<compile_context>
chip_gen: v5e
topology: v5e:2x2
jax: 0.10.0
libtpu: 0.0.40
codegen_flags: <defaults>
</compile_context>

<pallas_src>
import functools
import math

import jax
import jax.numpy as jnp
from jax import lax
from jax.experimental import pallas as pl
from jax.experimental.pallas import tpu as pltpu

EPS = 1e-5                      # LayerNorm / BatchNorm eps (PyTorch default)
COMPUTE_DTYPE = jnp.bfloat16    # MXU operand dtype (f32 accumulation everywhere);
                                # set to jnp.float32 for bit-faithful f32 matmuls.


def _layernorm(x, g, b):
    mu = jnp.mean(x, axis=-1, keepdims=True)
    var = jnp.mean(jnp.square(x - mu), axis=-1, keepdims=True)
    return (x - mu) * lax.rsqrt(var + EPS) * g + b


# ---------------------------------------------------------------------------
# Kernel 1: the whole PreLN encoder stack.
# grid = (B, n_layer).  Per-layer weights are streamed by BlockSpec (leading L
# axis squeezed away); the activation block lives in the output VMEM buffer
# across the layer axis, so layers never round-trip HBM.
# ---------------------------------------------------------------------------
def encoder_stack_kernel(x_ref, mask_ref,
                         ln1g_ref, ln1b_ref, wqkv_ref, bqkv_ref, wo_ref, bo_ref,
                         ln2g_ref, ln2b_ref, w1_ref, b1_ref, w2_ref, b2_ref,
                         out_ref, *, n_head):
    layer = pl.program_id(1)

    @pl.when(layer == 0)
    def _load_input():
        out_ref[...] = x_ref[...]

    _, S, E = out_ref.shape
    H = n_head
    Dh = E // H
    scale = 1.0 / math.sqrt(Dh)
    cdt = COMPUTE_DTYPE

    x = out_ref[...]                       # (1, S, E) VMEM-resident activations
    mask = mask_ref[...]                   # (1, 1, S) additive key-padding mask

    # ---- pre-LN + fused QKV projection: one (S, 3E) matmul ----
    xn = _layernorm(x, ln1g_ref[...], ln1b_ref[...]).reshape(S, E)
    qkv = jnp.dot(xn.astype(cdt), wqkv_ref[...],
                  preferred_element_type=jnp.float32) + bqkv_ref[...]      # (S, 3E)

    # Head-major (H, S, Dh) views: cheap major-axis stack of static lane slices.
    def split_heads(col0):
        return jnp.stack(
            [qkv[:, col0 + h * Dh: col0 + (h + 1) * Dh] for h in range(H)], axis=0)

    q = split_heads(0) * scale
    k = split_heads(E)
    v = split_heads(2 * E)

    # ---- attention: one batched contraction for scores, one for context ----
    s = jnp.einsum('hqd,hkd->hqk', q.astype(cdt), k.astype(cdt),
                   preferred_element_type=jnp.float32)                     # (H, S, S)
    s = s + mask                           # mask padded keys for every head/query
    m = jnp.max(s, axis=-1, keepdims=True)
    p = jnp.exp(s - m)
    p = p * pl.reciprocal(jnp.sum(p, axis=-1, keepdims=True), approx=True)
    ctx = jnp.einsum('hqk,hkd->hqd', p.astype(cdt), v.astype(cdt),
                     preferred_element_type=jnp.float32)                   # (H, S, Dh)

    # ---- output projection: blocked form of concat(heads) @ Wo (no scratch) ----
    attn = bo_ref[...]                                                     # (1, E)
    for h in range(H):
        attn = attn + jnp.dot(ctx[h].astype(cdt), wo_ref[h],
                              preferred_element_type=jnp.float32)
    x = x + attn.reshape(1, S, E)          # attn_dropout == identity (eval)

    # ---- pre-LN + FFN ----
    xn = _layernorm(x, ln2g_ref[...], ln2b_ref[...]).reshape(S, E)
    h1 = jnp.dot(xn.astype(cdt), w1_ref[...],
                 preferred_element_type=jnp.float32) + b1_ref[...]
    h1 = jnp.maximum(h1, 0.0)
    h2 = jnp.dot(h1.astype(cdt), w2_ref[...],
                 preferred_element_type=jnp.float32) + b2_ref[...]
    out_ref[...] = x + h2.reshape(1, S, E)  # FFN dropouts == identity (eval)


# ---------------------------------------------------------------------------
# Kernel 2: LayerNorm -> LSTM -> residual -> (last-step gather, masked max-pool)
#           -> bn_layer + ReLU -> Output_DMLP, all fused (feat stays in VMEM).
# ---------------------------------------------------------------------------
def lstm_mlp_head_kernel(x_ref, lens_ref, lng_ref, lnb_ref,
                         wih_ref, whh_ref, bg_ref,
                         bn0s_ref, bn0b_ref,
                         w1_ref, b1_ref, bn1s_ref, bn1b_ref,
                         w2_ref, b2_ref, bn2s_ref, bn2b_ref,
                         w3_ref, b3_ref, out_ref):
    B, S, E = x_ref.shape
    cdt = COMPUTE_DTYPE

    x = x_ref[...]                                   # (B, S, E)
    lens = lens_ref[...]                             # (B, 1) int32

    # LayerNorm, then the LSTM input projection hoisted out of the recurrence:
    # one (B*S, 4E) matmul covers every timestep (b_ih + b_hh folded in wrapper).
    xn = _layernorm(x, lng_ref[...], lnb_ref[...]).reshape(B * S, E)
    gates_in = (jnp.dot(xn.astype(cdt), wih_ref[...],
                        preferred_element_type=jnp.float32)
                + bg_ref[...]).reshape(B, S, 4 * E)

    whh = whh_ref[...]
    h = jnp.zeros((B, E), jnp.float32)
    c = jnp.zeros((B, E), jnp.float32)
    last = jnp.zeros((B, E), jnp.float32)            # out1: last valid timestep
    mx = jnp.full((B, E), -1e30, jnp.float32)        # out2: masked max-pool

    # Short sequential recurrence, statically unrolled (S is small & static);
    # only the recurrent h @ Whh matmul remains inside the loop.
    for t in range(S):
        g = gates_in[:, t, :] + jnp.dot(h.astype(cdt), whh,
                                        preferred_element_type=jnp.float32)
        i = jax.nn.sigmoid(g[:, 0 * E:1 * E])        # PyTorch gate order: i, f, g, o
        f = jax.nn.sigmoid(g[:, 1 * E:2 * E])
        gg = jnp.tanh(g[:, 2 * E:3 * E])
        o = jax.nn.sigmoid(g[:, 3 * E:4 * E])
        c = f * c + i * gg
        h = o * jnp.tanh(c)
        r = x[:, t, :] + h                           # residual (dropout1 == identity)
        last = jnp.where(lens == t + 1, r, last)
        mx = jnp.maximum(mx, jnp.where(lens > t, r, -1e30))

    # bn_layer + ReLU on cat(out1, out2) and Output_DMLP.  The concat stays
    # implicit: the folded-BN scale/shift and the first MLP matmul are split
    # into the out1 / out2 halves (no lane relayout, no scratch).
    bn0s = bn0s_ref[...]
    bn0b = bn0b_ref[...]
    za = jnp.maximum(last * bn0s[:, :E] + bn0b[:, :E], 0.0)
    zb = jnp.maximum(mx * bn0s[:, E:] + bn0b[:, E:], 0.0)
    w1 = w1_ref[...]                                 # (2E, 8E)
    z = (jnp.dot(za.astype(cdt), w1[:E, :], preferred_element_type=jnp.float32)
         + jnp.dot(zb.astype(cdt), w1[E:, :], preferred_element_type=jnp.float32)
         + b1_ref[...])
    z = jnp.maximum(z * bn1s_ref[...] + bn1b_ref[...], 0.0)
    z = jnp.dot(z.astype(cdt), w2_ref[...],
                preferred_element_type=jnp.float32) + b2_ref[...]
    z = jnp.maximum(z * bn2s_ref[...] + bn2b_ref[...], 0.0)
    out_ref[...] = jnp.dot(z.astype(cdt), w3_ref[...],
                           preferred_element_type=jnp.float32) + b3_ref[...]


# ---------------------------------------------------------------------------
# Wrappers
# ---------------------------------------------------------------------------
def encoder_stack(x, mask_add, p, n_head):
    B, S, E = x.shape
    L = p['ln1_g'].shape[0]
    I = p['w1'].shape[-1]
    H = n_head
    Dh = E // H

    def act_spec():
        return pl.BlockSpec((1, S, E), lambda b, l: (b, 0, 0))

    def layer_spec(*trailing):
        trailing = tuple(trailing)
        return pl.BlockSpec((None,) + trailing,
                            lambda b, l: (l,) + (0,) * len(trailing))

    in_specs = [
        act_spec(),                                        # x (read once per batch block)
        pl.BlockSpec((1, 1, S), lambda b, l: (b, 0, 0)),   # additive key-padding mask
        layer_spec(1, E), layer_spec(1, E),                # ln1 gamma / beta
        layer_spec(E, 3 * E), layer_spec(1, 3 * E),        # fused Wqkv, bqkv
        layer_spec(H, Dh, E), layer_spec(1, E),            # head-sliced Wo, bo
        layer_spec(1, E), layer_spec(1, E),                # ln2 gamma / beta
        layer_spec(E, I), layer_spec(1, I),                # FFN W1, b1
        layer_spec(I, E), layer_spec(1, E),                # FFN W2, b2
    ]

    wsize = jnp.dtype(COMPUTE_DTYPE).itemsize
    flops = 2 * B * L * S * (3 * E * E + 2 * S * E + E * E + 2 * E * I)
    bytes_accessed = (B * L * ((4 * E * E + 2 * E * I) * wsize + (8 * E + I) * 4)
                      + 2 * B * S * E * 4)

    return pl.pallas_call(
        functools.partial(encoder_stack_kernel, n_head=n_head),
        grid=(B, L),
        in_specs=in_specs,
        out_specs=pl.BlockSpec((1, S, E), lambda b, l: (b, 0, 0)),
        out_shape=jax.ShapeDtypeStruct((B, S, E), jnp.float32),
        compiler_params=pltpu.CompilerParams(
            dimension_semantics=("parallel", "arbitrary")),
        cost_estimate=pl.CostEstimate(flops=flops,
                                      transcendentals=B * L * H * S * S,
                                      bytes_accessed=bytes_accessed),
    )(x, mask_add,
      p['ln1_g'], p['ln1_b'], p['wqkv'], p['bqkv'], p['wo'], p['bo'],
      p['ln2_g'], p['ln2_b'], p['w1'], p['b1'], p['w2'], p['b2'])


def lstm_mlp_head(x, lens2d, p):
    B, S, E = x.shape
    out_size = p['w3'].shape[-1]
    D = 2 * E
    args = (x, lens2d, p['ln_g'], p['ln_b'],
            p['wih'], p['whh'], p['b_gates'],
            p['bn0_s'], p['bn0_b'],
            p['w1'], p['b1'], p['bn1_s'], p['bn1_b'],
            p['w2'], p['b2'], p['bn2_s'], p['bn2_b'],
            p['w3'], p['b3'])
    wsize = jnp.dtype(COMPUTE_DTYPE).itemsize
    flops = 16 * B * S * E * E + 2 * B * (8 * D * D + D * out_size)
    bytes_accessed = ((8 * E * E + 8 * D * D + D * out_size) * wsize
                      + B * S * E * 4 + B * out_size * 4)
    return pl.pallas_call(
        lstm_mlp_head_kernel,
        out_shape=jax.ShapeDtypeStruct((B, out_size), jnp.float32),
        in_specs=[pl.BlockSpec(memory_space=pltpu.MemorySpace.VMEM) for _ in args],
        out_specs=pl.BlockSpec(memory_space=pltpu.MemorySpace.VMEM),
        cost_estimate=pl.CostEstimate(flops=flops,
                                      transcendentals=5 * B * S * E,
                                      bytes_accessed=bytes_accessed),
    )(*args)


def final_preln_transformer_forward(params, x, inp_len, n_head):
    B, S, E = x.shape
    pos = jnp.arange(S, dtype=jnp.int32)
    # key_padding_mask: additive 0 / -1e30 on padded key positions.
    mask_add = jnp.where(pos[None, :] < inp_len[:, None], 0.0, -1e30)
    mask_add = mask_add.astype(jnp.float32).reshape(B, 1, S)
    x = encoder_stack(x, mask_add, params['enc'], n_head)
    lens2d = inp_len.astype(jnp.int32).reshape(B, 1)
    return lstm_mlp_head(x, lens2d, params['head'])


# ---------------------------------------------------------------------------
# Deterministic synthetic parameters (shapes match the PyTorch module)
# ---------------------------------------------------------------------------
def init_params(key, embed_size, n_layer, n_head, out_size, intermediate_size=2048):
    E, I, H = embed_size, intermediate_size, n_head
    Dh = E // H
    keys = iter(jax.random.split(key, 8 * n_layer + 16))

    def rnd(shape, scale=0.05):
        return scale * jax.random.normal(next(keys), shape, jnp.float32)

    wdt = COMPUTE_DTYPE

    ln1_g, ln1_b, wqkv, bqkv, wo, bo = [], [], [], [], [], []
    ln2_g, ln2_b, w1, b1, w2, b2 = [], [], [], [], [], []
    for _ in range(n_layer):
        ipw = rnd((3 * E, E))            # nn.MultiheadAttention.in_proj_weight
        ipb = rnd((3 * E,))
        ow = rnd((E, E))                 # out_proj.weight
        ln1_g.append(jnp.ones((1, E), jnp.float32))
        ln1_b.append(jnp.zeros((1, E), jnp.float32))
        wqkv.append(ipw.T.astype(wdt))                   # (E, 3E), columns [Q|K|V]
        bqkv.append(ipb.reshape(1, 3 * E))
        wo.append(ow.T.reshape(H, Dh, E).astype(wdt))    # head-sliced rows of Wo
        bo.append(rnd((E,)).reshape(1, E))
        ln2_g.append(jnp.ones((1, E), jnp.float32))
        ln2_b.append(jnp.zeros((1, E), jnp.float32))
        w1.append(rnd((I, E)).T.astype(wdt))
        b1.append(rnd((I,)).reshape(1, I))
        w2.append(rnd((E, I)).T.astype(wdt))
        b2.append(rnd((E,)).reshape(1, E))

    enc = dict(
        ln1_g=jnp.stack(ln1_g), ln1_b=jnp.stack(ln1_b),
        wqkv=jnp.stack(wqkv), bqkv=jnp.stack(bqkv),
        wo=jnp.stack(wo), bo=jnp.stack(bo),
        ln2_g=jnp.stack(ln2_g), ln2_b=jnp.stack(ln2_b),
        w1=jnp.stack(w1), b1=jnp.stack(b1),
        w2=jnp.stack(w2), b2=jnp.stack(b2),
    )

    D = 2 * E

    def bn_fold(dim):
        # Freshly initialised BatchNorm (eval): gamma=1, beta=0, mean=0, var=1.
        g = jnp.ones((1, dim), jnp.float32)
        b = jnp.zeros((1, dim), jnp.float32)
        m = jnp.zeros((1, dim), jnp.float32)
        v = jnp.ones((1, dim), jnp.float32)
        s = g / jnp.sqrt(v + EPS)
        return s, b - m * s

    bn0_s, bn0_b = bn_fold(D)
    bn1_s, bn1_b = bn_fold(4 * D)
    bn2_s, bn2_b = bn_fold(D)
    head = dict(
        ln_g=jnp.ones((1, E), jnp.float32), ln_b=jnp.zeros((1, E), jnp.float32),
        wih=rnd((4 * E, E)).T.astype(wdt),                  # gate order: i, f, g, o
        whh=rnd((4 * E, E)).T.astype(wdt),
        b_gates=(rnd((4 * E,)) + rnd((4 * E,))).reshape(1, 4 * E),   # b_ih + b_hh
        bn0_s=bn0_s, bn0_b=bn0_b,
        w1=rnd((4 * D, D)).T.astype(wdt), b1=rnd((4 * D,)).reshape(1, 4 * D),
        bn1_s=bn1_s, bn1_b=bn1_b,
        w2=rnd((D, 4 * D)).T.astype(wdt), b2=rnd((D,)).reshape(1, D),
        bn2_s=bn2_s, bn2_b=bn2_b,
        w3=rnd((out_size, D)).T.astype(wdt), b3=rnd((out_size,)).reshape(1, out_size),
    )
    return dict(enc=enc, head=head)


if __name__ == "__main__":
    B, S, E = 2, 8, 32            # batch, seq, embed_size
    n_layer, n_head, out_size = 2, 4, 4

    key = jax.random.PRNGKey(0)
    kx, kp = jax.random.split(key)
    x = jax.random.normal(kx, (B, S, E), jnp.float32)
    inp_len = jnp.array([8, 5], dtype=jnp.int32)

    params = init_params(kp, E, n_layer, n_head, out_size)
    fwd = jax.jit(functools.partial(final_preln_transformer_forward, n_head=n_head))
    out = jax.block_until_ready(fwd(params, x, inp_len))
    assert out.shape == (B, out_size)
    assert bool(jnp.all(jnp.isfinite(out)))
    print("KERNEL_OK")
</pallas_src>

<mosaic_0001>
module attributes {stable_mosaic.version = 11 : i64} {
  func.func @encoder_stack_kernel(%arg0: i32, %arg1: i32, %arg2: memref<1x8x32xf32, #tpu.memory_space<vmem>>, %arg3: memref<1x1x8xf32, #tpu.memory_space<vmem>>, %arg4: memref<1x1x32xf32, #tpu.memory_space<vmem>>, %arg5: memref<1x1x32xf32, #tpu.memory_space<vmem>>, %arg6: memref<1x32x96xbf16, #tpu.memory_space<vmem>>, %arg7: memref<1x1x96xf32, #tpu.memory_space<vmem>>, %arg8: memref<1x4x8x32xbf16, #tpu.memory_space<vmem>>, %arg9: memref<1x1x32xf32, #tpu.memory_space<vmem>>, %arg10: memref<1x1x32xf32, #tpu.memory_space<vmem>>, %arg11: memref<1x1x32xf32, #tpu.memory_space<vmem>>, %arg12: memref<1x32x2048xbf16, #tpu.memory_space<vmem>>, %arg13: memref<1x1x2048xf32, #tpu.memory_space<vmem>>, %arg14: memref<1x2048x32xbf16, #tpu.memory_space<vmem>>, %arg15: memref<1x1x32xf32, #tpu.memory_space<vmem>>, %arg16: memref<1x8x32xf32, #tpu.memory_space<vmem>>) attributes {dimension_semantics = [#tpu.dimension_semantics<parallel>, #tpu.dimension_semantics<arbitrary>], iteration_bounds = array<i64: 2, 2>, scalar_prefetch = 0 : i64, scratch_operands = 0 : i64, tpu.core_type = #tpu.core_type<tc>, window_params = [{transform_indices = @transform_0, window_bounds = array<i64: 1, 8, 32>}, {transform_indices = @transform_1, window_bounds = array<i64: 1, 1, 8>}, {transform_indices = @transform_2, window_bounds = array<i64: 1, 1, 32>}, {transform_indices = @transform_3, window_bounds = array<i64: 1, 1, 32>}, {transform_indices = @transform_4, window_bounds = array<i64: 1, 32, 96>}, {transform_indices = @transform_5, window_bounds = array<i64: 1, 1, 96>}, {transform_indices = @transform_6, window_bounds = array<i64: 1, 4, 8, 32>}, {transform_indices = @transform_7, window_bounds = array<i64: 1, 1, 32>}, {transform_indices = @transform_8, window_bounds = array<i64: 1, 1, 32>}, {transform_indices = @transform_9, window_bounds = array<i64: 1, 1, 32>}, {transform_indices = @transform_10, window_bounds = array<i64: 1, 32, 2048>}, {transform_indices = @transform_11, window_bounds = array<i64: 1, 1, 2048>}, {transform_indices = @transform_12, window_bounds = array<i64: 1, 2048, 32>}, {transform_indices = @transform_13, window_bounds = array<i64: 1, 1, 32>}, {transform_indices = @transform_14, window_bounds = array<i64: 1, 8, 32>}]} {
    %c0_i32 = arith.constant 0 : i32
    %0 = arith.cmpi eq, %arg1, %c0_i32 : i32
    %1 = arith.extui %0 : i1 to i32
    %c0_i32_0 = arith.constant 0 : i32
    %2 = arith.cmpi ne, %1, %c0_i32_0 : i32
    scf.if %2 {
      %c0_77 = arith.constant 0 : index
      %c0_78 = arith.constant 0 : index
      %c0_79 = arith.constant 0 : index
      %172 = vector.load %arg2[%c0_77, %c0_78, %c0_79] : memref<1x8x32xf32, #tpu.memory_space<vmem>>, vector<1x8x32xf32>
      %c0_80 = arith.constant 0 : index
      %c0_81 = arith.constant 0 : index
      %c0_82 = arith.constant 0 : index
      %173 = vector.load %arg16[%c0_80, %c0_81, %c0_82] : memref<1x8x32xf32, #tpu.memory_space<vmem>>, vector<1x8x32xf32>
      tpu.vector_store %arg16[%c0_80, %c0_81, %c0_82], %172 {strides = array<i32>} : memref<1x8x32xf32, #tpu.memory_space<vmem>>, vector<1x8x32xf32>,
    } else {
    }
    %c0 = arith.constant 0 : index
    %c0_1 = arith.constant 0 : index
    %c0_2 = arith.constant 0 : index
    %3 = vector.load %arg16[%c0, %c0_1, %c0_2] : memref<1x8x32xf32, #tpu.memory_space<vmem>>, vector<1x8x32xf32>
    %c0_3 = arith.constant 0 : index
    %c0_4 = arith.constant 0 : index
    %c0_5 = arith.constant 0 : index
    %4 = vector.load %arg3[%c0_3, %c0_4, %c0_5] : memref<1x1x8xf32, #tpu.memory_space<vmem>>, vector<1x1x8xf32>
    %c0_6 = arith.constant 0 : index
    %c0_7 = arith.constant 0 : index
    %c0_8 = arith.constant 0 : index
    %5 = vector.load %arg4[%c0_6, %c0_7, %c0_8] : memref<1x1x32xf32, #tpu.memory_space<vmem>>, vector<1x1x32xf32>
    %6 = vector.shape_cast %5 : vector<1x1x32xf32> to vector<1x32xf32>
    %c0_9 = arith.constant 0 : index
    %c0_10 = arith.constant 0 : index
    %c0_11 = arith.constant 0 : index
    %7 = vector.load %arg5[%c0_9, %c0_10, %c0_11] : memref<1x1x32xf32, #tpu.memory_space<vmem>>, vector<1x1x32xf32>
    %8 = vector.shape_cast %7 : vector<1x1x32xf32> to vector<1x32xf32>
    %cst = arith.constant dense<0.000000e+00> : vector<1x8xf32>
    %9 = vector.multi_reduction <add>, %3, %cst [2] : vector<1x8x32xf32> to vector<1x8xf32>
    %10 = vector.shape_cast %9 : vector<1x8xf32> to vector<1x8x1xf32>
    %cst_12 = arith.constant 3.200000e+01 : f32
    %11 = vector.broadcast %cst_12 : f32 to vector<1x8x1xf32>
    %12 = arith.divf %10, %11 : vector<1x8x1xf32>
    %13 = vector.broadcast %12 : vector<1x8x1xf32> to vector<1x8x32xf32>
    %14 = arith.subf %3, %13 : vector<1x8x32xf32>
    %15 = arith.mulf %14, %14 : vector<1x8x32xf32>
    %cst_13 = arith.constant dense<0.000000e+00> : vector<1x8xf32>
    %16 = vector.multi_reduction <add>, %15, %cst_13 [2] : vector<1x8x32xf32> to vector<1x8xf32>
    %17 = vector.shape_cast %16 : vector<1x8xf32> to vector<1x8x1xf32>
    %cst_14 = arith.constant 3.200000e+01 : f32
    %18 = vector.broadcast %cst_14 : f32 to vector<1x8x1xf32>
    %19 = arith.divf %17, %18 : vector<1x8x1xf32>
    %20 = vector.broadcast %12 : vector<1x8x1xf32> to vector<1x8x32xf32>
    %21 = arith.subf %3, %20 : vector<1x8x32xf32>
    %cst_15 = arith.constant 9.99999974E-6 : f32
    %22 = vector.broadcast %cst_15 : f32 to vector<1x8x1xf32>
    %23 = arith.addf %19, %22 : vector<1x8x1xf32>
    %24 = math.rsqrt %23 : vector<1x8x1xf32>
    %25 = vector.broadcast %24 : vector<1x8x1xf32> to vector<1x8x32xf32>
    %26 = arith.mulf %21, %25 : vector<1x8x32xf32>
    %27 = vector.shape_cast %6 : vector<1x32xf32> to vector<1x1x32xf32>
    %28 = vector.broadcast %27 : vector<1x1x32xf32> to vector<1x8x32xf32>
    %29 = arith.mulf %26, %28 : vector<1x8x32xf32>
    %30 = vector.shape_cast %8 : vector<1x32xf32> to vector<1x1x32xf32>
    %31 = vector.broadcast %30 : vector<1x1x32xf32> to vector<1x8x32xf32>
    %32 = arith.addf %29, %31 : vector<1x8x32xf32>
    %33 = vector.shape_cast %32 : vector<1x8x32xf32> to vector<8x32xf32>
    %34 = arith.truncf %33 : vector<8x32xf32> to vector<8x32xbf16>
    %c0_16 = arith.constant 0 : index
    %c0_17 = arith.constant 0 : index
    %c0_18 = arith.constant 0 : index
    %35 = vector.load %arg6[%c0_16, %c0_17, %c0_18] : memref<1x32x96xbf16, #tpu.memory_space<vmem>>, vector<1x32x96xbf16>
    %36 = vector.shape_cast %35 : vector<1x32x96xbf16> to vector<32x96xbf16>
    %cst_19 = arith.constant dense<0.000000e+00> : vector<8x96xf32>
    %37 = tpu.matmul %34, %36, %cst_19 {dimension_numbers = #tpu.dot_dimension_numbers<[1], [0], [0], [1], [0, 0, 1, 1], [], []>} : vector<8x32xbf16>, vector<32x96xbf16>, vector<8x96xf32> -> vector<8x96xf32>
    %c0_20 = arith.constant 0 : index
    %c0_21 = arith.constant 0 : index
    %c0_22 = arith.constant 0 : index
    %38 = vector.load %arg7[%c0_20, %c0_21, %c0_22] : memref<1x1x96xf32, #tpu.memory_space<vmem>>, vector<1x1x96xf32>
    %39 = vector.shape_cast %38 : vector<1x1x96xf32> to vector<1x96xf32>
    %40 = vector.broadcast %39 : vector<1x96xf32> to vector<8x96xf32>
    %41 = arith.addf %37, %40 : vector<8x96xf32>
    %42 = vector.extract_strided_slice %41 {offsets = [0, 0], sizes = [8, 8], strides = [1, 1]} : vector<8x96xf32> to vector<8x8xf32>
    %43 = vector.extract_strided_slice %41 {offsets = [0, 8], sizes = [8, 8], strides = [1, 1]} : vector<8x96xf32> to vector<8x8xf32>
    %44 = vector.extract_strided_slice %41 {offsets = [0, 16], sizes = [8, 8], strides = [1, 1]} : vector<8x96xf32> to vector<8x8xf32>
    %45 = vector.extract_strided_slice %41 {offsets = [0, 24], sizes = [8, 8], strides = [1, 1]} : vector<8x96xf32> to vector<8x8xf32>
    %46 = vector.shape_cast %42 : vector<8x8xf32> to vector<1x8x8xf32>
    %47 = vector.shape_cast %43 : vector<8x8xf32> to vector<1x8x8xf32>
    %48 = vector.shape_cast %44 : vector<8x8xf32> to vector<1x8x8xf32>
    %49 = vector.shape_cast %45 : vector<8x8xf32> to vector<1x8x8xf32>
    %50 = tpu.concatenate %46, %47, %48, %49 in 0 : vector<1x8x8xf32>, vector<1x8x8xf32>, vector<1x8x8xf32>, vector<1x8x8xf32> -> vector<4x8x8xf32>
    %cst_23 = arith.constant 0.353553385 : f32
    %51 = vector.broadcast %cst_23 : f32 to vector<4x8x8xf32>
    %52 = arith.mulf %50, %51 : vector<4x8x8xf32>
    %53 = vector.extract_strided_slice %41 {offsets = [0, 32], sizes = [8, 8], strides = [1, 1]} : vector<8x96xf32> to vector<8x8xf32>
    %54 = vector.extract_strided_slice %41 {offsets = [0, 40], sizes = [8, 8], strides = [1, 1]} : vector<8x96xf32> to vector<8x8xf32>
    %55 = vector.extract_strided_slice %41 {offsets = [0, 48], sizes = [8, 8], strides = [1, 1]} : vector<8x96xf32> to vector<8x8xf32>
    %56 = vector.extract_strided_slice %41 {offsets = [0, 56], sizes = [8, 8], strides = [1, 1]} : vector<8x96xf32> to vector<8x8xf32>
    %57 = vector.shape_cast %53 : vector<8x8xf32> to vector<1x8x8xf32>
    %58 = vector.shape_cast %54 : vector<8x8xf32> to vector<1x8x8xf32>
    %59 = vector.shape_cast %55 : vector<8x8xf32> to vector<1x8x8xf32>
    %60 = vector.shape_cast %56 : vector<8x8xf32> to vector<1x8x8xf32>
    %61 = tpu.concatenate %57, %58, %59, %60 in 0 : vector<1x8x8xf32>, vector<1x8x8xf32>, vector<1x8x8xf32>, vector<1x8x8xf32> -> vector<4x8x8xf32>
    %62 = vector.extract_strided_slice %41 {offsets = [0, 64], sizes = [8, 8], strides = [1, 1]} : vector<8x96xf32> to vector<8x8xf32>
    %63 = vector.extract_strided_slice %41 {offsets = [0, 72], sizes = [8, 8], strides = [1, 1]} : vector<8x96xf32> to vector<8x8xf32>
    %64 = vector.extract_strided_slice %41 {offsets = [0, 80], sizes = [8, 8], strides = [1, 1]} : vector<8x96xf32> to vector<8x8xf32>
    %65 = vector.extract_strided_slice %41 {offsets = [0, 88], sizes = [8, 8], strides = [1, 1]} : vector<8x96xf32> to vector<8x8xf32>
    %66 = vector.shape_cast %62 : vector<8x8xf32> to vector<1x8x8xf32>
    %67 = vector.shape_cast %63 : vector<8x8xf32> to vector<1x8x8xf32>
    %68 = vector.shape_cast %64 : vector<8x8xf32> to vector<1x8x8xf32>
    %69 = vector.shape_cast %65 : vector<8x8xf32> to vector<1x8x8xf32>
    %70 = tpu.concatenate %66, %67, %68, %69 in 0 : vector<1x8x8xf32>, vector<1x8x8xf32>, vector<1x8x8xf32>, vector<1x8x8xf32> -> vector<4x8x8xf32>
    %71 = arith.truncf %52 : vector<4x8x8xf32> to vector<4x8x8xbf16>
    %72 = arith.truncf %61 : vector<4x8x8xf32> to vector<4x8x8xbf16>
    "tpu.trace_start"() <{level = 10 : i32, message = "hqd,hkd->hqk"}> : () -> ()
    %cst_24 = arith.constant dense<0.000000e+00> : vector<4x8x8xf32>
    %73 = tpu.matmul %71, %72, %cst_24 {dimension_numbers = #tpu.dot_dimension_numbers<[2], [2], [1], [1], [0, 0, 0, 1, 1, 1], [0], [0]>} : vector<4x8x8xbf16>, vector<4x8x8xbf16>, vector<4x8x8xf32> -> vector<4x8x8xf32>
    "tpu.trace_stop"() : () -> ()
    %74 = vector.broadcast %4 : vector<1x1x8xf32> to vector<4x8x8xf32>
    %75 = arith.addf %73, %74 : vector<4x8x8xf32>
    %cst_25 = arith.constant dense<0xFF800000> : vector<4x8xf32>
    %76 = vector.multi_reduction <maximumf>, %75, %cst_25 [2] : vector<4x8x8xf32> to vector<4x8xf32>
    %77 = vector.shape_cast %76 : vector<4x8xf32> to vector<4x8x1xf32>
    %78 = vector.broadcast %77 : vector<4x8x1xf32> to vector<4x8x8xf32>
    %79 = arith.subf %75, %78 : vector<4x8x8xf32>
    %80 = math.exp %79 : vector<4x8x8xf32>
    %cst_26 = arith.constant dense<0.000000e+00> : vector<4x8xf32>
    %81 = vector.multi_reduction <add>, %80, %cst_26 [2] : vector<4x8x8xf32> to vector<4x8xf32>
    %82 = vector.shape_cast %81 : vector<4x8xf32> to vector<4x8x1xf32>
    %83 = tpu.reciprocal %82 {approx = true} : vector<4x8x1xf32> -> vector<4x8x1xf32>
    %84 = vector.broadcast %83 : vector<4x8x1xf32> to vector<4x8x8xf32>
    %85 = arith.mulf %80, %84 : vector<4x8x8xf32>
    %86 = arith.truncf %85 : vector<4x8x8xf32> to vector<4x8x8xbf16>
    %87 = arith.truncf %70 : vector<4x8x8xf32> to vector<4x8x8xbf16>
    "tpu.trace_start"() <{level = 10 : i32, message = "hqk,hkd->hqd"}> : () -> ()
    %cst_27 = arith.constant dense<0.000000e+00> : vector<4x8x8xf32>
    %88 = tpu.matmul %86, %87, %cst_27 {dimension_numbers = #tpu.dot_dimension_numbers<[2], [1], [1], [2], [0, 0, 0, 1, 1, 2], [0], [0]>} : vector<4x8x8xbf16>, vector<4x8x8xbf16>, vector<4x8x8xf32> -> vector<4x8x8xf32>
    "tpu.trace_stop"() : () -> ()
    %c0_28 = arith.constant 0 : index
    %c0_29 = arith.constant 0 : index
    %c0_30 = arith.constant 0 : index
    %89 = vector.load %arg9[%c0_28, %c0_29, %c0_30] : memref<1x1x32xf32, #tpu.memory_space<vmem>>, vector<1x1x32xf32>
    %90 = vector.shape_cast %89 : vector<1x1x32xf32> to vector<1x32xf32>
    %91 = vector.extract_strided_slice %88 {offsets = [0, 0, 0], sizes = [1, 8, 8], strides = [1, 1, 1]} : vector<4x8x8xf32> to vector<1x8x8xf32>
    %92 = vector.shape_cast %91 : vector<1x8x8xf32> to vector<8x8xf32>
    %93 = arith.truncf %92 : vector<8x8xf32> to vector<8x8xbf16>
    %c0_31 = arith.constant 0 : index
    %c0_32 = arith.constant 0 : index
    %c0_33 = arith.constant 0 : index
    %c0_34 = arith.constant 0 : index
    %94 = vector.load %arg8[%c0_31, %c0_32, %c0_33, %c0_34] : memref<1x4x8x32xbf16, #tpu.memory_space<vmem>>, vector<1x1x8x32xbf16>
    %95 = vector.shape_cast %94 : vector<1x1x8x32xbf16> to vector<8x32xbf16>
    %cst_35 = arith.constant dense<0.000000e+00> : vector<8x32xf32>
    %96 = tpu.matmul %93, %95, %cst_35 {dimension_numbers = #tpu.dot_dimension_numbers<[1], [0], [0], [1], [0, 0, 1, 1], [], []>} : vector<8x8xbf16>, vector<8x32xbf16>, vector<8x32xf32> -> vector<8x32xf32>
    %97 = vector.broadcast %90 : vector<1x32xf32> to vector<8x32xf32>
    %98 = arith.addf %97, %96 : vector<8x32xf32>
    %99 = vector.extract_strided_slice %88 {offsets = [1, 0, 0], sizes = [1, 8, 8], strides = [1, 1, 1]} : vector<4x8x8xf32> to vector<1x8x8xf32>
    %100 = vector.shape_cast %99 : vector<1x8x8xf32> to vector<8x8xf32>
    %101 = arith.truncf %100 : vector<8x8xf32> to vector<8x8xbf16>
    %c0_36 = arith.constant 0 : index
    %c1 = arith.constant 1 : index
    %c0_37 = arith.constant 0 : index
    %c0_38 = arith.constant 0 : index
    %102 = vector.load %arg8[%c0_36, %c1, %c0_37, %c0_38] : memref<1x4x8x32xbf16, #tpu.memory_space<vmem>>, vector<1x1x8x32xbf16>
    %103 = vector.shape_cast %102 : vector<1x1x8x32xbf16> to vector<8x32xbf16>
    %cst_39 = arith.constant dense<0.000000e+00> : vector<8x32xf32>
    %104 = tpu.matmul %101, %103, %cst_39 {dimension_numbers = #tpu.dot_dimension_numbers<[1], [0], [0], [1], [0, 0, 1, 1], [], []>} : vector<8x8xbf16>, vector<8x32xbf16>, vector<8x32xf32> -> vector<8x32xf32>
    %105 = arith.addf %98, %104 : vector<8x32xf32>
    %106 = vector.extract_strided_slice %88 {offsets = [2, 0, 0], sizes = [1, 8, 8], strides = [1, 1, 1]} : vector<4x8x8xf32> to vector<1x8x8xf32>
    %107 = vector.shape_cast %106 : vector<1x8x8xf32> to vector<8x8xf32>
    %108 = arith.truncf %107 : vector<8x8xf32> to vector<8x8xbf16>
    %c0_40 = arith.constant 0 : index
    %c2 = arith.constant 2 : index
    %c0_41 = arith.constant 0 : index
    %c0_42 = arith.constant 0 : index
    %109 = vector.load %arg8[%c0_40, %c2, %c0_41, %c0_42] : memref<1x4x8x32xbf16, #tpu.memory_space<vmem>>, vector<1x1x8x32xbf16>
    %110 = vector.shape_cast %109 : vector<1x1x8x32xbf16> to vector<8x32xbf16>
    %cst_43 = arith.constant dense<0.000000e+00> : vector<8x32xf32>
    %111 = tpu.matmul %108, %110, %cst_43 {dimension_numbers = #tpu.dot_dimension_numbers<[1], [0], [0], [1], [0, 0, 1, 1], [], []>} : vector<8x8xbf16>, vector<8x32xbf16>, vector<8x32xf32> -> vector<8x32xf32>
    %112 = arith.addf %105, %111 : vector<8x32xf32>
    %113 = vector.extract_strided_slice %88 {offsets = [3, 0, 0], sizes = [1, 8, 8], strides = [1, 1, 1]} : vector<4x8x8xf32> to vector<1x8x8xf32>
    %114 = vector.shape_cast %113 : vector<1x8x8xf32> to vector<8x8xf32>
    %115 = arith.truncf %114 : vector<8x8xf32> to vector<8x8xbf16>
    %c0_44 = arith.constant 0 : index
    %c3 = arith.constant 3 : index
    %c0_45 = arith.constant 0 : index
    %c0_46 = arith.constant 0 : index
    %116 = vector.load %arg8[%c0_44, %c3, %c0_45, %c0_46] : memref<1x4x8x32xbf16, #tpu.memory_space<vmem>>, vector<1x1x8x32xbf16>
    %117 = vector.shape_cast %116 : vector<1x1x8x32xbf16> to vector<8x32xbf16>
    %cst_47 = arith.constant dense<0.000000e+00> : vector<8x32xf32>
    %118 = tpu.matmul %115, %117, %cst_47 {dimension_numbers = #tpu.dot_dimension_numbers<[1], [0], [0], [1], [0, 0, 1, 1], [], []>} : vector<8x8xbf16>, vector<8x32xbf16>, vector<8x32xf32> -> vector<8x32xf32>
    %119 = arith.addf %112, %118 : vector<8x32xf32>
    %120 = vector.shape_cast %119 : vector<8x32xf32> to vector<1x8x32xf32>
    %121 = arith.addf %3, %120 : vector<1x8x32xf32>
    %c0_48 = arith.constant 0 : index
    %c0_49 = arith.constant 0 : index
    %c0_50 = arith.constant 0 : index
    %122 = vector.load %arg10[%c0_48, %c0_49, %c0_50] : memref<1x1x32xf32, #tpu.memory_space<vmem>>, vector<1x1x32xf32>
    %123 = vector.shape_cast %122 : vector<1x1x32xf32> to vector<1x32xf32>
    %c0_51 = arith.constant 0 : index
    %c0_52 = arith.constant 0 : index
    %c0_53 = arith.constant 0 : index
    %124 = vector.load %arg11[%c0_51, %c0_52, %c0_53] : memref<1x1x32xf32, #tpu.memory_space<vmem>>, vector<1x1x32xf32>
    %125 = vector.shape_cast %124 : vector<1x1x32xf32> to vector<1x32xf32>
    %cst_54 = arith.constant dense<0.000000e+00> : vector<1x8xf32>
    %126 = vector.multi_reduction <add>, %121, %cst_54 [2] : vector<1x8x32xf32> to vector<1x8xf32>
    %127 = vector.shape_cast %126 : vector<1x8xf32> to vector<1x8x1xf32>
    %cst_55 = arith.constant 3.200000e+01 : f32
    %128 = vector.broadcast %cst_55 : f32 to vector<1x8x1xf32>
    %129 = arith.divf %127, %128 : vector<1x8x1xf32>
    %130 = vector.broadcast %129 : vector<1x8x1xf32> to vector<1x8x32xf32>
    %131 = arith.subf %121, %130 : vector<1x8x32xf32>
    %132 = arith.mulf %131, %131 : vector<1x8x32xf32>
    %cst_56 = arith.constant dense<0.000000e+00> : vector<1x8xf32>
    %133 = vector.multi_reduction <add>, %132, %cst_56 [2] : vector<1x8x32xf32> to vector<1x8xf32>
    %134 = vector.shape_cast %133 : vector<1x8xf32> to vector<1x8x1xf32>
    %cst_57 = arith.constant 3.200000e+01 : f32
    %135 = vector.broadcast %cst_57 : f32 to vector<1x8x1xf32>
    %136 = arith.divf %134, %135 : vector<1x8x1xf32>
    %137 = vector.broadcast %129 : vector<1x8x1xf32> to vector<1x8x32xf32>
    %138 = arith.subf %121, %137 : vector<1x8x32xf32>
    %cst_58 = arith.constant 9.99999974E-6 : f32
    %139 = vector.broadcast %cst_58 : f32 to vector<1x8x1xf32>
    %140 = arith.addf %136, %139 : vector<1x8x1xf32>
    %141 = math.rsqrt %140 : vector<1x8x1xf32>
    %142 = vector.broadcast %141 : vector<1x8x1xf32> to vector<1x8x32xf32>
    %143 = arith.mulf %138, %142 : vector<1x8x32xf32>
    %144 = vector.shape_cast %123 : vector<1x32xf32> to vector<1x1x32xf32>
    %145 = vector.broadcast %144 : vector<1x1x32xf32> to vector<1x8x32xf32>
    %146 = arith.mulf %143, %145 : vector<1x8x32xf32>
    %147 = vector.shape_cast %125 : vector<1x32xf32> to vector<1x1x32xf32>
    %148 = vector.broadcast %147 : vector<1x1x32xf32> to vector<1x8x32xf32>
    %149 = arith.addf %146, %148 : vector<1x8x32xf32>
    %150 = vector.shape_cast %149 : vector<1x8x32xf32> to vector<8x32xf32>
    %151 = arith.truncf %150 : vector<8x32xf32> to vector<8x32xbf16>
    %c0_59 = arith.constant 0 : index
    %c0_60 = arith.constant 0 : index
    %c0_61 = arith.constant 0 : index
    %152 = vector.load %arg12[%c0_59, %c0_60, %c0_61] : memref<1x32x2048xbf16, #tpu.memory_space<vmem>>, vector<1x32x2048xbf16>
    %153 = vector.shape_cast %152 : vector<1x32x2048xbf16> to vector<32x2048xbf16>
    %cst_62 = arith.constant dense<0.000000e+00> : vector<8x2048xf32>
    %154 = tpu.matmul %151, %153, %cst_62 {dimension_numbers = #tpu.dot_dimension_numbers<[1], [0], [0], [1], [0, 0, 1, 1], [], []>} : vector<8x32xbf16>, vector<32x2048xbf16>, vector<8x2048xf32> -> vector<8x2048xf32>
    %c0_63 = arith.constant 0 : index
    %c0_64 = arith.constant 0 : index
    %c0_65 = arith.constant 0 : index
    %155 = vector.load %arg13[%c0_63, %c0_64, %c0_65] : memref<1x1x2048xf32, #tpu.memory_space<vmem>>, vector<1x1x2048xf32>
    %156 = vector.shape_cast %155 : vector<1x1x2048xf32> to vector<1x2048xf32>
    %157 = vector.broadcast %156 : vector<1x2048xf32> to vector<8x2048xf32>
    %158 = arith.addf %154, %157 : vector<8x2048xf32>
    %cst_66 = arith.constant 0.000000e+00 : f32
    %159 = vector.broadcast %cst_66 : f32 to vector<8x2048xf32>
    %160 = arith.maximumf %158, %159 : vector<8x2048xf32>
    %161 = arith.truncf %160 : vector<8x2048xf32> to vector<8x2048xbf16>
    %c0_67 = arith.constant 0 : index
    %c0_68 = arith.constant 0 : index
    %c0_69 = arith.constant 0 : index
    %162 = vector.load %arg14[%c0_67, %c0_68, %c0_69] : memref<1x2048x32xbf16, #tpu.memory_space<vmem>>, vector<1x2048x32xbf16>
    %163 = vector.shape_cast %162 : vector<1x2048x32xbf16> to vector<2048x32xbf16>
    %cst_70 = arith.constant dense<0.000000e+00> : vector<8x32xf32>
    %164 = tpu.matmul %161, %163, %cst_70 {dimension_numbers = #tpu.dot_dimension_numbers<[1], [0], [0], [1], [0, 0, 1, 1], [], []>} : vector<8x2048xbf16>, vector<2048x32xbf16>, vector<8x32xf32> -> vector<8x32xf32>
    %c0_71 = arith.constant 0 : index
    %c0_72 = arith.constant 0 : index
    %c0_73 = arith.constant 0 : index
    %165 = vector.load %arg15[%c0_71, %c0_72, %c0_73] : memref<1x1x32xf32, #tpu.memory_space<vmem>>, vector<1x1x32xf32>
    %166 = vector.shape_cast %165 : vector<1x1x32xf32> to vector<1x32xf32>
    %167 = vector.broadcast %166 : vector<1x32xf32> to vector<8x32xf32>
    %168 = arith.addf %164, %167 : vector<8x32xf32>
    %169 = vector.shape_cast %168 : vector<8x32xf32> to vector<1x8x32xf32>
    %170 = arith.addf %121, %169 : vector<1x8x32xf32>
    %c0_74 = arith.constant 0 : index
    %c0_75 = arith.constant 0 : index
    %c0_76 = arith.constant 0 : index
    %171 = vector.load %arg16[%c0_74, %c0_75, %c0_76] : memref<1x8x32xf32, #tpu.memory_space<vmem>>, vector<1x8x32xf32>
    tpu.vector_store %arg16[%c0_74, %c0_75, %c0_76], %170 {strides = array<i32>} : memref<1x8x32xf32, #tpu.memory_space<vmem>>, vector<1x8x32xf32>,
    return
  }
  func.func @transform_0(%arg0: i32, %arg1: i32) -> (i32, i32, i32) {
    %c0_i32 = arith.constant 0 : i32
    %c0_i32_0 = arith.constant 0 : i32
    %c0_i32_1 = arith.constant 0 : i32
    return %arg0, %c0_i32, %c0_i32_0 : i32, i32, i32
  }
  func.func @transform_1(%arg0: i32, %arg1: i32) -> (i32, i32, i32) {
    %c0_i32 = arith.constant 0 : i32
    %c0_i32_0 = arith.constant 0 : i32
    %c0_i32_1 = arith.constant 0 : i32
    return %arg0, %c0_i32, %c0_i32_0 : i32, i32, i32
  }
  func.func @transform_2(%arg0: i32, %arg1: i32) -> (i32, i32, i32) {
    %c0_i32 = arith.constant 0 : i32
    %c0_i32_0 = arith.constant 0 : i32
    %c0_i32_1 = arith.constant 0 : i32
    return %arg1, %c0_i32, %c0_i32_0 : i32, i32, i32
  }
  func.func @transform_3(%arg0: i32, %arg1: i32) -> (i32, i32, i32) {
    %c0_i32 = arith.constant 0 : i32
    %c0_i32_0 = arith.constant 0 : i32
    %c0_i32_1 = arith.constant 0 : i32
    return %arg1, %c0_i32, %c0_i32_0 : i32, i32, i32
  }
  func.func @transform_4(%arg0: i32, %arg1: i32) -> (i32, i32, i32) {
    %c0_i32 = arith.constant 0 : i32
    %c0_i32_0 = arith.constant 0 : i32
    %c0_i32_1 = arith.constant 0 : i32
    return %arg1, %c0_i32, %c0_i32_0 : i32, i32, i32
  }
  func.func @transform_5(%arg0: i32, %arg1: i32) -> (i32, i32, i32) {
    %c0_i32 = arith.constant 0 : i32
    %c0_i32_0 = arith.constant 0 : i32
    %c0_i32_1 = arith.constant 0 : i32
    return %arg1, %c0_i32, %c0_i32_0 : i32, i32, i32
  }
  func.func @transform_6(%arg0: i32, %arg1: i32) -> (i32, i32, i32, i32) {
    %c0_i32 = arith.constant 0 : i32
    %c0_i32_0 = arith.constant 0 : i32
    %c0_i32_1 = arith.constant 0 : i32
    %c0_i32_2 = arith.constant 0 : i32
    return %arg1, %c0_i32, %c0_i32_0, %c0_i32_1 : i32, i32, i32, i32
  }
  func.func @transform_7(%arg0: i32, %arg1: i32) -> (i32, i32, i32) {
    %c0_i32 = arith.constant 0 : i32
    %c0_i32_0 = arith.constant 0 : i32
    %c0_i32_1 = arith.constant 0 : i32
    return %arg1, %c0_i32, %c0_i32_0 : i32, i32, i32
  }
  func.func @transform_8(%arg0: i32, %arg1: i32) -> (i32, i32, i32) {
    %c0_i32 = arith.constant 0 : i32
    %c0_i32_0 = arith.constant 0 : i32
    %c0_i32_1 = arith.constant 0 : i32
    return %arg1, %c0_i32, %c0_i32_0 : i32, i32, i32
  }
  func.func @transform_9(%arg0: i32, %arg1: i32) -> (i32, i32, i32) {
    %c0_i32 = arith.constant 0 : i32
    %c0_i32_0 = arith.constant 0 : i32
    %c0_i32_1 = arith.constant 0 : i32
    return %arg1, %c0_i32, %c0_i32_0 : i32, i32, i32
  }
  func.func @transform_10(%arg0: i32, %arg1: i32) -> (i32, i32, i32) {
    %c0_i32 = arith.constant 0 : i32
    %c0_i32_0 = arith.constant 0 : i32
    %c0_i32_1 = arith.constant 0 : i32
    return %arg1, %c0_i32, %c0_i32_0 : i32, i32, i32
  }
  func.func @transform_11(%arg0: i32, %arg1: i32) -> (i32, i32, i32) {
    %c0_i32 = arith.constant 0 : i32
    %c0_i32_0 = arith.constant 0 : i32
    %c0_i32_1 = arith.constant 0 : i32
    return %arg1, %c0_i32, %c0_i32_0 : i32, i32, i32
  }
  func.func @transform_12(%arg0: i32, %arg1: i32) -> (i32, i32, i32) {
    %c0_i32 = arith.constant 0 : i32
    %c0_i32_0 = arith.constant 0 : i32
    %c0_i32_1 = arith.constant 0 : i32
    return %arg1, %c0_i32, %c0_i32_0 : i32, i32, i32
  }
  func.func @transform_13(%arg0: i32, %arg1: i32) -> (i32, i32, i32) {
    %c0_i32 = arith.constant 0 : i32
    %c0_i32_0 = arith.constant 0 : i32
    %c0_i32_1 = arith.constant 0 : i32
    return %arg1, %c0_i32, %c0_i32_0 : i32, i32, i32
  }
  func.func @transform_14(%arg0: i32, %arg1: i32) -> (i32, i32, i32) {
    %c0_i32 = arith.constant 0 : i32
    %c0_i32_0 = arith.constant 0 : i32
    %c0_i32_1 = arith.constant 0 : i32
    return %arg0, %c0_i32, %c0_i32_0 : i32, i32, i32
  }
}

module attributes {stable_mosaic.version = 11 : i64} {
  func.func @lstm_mlp_head_kernel(%arg0: memref<2x8x32xf32, #tpu.memory_space<vmem>>, %arg1: memref<2x1xi32, #tpu.memory_space<vmem>>, %arg2: memref<1x32xf32, #tpu.memory_space<vmem>>, %arg3: memref<1x32xf32, #tpu.memory_space<vmem>>, %arg4: memref<32x128xbf16, #tpu.memory_space<vmem>>, %arg5: memref<32x128xbf16, #tpu.memory_space<vmem>>, %arg6: memref<1x128xf32, #tpu.memory_space<vmem>>, %arg7: memref<1x64xf32, #tpu.memory_space<vmem>>, %arg8: memref<1x64xf32, #tpu.memory_space<vmem>>, %arg9: memref<64x256xbf16, #tpu.memory_space<vmem>>, %arg10: memref<1x256xf32, #tpu.memory_space<vmem>>, %arg11: memref<1x256xf32, #tpu.memory_space<vmem>>, %arg12: memref<1x256xf32, #tpu.memory_space<vmem>>, %arg13: memref<256x64xbf16, #tpu.memory_space<vmem>>, %arg14: memref<1x64xf32, #tpu.memory_space<vmem>>, %arg15: memref<1x64xf32, #tpu.memory_space<vmem>>, %arg16: memref<1x64xf32, #tpu.memory_space<vmem>>, %arg17: memref<64x4xbf16, #tpu.memory_space<vmem>>, %arg18: memref<1x4xf32, #tpu.memory_space<vmem>>, %arg19: memref<2x4xf32, #tpu.memory_space<vmem>>) attributes {dimension_semantics = [], scalar_prefetch = 0 : i64, scratch_operands = 0 : i64, tpu.core_type = #tpu.core_type<tc>} {
    %c0 = arith.constant 0 : index
    %c0_0 = arith.constant 0 : index
    %c0_1 = arith.constant 0 : index
    %0 = vector.load %arg0[%c0, %c0_0, %c0_1] : memref<2x8x32xf32, #tpu.memory_space<vmem>>, vector<2x8x32xf32>
    %c0_2 = arith.constant 0 : index
    %c0_3 = arith.constant 0 : index
    %1 = vector.load %arg1[%c0_2, %c0_3] : memref<2x1xi32, #tpu.memory_space<vmem>>, vector<2x1xi32>
    %c0_4 = arith.constant 0 : index
    %c0_5 = arith.constant 0 : index
    %2 = vector.load %arg2[%c0_4, %c0_5] : memref<1x32xf32, #tpu.memory_space<vmem>>, vector<1x32xf32>
    %c0_6 = arith.constant 0 : index
    %c0_7 = arith.constant 0 : index
    %3 = vector.load %arg3[%c0_6, %c0_7] : memref<1x32xf32, #tpu.memory_space<vmem>>, vector<1x32xf32>
    %cst = arith.constant dense<0.000000e+00> : vector<2x8xf32>
    %4 = vector.multi_reduction <add>, %0, %cst [2] : vector<2x8x32xf32> to vector<2x8xf32>
    %5 = vector.shape_cast %4 : vector<2x8xf32> to vector<2x8x1xf32>
    %cst_8 = arith.constant 3.200000e+01 : f32
    %6 = vector.broadcast %cst_8 : f32 to vector<2x8x1xf32>
    %7 = arith.divf %5, %6 : vector<2x8x1xf32>
    %8 = vector.broadcast %7 : vector<2x8x1xf32> to vector<2x8x32xf32>
    %9 = arith.subf %0, %8 : vector<2x8x32xf32>
    %10 = arith.mulf %9, %9 : vector<2x8x32xf32>
    %cst_9 = arith.constant dense<0.000000e+00> : vector<2x8xf32>
    %11 = vector.multi_reduction <add>, %10, %cst_9 [2] : vector<2x8x32xf32> to vector<2x8xf32>
    %12 = vector.shape_cast %11 : vector<2x8xf32> to vector<2x8x1xf32>
    %cst_10 = arith.constant 3.200000e+01 : f32
    %13 = vector.broadcast %cst_10 : f32 to vector<2x8x1xf32>
    %14 = arith.divf %12, %13 : vector<2x8x1xf32>
    %15 = vector.broadcast %7 : vector<2x8x1xf32> to vector<2x8x32xf32>
    %16 = arith.subf %0, %15 : vector<2x8x32xf32>
    %cst_11 = arith.constant 9.99999974E-6 : f32
    %17 = vector.broadcast %cst_11 : f32 to vector<2x8x1xf32>
    %18 = arith.addf %14, %17 : vector<2x8x1xf32>
    %19 = math.rsqrt %18 : vector<2x8x1xf32>
    %20 = vector.broadcast %19 : vector<2x8x1xf32> to vector<2x8x32xf32>
    %21 = arith.mulf %16, %20 : vector<2x8x32xf32>
    %22 = vector.shape_cast %2 : vector<1x32xf32> to vector<1x1x32xf32>
    %23 = vector.broadcast %22 : vector<1x1x32xf32> to vector<2x8x32xf32>
    %24 = arith.mulf %21, %23 : vector<2x8x32xf32>
    %25 = vector.shape_cast %3 : vector<1x32xf32> to vector<1x1x32xf32>
    %26 = vector.broadcast %25 : vector<1x1x32xf32> to vector<2x8x32xf32>
    %27 = arith.addf %24, %26 : vector<2x8x32xf32>
    %28 = vector.shape_cast %27 : vector<2x8x32xf32> to vector<16x32xf32>
    %29 = arith.truncf %28 : vector<16x32xf32> to vector<16x32xbf16>
    %c0_12 = arith.constant 0 : index
    %c0_13 = arith.constant 0 : index
    %30 = vector.load %arg4[%c0_12, %c0_13] : memref<32x128xbf16, #tpu.memory_space<vmem>>, vector<32x128xbf16>
    %cst_14 = arith.constant dense<0.000000e+00> : vector<16x128xf32>
    %31 = tpu.matmul %29, %30, %cst_14 {dimension_numbers = #tpu.dot_dimension_numbers<[1], [0], [0], [1], [0, 0, 1, 1], [], []>} : vector<16x32xbf16>, vector<32x128xbf16>, vector<16x128xf32> -> vector<16x128xf32>
    %c0_15 = arith.constant 0 : index
    %c0_16 = arith.constant 0 : index
    %32 = vector.load %arg6[%c0_15, %c0_16] : memref<1x128xf32, #tpu.memory_space<vmem>>, vector<1x128xf32>
    %33 = vector.broadcast %32 : vector<1x128xf32> to vector<16x128xf32>
    %34 = arith.addf %31, %33 : vector<16x128xf32>
    %35 = vector.shape_cast %34 : vector<16x128xf32> to vector<2x8x128xf32>
    %c0_17 = arith.constant 0 : index
    %c0_18 = arith.constant 0 : index
    %36 = vector.load %arg5[%c0_17, %c0_18] : memref<32x128xbf16, #tpu.memory_space<vmem>>, vector<32x128xbf16>
    %cst_19 = arith.constant 0.000000e+00 : f32
    %37 = vector.broadcast %cst_19 : f32 to vector<2x32xf32>
    %cst_20 = arith.constant 0.000000e+00 : f32
    %38 = vector.broadcast %cst_20 : f32 to vector<2x32xf32>
    %cst_21 = arith.constant 0.000000e+00 : f32
    %39 = vector.broadcast %cst_21 : f32 to vector<2x32xf32>
    %cst_22 = arith.constant -1.000000e+30 : f32
    %40 = vector.broadcast %cst_22 : f32 to vector<2x32xf32>
    %41 = vector.extract_strided_slice %35 {offsets = [0, 0, 0], sizes = [2, 1, 128], strides = [1, 1, 1]} : vector<2x8x128xf32> to vector<2x1x128xf32>
    %42 = vector.shape_cast %41 : vector<2x1x128xf32> to vector<2x128xf32>
    %43 = arith.truncf %37 : vector<2x32xf32> to vector<2x32xbf16>
    %cst_23 = arith.constant dense<0.000000e+00> : vector<2x128xf32>
    %44 = tpu.matmul %43, %36, %cst_23 {dimension_numbers = #tpu.dot_dimension_numbers<[1], [0], [0], [1], [0, 0, 1, 1], [], []>} : vector<2x32xbf16>, vector<32x128xbf16>, vector<2x128xf32> -> vector<2x128xf32>
    %45 = arith.addf %42, %44 : vector<2x128xf32>
    %46 = vector.extract_strided_slice %45 {offsets = [0, 0], sizes = [2, 32], strides = [1, 1]} : vector<2x128xf32> to vector<2x32xf32>
    %47 = arith.negf %46 : vector<2x32xf32>
    %48 = math.exp %47 : vector<2x32xf32>
    %cst_24 = arith.constant 1.000000e+00 : f32
    %49 = vector.broadcast %cst_24 : f32 to vector<2x32xf32>
    %50 = arith.addf %49, %48 : vector<2x32xf32>
    %51 = arith.divf %49, %50 : vector<2x32xf32>
    %52 = vector.extract_strided_slice %45 {offsets = [0, 32], sizes = [2, 32], strides = [1, 1]} : vector<2x128xf32> to vector<2x32xf32>
    %53 = arith.negf %52 : vector<2x32xf32>
    %54 = math.exp %53 : vector<2x32xf32>
    %cst_25 = arith.constant 1.000000e+00 : f32
    %55 = vector.broadcast %cst_25 : f32 to vector<2x32xf32>
    %56 = arith.addf %55, %54 : vector<2x32xf32>
    %57 = arith.divf %55, %56 : vector<2x32xf32>
    %58 = vector.extract_strided_slice %45 {offsets = [0, 64], sizes = [2, 32], strides = [1, 1]} : vector<2x128xf32> to vector<2x32xf32>
    %59 = math.tanh %58 : vector<2x32xf32>
    %60 = vector.extract_strided_slice %45 {offsets = [0, 96], sizes = [2, 32], strides = [1, 1]} : vector<2x128xf32> to vector<2x32xf32>
    %61 = arith.negf %60 : vector<2x32xf32>
    %62 = math.exp %61 : vector<2x32xf32>
    %cst_26 = arith.constant 1.000000e+00 : f32
    %63 = vector.broadcast %cst_26 : f32 to vector<2x32xf32>
    %64 = arith.addf %63, %62 : vector<2x32xf32>
    %65 = arith.divf %63, %64 : vector<2x32xf32>
    %66 = arith.mulf %57, %38 : vector<2x32xf32>
    %67 = arith.mulf %51, %59 : vector<2x32xf32>
    %68 = arith.addf %66, %67 : vector<2x32xf32>
    %69 = math.tanh %68 : vector<2x32xf32>
    %70 = arith.mulf %65, %69 : vector<2x32xf32>
    %71 = vector.extract_strided_slice %0 {offsets = [0, 0, 0], sizes = [2, 1, 32], strides = [1, 1, 1]} : vector<2x8x32xf32> to vector<2x1x32xf32>
    %72 = vector.shape_cast %71 : vector<2x1x32xf32> to vector<2x32xf32>
    %73 = arith.addf %72, %70 : vector<2x32xf32>
    %c1_i32 = arith.constant 1 : i32
    %74 = vector.broadcast %c1_i32 : i32 to vector<2x1xi32>
    %75 = arith.cmpi eq, %1, %74 : vector<2x1xi32>
    %76 = vector.shape_cast %75 : vector<2x1xi1> to vector<2x1xi1>
    %77 = vector.broadcast %76 : vector<2x1xi1> to vector<2x32xi1>
    %78 = arith.select %77, %73, %39 : vector<2x32xi1>, vector<2x32xf32>
    %c0_i32 = arith.constant 0 : i32
    %79 = vector.broadcast %c0_i32 : i32 to vector<2x1xi32>
    %80 = arith.cmpi sgt, %1, %79 : vector<2x1xi32>
    %cst_27 = arith.constant -1.000000e+30 : f32
    %81 = vector.shape_cast %80 : vector<2x1xi1> to vector<2x1xi1>
    %82 = vector.broadcast %81 : vector<2x1xi1> to vector<2x32xi1>
    %83 = vector.broadcast %cst_27 : f32 to vector<2x32xf32>
    %84 = arith.select %82, %73, %83 : vector<2x32xi1>, vector<2x32xf32>
    %85 = arith.maximumf %40, %84 : vector<2x32xf32>
    %86 = vector.extract_strided_slice %35 {offsets = [0, 1, 0], sizes = [2, 1, 128], strides = [1, 1, 1]} : vector<2x8x128xf32> to vector<2x1x128xf32>
    %87 = vector.shape_cast %86 : vector<2x1x128xf32> to vector<2x128xf32>
    %88 = arith.truncf %70 : vector<2x32xf32> to vector<2x32xbf16>
    %cst_28 = arith.constant dense<0.000000e+00> : vector<2x128xf32>
    %89 = tpu.matmul %88, %36, %cst_28 {dimension_numbers = #tpu.dot_dimension_numbers<[1], [0], [0], [1], [0, 0, 1, 1], [], []>} : vector<2x32xbf16>, vector<32x128xbf16>, vector<2x128xf32> -> vector<2x128xf32>
    %90 = arith.addf %87, %89 : vector<2x128xf32>
    %91 = vector.extract_strided_slice %90 {offsets = [0, 0], sizes = [2, 32], strides = [1, 1]} : vector<2x128xf32> to vector<2x32xf32>
    %92 = arith.negf %91 : vector<2x32xf32>
    %93 = math.exp %92 : vector<2x32xf32>
    %cst_29 = arith.constant 1.000000e+00 : f32
    %94 = vector.broadcast %cst_29 : f32 to vector<2x32xf32>
    %95 = arith.addf %94, %93 : vector<2x32xf32>
    %96 = arith.divf %94, %95 : vector<2x32xf32>
    %97 = vector.extract_strided_slice %90 {offsets = [0, 32], sizes = [2, 32], strides = [1, 1]} : vector<2x128xf32> to vector<2x32xf32>
    %98 = arith.negf %97 : vector<2x32xf32>
    %99 = math.exp %98 : vector<2x32xf32>
    %cst_30 = arith.constant 1.000000e+00 : f32
    %100 = vector.broadcast %cst_30 : f32 to vector<2x32xf32>
    %101 = arith.addf %100, %99 : vector<2x32xf32>
    %102 = arith.divf %100, %101 : vector<2x32xf32>
    %103 = vector.extract_strided_slice %90 {offsets = [0, 64], sizes = [2, 32], strides = [1, 1]} : vector<2x128xf32> to vector<2x32xf32>
    %104 = math.tanh %103 : vector<2x32xf32>
    %105 = vector.extract_strided_slice %90 {offsets = [0, 96], sizes = [2, 32], strides = [1, 1]} : vector<2x128xf32> to vector<2x32xf32>
    %106 = arith.negf %105 : vector<2x32xf32>
    %107 = math.exp %106 : vector<2x32xf32>
    %cst_31 = arith.constant 1.000000e+00 : f32
    %108 = vector.broadcast %cst_31 : f32 to vector<2x32xf32>
    %109 = arith.addf %108, %107 : vector<2x32xf32>
    %110 = arith.divf %108, %109 : vector<2x32xf32>
    %111 = arith.mulf %102, %68 : vector<2x32xf32>
    %112 = arith.mulf %96, %104 : vector<2x32xf32>
    %113 = arith.addf %111, %112 : vector<2x32xf32>
    %114 = math.tanh %113 : vector<2x32xf32>
    %115 = arith.mulf %110, %114 : vector<2x32xf32>
    %116 = vector.extract_strided_slice %0 {offsets = [0, 1, 0], sizes = [2, 1, 32], strides = [1, 1, 1]} : vector<2x8x32xf32> to vector<2x1x32xf32>
    %117 = vector.shape_cast %116 : vector<2x1x32xf32> to vector<2x32xf32>
    %118 = arith.addf %117, %115 : vector<2x32xf32>
    %c2_i32 = arith.constant 2 : i32
    %119 = vector.broadcast %c2_i32 : i32 to vector<2x1xi32>
    %120 = arith.cmpi eq, %1, %119 : vector<2x1xi32>
    %121 = vector.shape_cast %120 : vector<2x1xi1> to vector<2x1xi1>
    %122 = vector.broadcast %121 : vector<2x1xi1> to vector<2x32xi1>
    %123 = arith.select %122, %118, %78 : vector<2x32xi1>, vector<2x32xf32>
    %c1_i32_32 = arith.constant 1 : i32
    %124 = vector.broadcast %c1_i32_32 : i32 to vector<2x1xi32>
    %125 = arith.cmpi sgt, %1, %124 : vector<2x1xi32>
    %cst_33 = arith.constant -1.000000e+30 : f32
    %126 = vector.shape_cast %125 : vector<2x1xi1> to vector<2x1xi1>
    %127 = vector.broadcast %126 : vector<2x1xi1> to vector<2x32xi1>
    %128 = vector.broadcast %cst_33 : f32 to vector<2x32xf32>
    %129 = arith.select %127, %118, %128 : vector<2x32xi1>, vector<2x32xf32>
    %130 = arith.maximumf %85, %129 : vector<2x32xf32>
    %131 = vector.extract_strided_slice %35 {offsets = [0, 2, 0], sizes = [2, 1, 128], strides = [1, 1, 1]} : vector<2x8x128xf32> to vector<2x1x128xf32>
    %132 = vector.shape_cast %131 : vector<2x1x128xf32> to vector<2x128xf32>
    %133 = arith.truncf %115 : vector<2x32xf32> to vector<2x32xbf16>
    %cst_34 = arith.constant dense<0.000000e+00> : vector<2x128xf32>
    %134 = tpu.matmul %133, %36, %cst_34 {dimension_numbers = #tpu.dot_dimension_numbers<[1], [0], [0], [1], [0, 0, 1, 1], [], []>} : vector<2x32xbf16>, vector<32x128xbf16>, vector<2x128xf32> -> vector<2x128xf32>
    %135 = arith.addf %132, %134 : vector<2x128xf32>
    %136 = vector.extract_strided_slice %135 {offsets = [0, 0], sizes = [2, 32], strides = [1, 1]} : vector<2x128xf32> to vector<2x32xf32>
    %137 = arith.negf %136 : vector<2x32xf32>
    %138 = math.exp %137 : vector<2x32xf32>
    %cst_35 = arith.constant 1.000000e+00 : f32
    %139 = vector.broadcast %cst_35 : f32 to vector<2x32xf32>
    %140 = arith.addf %139, %138 : vector<2x32xf32>
    %141 = arith.divf %139, %140 : vector<2x32xf32>
    %142 = vector.extract_strided_slice %135 {offsets = [0, 32], sizes = [2, 32], strides = [1, 1]} : vector<2x128xf32> to vector<2x32xf32>
    %143 = arith.negf %142 : vector<2x32xf32>
    %144 = math.exp %143 : vector<2x32xf32>
    %cst_36 = arith.constant 1.000000e+00 : f32
    %145 = vector.broadcast %cst_36 : f32 to vector<2x32xf32>
    %146 = arith.addf %145, %144 : vector<2x32xf32>
    %147 = arith.divf %145, %146 : vector<2x32xf32>
    %148 = vector.extract_strided_slice %135 {offsets = [0, 64], sizes = [2, 32], strides = [1, 1]} : vector<2x128xf32> to vector<2x32xf32>
    %149 = math.tanh %148 : vector<2x32xf32>
    %150 = vector.extract_strided_slice %135 {offsets = [0, 96], sizes = [2, 32], strides = [1, 1]} : vector<2x128xf32> to vector<2x32xf32>
    %151 = arith.negf %150 : vector<2x32xf32>
    %152 = math.exp %151 : vector<2x32xf32>
    %cst_37 = arith.constant 1.000000e+00 : f32
    %153 = vector.broadcast %cst_37 : f32 to vector<2x32xf32>
    %154 = arith.addf %153, %152 : vector<2x32xf32>
    %155 = arith.divf %153, %154 : vector<2x32xf32>
    %156 = arith.mulf %147, %113 : vector<2x32xf32>
    %157 = arith.mulf %141, %149 : vector<2x32xf32>
    %158 = arith.addf %156, %157 : vector<2x32xf32>
    %159 = math.tanh %158 : vector<2x32xf32>
    %160 = arith.mulf %155, %159 : vector<2x32xf32>
    %161 = vector.extract_strided_slice %0 {offsets = [0, 2, 0], sizes = [2, 1, 32], strides = [1, 1, 1]} : vector<2x8x32xf32> to vector<2x1x32xf32>
    %162 = vector.shape_cast %161 : vector<2x1x32xf32> to vector<2x32xf32>
    %163 = arith.addf %162, %160 : vector<2x32xf32>
    %c3_i32 = arith.constant 3 : i32
    %164 = vector.broadcast %c3_i32 : i32 to vector<2x1xi32>
    %165 = arith.cmpi eq, %1, %164 : vector<2x1xi32>
    %166 = vector.shape_cast %165 : vector<2x1xi1> to vector<2x1xi1>
    %167 = vector.broadcast %166 : vector<2x1xi1> to vector<2x32xi1>
    %168 = arith.select %167, %163, %123 : vector<2x32xi1>, vector<2x32xf32>
    %c2_i32_38 = arith.constant 2 : i32
    %169 = vector.broadcast %c2_i32_38 : i32 to vector<2x1xi32>
    %170 = arith.cmpi sgt, %1, %169 : vector<2x1xi32>
    %cst_39 = arith.constant -1.000000e+30 : f32
    %171 = vector.shape_cast %170 : vector<2x1xi1> to vector<2x1xi1>
    %172 = vector.broadcast %171 : vector<2x1xi1> to vector<2x32xi1>
    %173 = vector.broadcast %cst_39 : f32 to vector<2x32xf32>
    %174 = arith.select %172, %163, %173 : vector<2x32xi1>, vector<2x32xf32>
    %175 = arith.maximumf %130, %174 : vector<2x32xf32>
    %176 = vector.extract_strided_slice %35 {offsets = [0, 3, 0], sizes = [2, 1, 128], strides = [1, 1, 1]} : vector<2x8x128xf32> to vector<2x1x128xf32>
    %177 = vector.shape_cast %176 : vector<2x1x128xf32> to vector<2x128xf32>
    %178 = arith.truncf %160 : vector<2x32xf32> to vector<2x32xbf16>
    %cst_40 = arith.constant dense<0.000000e+00> : vector<2x128xf32>
    %179 = tpu.matmul %178, %36, %cst_40 {dimension_numbers = #tpu.dot_dimension_numbers<[1], [0], [0], [1], [0, 0, 1, 1], [], []>} : vector<2x32xbf16>, vector<32x128xbf16>, vector<2x128xf32> -> vector<2x128xf32>
    %180 = arith.addf %177, %179 : vector<2x128xf32>
    %181 = vector.extract_strided_slice %180 {offsets = [0, 0], sizes = [2, 32], strides = [1, 1]} : vector<2x128xf32> to vector<2x32xf32>
    %182 = arith.negf %181 : vector<2x32xf32>
    %183 = math.exp %182 : vector<2x32xf32>
    %cst_41 = arith.constant 1.000000e+00 : f32
    %184 = vector.broadcast %cst_41 : f32 to vector<2x32xf32>
    %185 = arith.addf %184, %183 : vector<2x32xf32>
    %186 = arith.divf %184, %185 : vector<2x32xf32>
    %187 = vector.extract_strided_slice %180 {offsets = [0, 32], sizes = [2, 32], strides = [1, 1]} : vector<2x128xf32> to vector<2x32xf32>
    %188 = arith.negf %187 : vector<2x32xf32>
    %189 = math.exp %188 : vector<2x32xf32>
    %cst_42 = arith.constant 1.000000e+00 : f32
    %190 = vector.broadcast %cst_42 : f32 to vector<2x32xf32>
    %191 = arith.addf %190, %189 : vector<2x32xf32>
    %192 = arith.divf %190, %191 : vector<2x32xf32>
    %193 = vector.extract_strided_slice %180 {offsets = [0, 64], sizes = [2, 32], strides = [1, 1]} : vector<2x128xf32> to vector<2x32xf32>
    %194 = math.tanh %193 : vector<2x32xf32>
    %195 = vector.extract_strided_slice %180 {offsets = [0, 96], sizes = [2, 32], strides = [1, 1]} : vector<2x128xf32> to vector<2x32xf32>
    %196 = arith.negf %195 : vector<2x32xf32>
    %197 = math.exp %196 : vector<2x32xf32>
    %cst_43 = arith.constant 1.000000e+00 : f32
    %198 = vector.broadcast %cst_43 : f32 to vector<2x32xf32>
    %199 = arith.addf %198, %197 : vector<2x32xf32>
    %200 = arith.divf %198, %199 : vector<2x32xf32>
    %201 = arith.mulf %192, %158 : vector<2x32xf32>
    %202 = arith.mulf %186, %194 : vector<2x32xf32>
    %203 = arith.addf %201, %202 : vector<2x32xf32>
    %204 = math.tanh %203 : vector<2x32xf32>
    %205 = arith.mulf %200, %204 : vector<2x32xf32>
    %206 = vector.extract_strided_slice %0 {offsets = [0, 3, 0], sizes = [2, 1, 32], strides = [1, 1, 1]} : vector<2x8x32xf32> to vector<2x1x32xf32>
    %207 = vector.shape_cast %206 : vector<2x1x32xf32> to vector<2x32xf32>
    %208 = arith.addf %207, %205 : vector<2x32xf32>
    %c4_i32 = arith.constant 4 : i32
    %209 = vector.broadcast %c4_i32 : i32 to vector<2x1xi32>
    %210 = arith.cmpi eq, %1, %209 : vector<2x1xi32>
    %211 = vector.shape_cast %210 : vector<2x1xi1> to vector<2x1xi1>
    %212 = vector.broadcast %211 : vector<2x1xi1> to vector<2x32xi1>
    %213 = arith.select %212, %208, %168 : vector<2x32xi1>, vector<2x32xf32>
    %c3_i32_44 = arith.constant 3 : i32
    %214 = vector.broadcast %c3_i32_44 : i32 to vector<2x1xi32>
    %215 = arith.cmpi sgt, %1, %214 : vector<2x1xi32>
    %cst_45 = arith.constant -1.000000e+30 : f32
    %216 = vector.shape_cast %215 : vector<2x1xi1> to vector<2x1xi1>
    %217 = vector.broadcast %216 : vector<2x1xi1> to vector<2x32xi1>
    %218 = vector.broadcast %cst_45 : f32 to vector<2x32xf32>
    %219 = arith.select %217, %208, %218 : vector<2x32xi1>, vector<2x32xf32>
    %220 = arith.maximumf %175, %219 : vector<2x32xf32>
    %221 = vector.extract_strided_slice %35 {offsets = [0, 4, 0], sizes = [2, 1, 128], strides = [1, 1, 1]} : vector<2x8x128xf32> to vector<2x1x128xf32>
    %222 = vector.shape_cast %221 : vector<2x1x128xf32> to vector<2x128xf32>
    %223 = arith.truncf %205 : vector<2x32xf32> to vector<2x32xbf16>
    %cst_46 = arith.constant dense<0.000000e+00> : vector<2x128xf32>
    %224 = tpu.matmul %223, %36, %cst_46 {dimension_numbers = #tpu.dot_dimension_numbers<[1], [0], [0], [1], [0, 0, 1, 1], [], []>} : vector<2x32xbf16>, vector<32x128xbf16>, vector<2x128xf32> -> vector<2x128xf32>
    %225 = arith.addf %222, %224 : vector<2x128xf32>
    %226 = vector.extract_strided_slice %225 {offsets = [0, 0], sizes = [2, 32], strides = [1, 1]} : vector<2x128xf32> to vector<2x32xf32>
    %227 = arith.negf %226 : vector<2x32xf32>
    %228 = math.exp %227 : vector<2x32xf32>
    %cst_47 = arith.constant 1.000000e+00 : f32
    %229 = vector.broadcast %cst_47 : f32 to vector<2x32xf32>
    %230 = arith.addf %229, %228 : vector<2x32xf32>
    %231 = arith.divf %229, %230 : vector<2x32xf32>
    %232 = vector.extract_strided_slice %225 {offsets = [0, 32], sizes = [2, 32], strides = [1, 1]} : vector<2x128xf32> to vector<2x32xf32>
    %233 = arith.negf %232 : vector<2x32xf32>
    %234 = math.exp %233 : vector<2x32xf32>
    %cst_48 = arith.constant 1.000000e+00 : f32
    %235 = vector.broadcast %cst_48 : f32 to vector<2x32xf32>
    %236 = arith.addf %235, %234 : vector<2x32xf32>
    %237 = arith.divf %235, %236 : vector<2x32xf32>
    %238 = vector.extract_strided_slice %225 {offsets = [0, 64], sizes = [2, 32], strides = [1, 1]} : vector<2x128xf32> to vector<2x32xf32>
    %239 = math.tanh %238 : vector<2x32xf32>
    %240 = vector.extract_strided_slice %225 {offsets = [0, 96], sizes = [2, 32], strides = [1, 1]} : vector<2x128xf32> to vector<2x32xf32>
    %241 = arith.negf %240 : vector<2x32xf32>
    %242 = math.exp %241 : vector<2x32xf32>
    %cst_49 = arith.constant 1.000000e+00 : f32
    %243 = vector.broadcast %cst_49 : f32 to vector<2x32xf32>
    %244 = arith.addf %243, %242 : vector<2x32xf32>
    %245 = arith.divf %243, %244 : vector<2x32xf32>
    %246 = arith.mulf %237, %203 : vector<2x32xf32>
    %247 = arith.mulf %231, %239 : vector<2x32xf32>
    %248 = arith.addf %246, %247 : vector<2x32xf32>
    %249 = math.tanh %248 : vector<2x32xf32>
    %250 = arith.mulf %245, %249 : vector<2x32xf32>
    %251 = vector.extract_strided_slice %0 {offsets = [0, 4, 0], sizes = [2, 1, 32], strides = [1, 1, 1]} : vector<2x8x32xf32> to vector<2x1x32xf32>
    %252 = vector.shape_cast %251 : vector<2x1x32xf32> to vector<2x32xf32>
    %253 = arith.addf %252, %250 : vector<2x32xf32>
    %c5_i32 = arith.constant 5 : i32
    %254 = vector.broadcast %c5_i32 : i32 to vector<2x1xi32>
    %255 = arith.cmpi eq, %1, %254 : vector<2x1xi32>
    %256 = vector.shape_cast %255 : vector<2x1xi1> to vector<2x1xi1>
    %257 = vector.broadcast %256 : vector<2x1xi1> to vector<2x32xi1>
    %258 = arith.select %257, %253, %213 : vector<2x32xi1>, vector<2x32xf32>
    %c4_i32_50 = arith.constant 4 : i32
    %259 = vector.broadcast %c4_i32_50 : i32 to vector<2x1xi32>
    %260 = arith.cmpi sgt, %1, %259 : vector<2x1xi32>
    %cst_51 = arith.constant -1.000000e+30 : f32
    %261 = vector.shape_cast %260 : vector<2x1xi1> to vector<2x1xi1>
    %262 = vector.broadcast %261 : vector<2x1xi1> to vector<2x32xi1>
    %263 = vector.broadcast %cst_51 : f32 to vector<2x32xf32>
    %264 = arith.select %262, %253, %263 : vector<2x32xi1>, vector<2x32xf32>
    %265 = arith.maximumf %220, %264 : vector<2x32xf32>
    %266 = vector.extract_strided_slice %35 {offsets = [0, 5, 0], sizes = [2, 1, 128], strides = [1, 1, 1]} : vector<2x8x128xf32> to vector<2x1x128xf32>
    %267 = vector.shape_cast %266 : vector<2x1x128xf32> to vector<2x128xf32>
    %268 = arith.truncf %250 : vector<2x32xf32> to vector<2x32xbf16>
    %cst_52 = arith.constant dense<0.000000e+00> : vector<2x128xf32>
    %269 = tpu.matmul %268, %36, %cst_52 {dimension_numbers = #tpu.dot_dimension_numbers<[1], [0], [0], [1], [0, 0, 1, 1], [], []>} : vector<2x32xbf16>, vector<32x128xbf16>, vector<2x128xf32> -> vector<2x128xf32>
    %270 = arith.addf %267, %269 : vector<2x128xf32>
    %271 = vector.extract_strided_slice %270 {offsets = [0, 0], sizes = [2, 32], strides = [1, 1]} : vector<2x128xf32> to vector<2x32xf32>
    %272 = arith.negf %271 : vector<2x32xf32>
    %273 = math.exp %272 : vector<2x32xf32>
    %cst_53 = arith.constant 1.000000e+00 : f32
    %274 = vector.broadcast %cst_53 : f32 to vector<2x32xf32>
    %275 = arith.addf %274, %273 : vector<2x32xf32>
    %276 = arith.divf %274, %275 : vector<2x32xf32>
    %277 = vector.extract_strided_slice %270 {offsets = [0, 32], sizes = [2, 32], strides = [1, 1]} : vector<2x128xf32> to vector<2x32xf32>
    %278 = arith.negf %277 : vector<2x32xf32>
    %279 = math.exp %278 : vector<2x32xf32>
    %cst_54 = arith.constant 1.000000e+00 : f32
    %280 = vector.broadcast %cst_54 : f32 to vector<2x32xf32>
    %281 = arith.addf %280, %279 : vector<2x32xf32>
    %282 = arith.divf %280, %281 : vector<2x32xf32>
    %283 = vector.extract_strided_slice %270 {offsets = [0, 64], sizes = [2, 32], strides = [1, 1]} : vector<2x128xf32> to vector<2x32xf32>
    %284 = math.tanh %283 : vector<2x32xf32>
    %285 = vector.extract_strided_slice %270 {offsets = [0, 96], sizes = [2, 32], strides = [1, 1]} : vector<2x128xf32> to vector<2x32xf32>
    %286 = arith.negf %285 : vector<2x32xf32>
    %287 = math.exp %286 : vector<2x32xf32>
    %cst_55 = arith.constant 1.000000e+00 : f32
    %288 = vector.broadcast %cst_55 : f32 to vector<2x32xf32>
    %289 = arith.addf %288, %287 : vector<2x32xf32>
    %290 = arith.divf %288, %289 : vector<2x32xf32>
    %291 = arith.mulf %282, %248 : vector<2x32xf32>
    %292 = arith.mulf %276, %284 : vector<2x32xf32>
    %293 = arith.addf %291, %292 : vector<2x32xf32>
    %294 = math.tanh %293 : vector<2x32xf32>
    %295 = arith.mulf %290, %294 : vector<2x32xf32>
    %296 = vector.extract_strided_slice %0 {offsets = [0, 5, 0], sizes = [2, 1, 32], strides = [1, 1, 1]} : vector<2x8x32xf32> to vector<2x1x32xf32>
    %297 = vector.shape_cast %296 : vector<2x1x32xf32> to vector<2x32xf32>
    %298 = arith.addf %297, %295 : vector<2x32xf32>
    %c6_i32 = arith.constant 6 : i32
    %299 = vector.broadcast %c6_i32 : i32 to vector<2x1xi32>
    %300 = arith.cmpi eq, %1, %299 : vector<2x1xi32>
    %301 = vector.shape_cast %300 : vector<2x1xi1> to vector<2x1xi1>
    %302 = vector.broadcast %301 : vector<2x1xi1> to vector<2x32xi1>
    %303 = arith.select %302, %298, %258 : vector<2x32xi1>, vector<2x32xf32>
    %c5_i32_56 = arith.constant 5 : i32
    %304 = vector.broadcast %c5_i32_56 : i32 to vector<2x1xi32>
    %305 = arith.cmpi sgt, %1, %304 : vector<2x1xi32>
    %cst_57 = arith.constant -1.000000e+30 : f32
    %306 = vector.shape_cast %305 : vector<2x1xi1> to vector<2x1xi1>
    %307 = vector.broadcast %306 : vector<2x1xi1> to vector<2x32xi1>
    %308 = vector.broadcast %cst_57 : f32 to vector<2x32xf32>
    %309 = arith.select %307, %298, %308 : vector<2x32xi1>, vector<2x32xf32>
    %310 = arith.maximumf %265, %309 : vector<2x32xf32>
    %311 = vector.extract_strided_slice %35 {offsets = [0, 6, 0], sizes = [2, 1, 128], strides = [1, 1, 1]} : vector<2x8x128xf32> to vector<2x1x128xf32>
    %312 = vector.shape_cast %311 : vector<2x1x128xf32> to vector<2x128xf32>
    %313 = arith.truncf %295 : vector<2x32xf32> to vector<2x32xbf16>
    %cst_58 = arith.constant dense<0.000000e+00> : vector<2x128xf32>
    %314 = tpu.matmul %313, %36, %cst_58 {dimension_numbers = #tpu.dot_dimension_numbers<[1], [0], [0], [1], [0, 0, 1, 1], [], []>} : vector<2x32xbf16>, vector<32x128xbf16>, vector<2x128xf32> -> vector<2x128xf32>
    %315 = arith.addf %312, %314 : vector<2x128xf32>
    %316 = vector.extract_strided_slice %315 {offsets = [0, 0], sizes = [2, 32], strides = [1, 1]} : vector<2x128xf32> to vector<2x32xf32>
    %317 = arith.negf %316 : vector<2x32xf32>
    %318 = math.exp %317 : vector<2x32xf32>
    %cst_59 = arith.constant 1.000000e+00 : f32
    %319 = vector.broadcast %cst_59 : f32 to vector<2x32xf32>
    %320 = arith.addf %319, %318 : vector<2x32xf32>
    %321 = arith.divf %319, %320 : vector<2x32xf32>
    %322 = vector.extract_strided_slice %315 {offsets = [0, 32], sizes = [2, 32], strides = [1, 1]} : vector<2x128xf32> to vector<2x32xf32>
    %323 = arith.negf %322 : vector<2x32xf32>
    %324 = math.exp %323 : vector<2x32xf32>
    %cst_60 = arith.constant 1.000000e+00 : f32
    %325 = vector.broadcast %cst_60 : f32 to vector<2x32xf32>
    %326 = arith.addf %325, %324 : vector<2x32xf32>
    %327 = arith.divf %325, %326 : vector<2x32xf32>
    %328 = vector.extract_strided_slice %315 {offsets = [0, 64], sizes = [2, 32], strides = [1, 1]} : vector<2x128xf32> to vector<2x32xf32>
    %329 = math.tanh %328 : vector<2x32xf32>
    %330 = vector.extract_strided_slice %315 {offsets = [0, 96], sizes = [2, 32], strides = [1, 1]} : vector<2x128xf32> to vector<2x32xf32>
    %331 = arith.negf %330 : vector<2x32xf32>
    %332 = math.exp %331 : vector<2x32xf32>
    %cst_61 = arith.constant 1.000000e+00 : f32
    %333 = vector.broadcast %cst_61 : f32 to vector<2x32xf32>
    %334 = arith.addf %333, %332 : vector<2x32xf32>
    %335 = arith.divf %333, %334 : vector<2x32xf32>
    %336 = arith.mulf %327, %293 : vector<2x32xf32>
    %337 = arith.mulf %321, %329 : vector<2x32xf32>
    %338 = arith.addf %336, %337 : vector<2x32xf32>
    %339 = math.tanh %338 : vector<2x32xf32>
    %340 = arith.mulf %335, %339 : vector<2x32xf32>
    %341 = vector.extract_strided_slice %0 {offsets = [0, 6, 0], sizes = [2, 1, 32], strides = [1, 1, 1]} : vector<2x8x32xf32> to vector<2x1x32xf32>
    %342 = vector.shape_cast %341 : vector<2x1x32xf32> to vector<2x32xf32>
    %343 = arith.addf %342, %340 : vector<2x32xf32>
    %c7_i32 = arith.constant 7 : i32
    %344 = vector.broadcast %c7_i32 : i32 to vector<2x1xi32>
    %345 = arith.cmpi eq, %1, %344 : vector<2x1xi32>
    %346 = vector.shape_cast %345 : vector<2x1xi1> to vector<2x1xi1>
    %347 = vector.broadcast %346 : vector<2x1xi1> to vector<2x32xi1>
    %348 = arith.select %347, %343, %303 : vector<2x32xi1>, vector<2x32xf32>
    %c6_i32_62 = arith.constant 6 : i32
    %349 = vector.broadcast %c6_i32_62 : i32 to vector<2x1xi32>
    %350 = arith.cmpi sgt, %1, %349 : vector<2x1xi32>
    %cst_63 = arith.constant -1.000000e+30 : f32
    %351 = vector.shape_cast %350 : vector<2x1xi1> to vector<2x1xi1>
    %352 = vector.broadcast %351 : vector<2x1xi1> to vector<2x32xi1>
    %353 = vector.broadcast %cst_63 : f32 to vector<2x32xf32>
    %354 = arith.select %352, %343, %353 : vector<2x32xi1>, vector<2x32xf32>
    %355 = arith.maximumf %310, %354 : vector<2x32xf32>
    %356 = vector.extract_strided_slice %35 {offsets = [0, 7, 0], sizes = [2, 1, 128], strides = [1, 1, 1]} : vector<2x8x128xf32> to vector<2x1x128xf32>
    %357 = vector.shape_cast %356 : vector<2x1x128xf32> to vector<2x128xf32>
    %358 = arith.truncf %340 : vector<2x32xf32> to vector<2x32xbf16>
    %cst_64 = arith.constant dense<0.000000e+00> : vector<2x128xf32>
    %359 = tpu.matmul %358, %36, %cst_64 {dimension_numbers = #tpu.dot_dimension_numbers<[1], [0], [0], [1], [0, 0, 1, 1], [], []>} : vector<2x32xbf16>, vector<32x128xbf16>, vector<2x128xf32> -> vector<2x128xf32>
    %360 = arith.addf %357, %359 : vector<2x128xf32>
    %361 = vector.extract_strided_slice %360 {offsets = [0, 0], sizes = [2, 32], strides = [1, 1]} : vector<2x128xf32> to vector<2x32xf32>
    %362 = arith.negf %361 : vector<2x32xf32>
    %363 = math.exp %362 : vector<2x32xf32>
    %cst_65 = arith.constant 1.000000e+00 : f32
    %364 = vector.broadcast %cst_65 : f32 to vector<2x32xf32>
    %365 = arith.addf %364, %363 : vector<2x32xf32>
    %366 = arith.divf %364, %365 : vector<2x32xf32>
    %367 = vector.extract_strided_slice %360 {offsets = [0, 32], sizes = [2, 32], strides = [1, 1]} : vector<2x128xf32> to vector<2x32xf32>
    %368 = arith.negf %367 : vector<2x32xf32>
    %369 = math.exp %368 : vector<2x32xf32>
    %cst_66 = arith.constant 1.000000e+00 : f32
    %370 = vector.broadcast %cst_66 : f32 to vector<2x32xf32>
    %371 = arith.addf %370, %369 : vector<2x32xf32>
    %372 = arith.divf %370, %371 : vector<2x32xf32>
    %373 = vector.extract_strided_slice %360 {offsets = [0, 64], sizes = [2, 32], strides = [1, 1]} : vector<2x128xf32> to vector<2x32xf32>
    %374 = math.tanh %373 : vector<2x32xf32>
    %375 = vector.extract_strided_slice %360 {offsets = [0, 96], sizes = [2, 32], strides = [1, 1]} : vector<2x128xf32> to vector<2x32xf32>
    %376 = arith.negf %375 : vector<2x32xf32>
    %377 = math.exp %376 : vector<2x32xf32>
    %cst_67 = arith.constant 1.000000e+00 : f32
    %378 = vector.broadcast %cst_67 : f32 to vector<2x32xf32>
    %379 = arith.addf %378, %377 : vector<2x32xf32>
    %380 = arith.divf %378, %379 : vector<2x32xf32>
    %381 = arith.mulf %372, %338 : vector<2x32xf32>
    %382 = arith.mulf %366, %374 : vector<2x32xf32>
    %383 = arith.addf %381, %382 : vector<2x32xf32>
    %384 = math.tanh %383 : vector<2x32xf32>
    %385 = arith.mulf %380, %384 : vector<2x32xf32>
    %386 = vector.extract_strided_slice %0 {offsets = [0, 7, 0], sizes = [2, 1, 32], strides = [1, 1, 1]} : vector<2x8x32xf32> to vector<2x1x32xf32>
    %387 = vector.shape_cast %386 : vector<2x1x32xf32> to vector<2x32xf32>
    %388 = arith.addf %387, %385 : vector<2x32xf32>
    %c8_i32 = arith.constant 8 : i32
    %389 = vector.broadcast %c8_i32 : i32 to vector<2x1xi32>
    %390 = arith.cmpi eq, %1, %389 : vector<2x1xi32>
    %391 = vector.shape_cast %390 : vector<2x1xi1> to vector<2x1xi1>
    %392 = vector.broadcast %391 : vector<2x1xi1> to vector<2x32xi1>
    %393 = arith.select %392, %388, %348 : vector<2x32xi1>, vector<2x32xf32>
    %c7_i32_68 = arith.constant 7 : i32
    %394 = vector.broadcast %c7_i32_68 : i32 to vector<2x1xi32>
    %395 = arith.cmpi sgt, %1, %394 : vector<2x1xi32>
    %cst_69 = arith.constant -1.000000e+30 : f32
    %396 = vector.shape_cast %395 : vector<2x1xi1> to vector<2x1xi1>
    %397 = vector.broadcast %396 : vector<2x1xi1> to vector<2x32xi1>
    %398 = vector.broadcast %cst_69 : f32 to vector<2x32xf32>
    %399 = arith.select %397, %388, %398 : vector<2x32xi1>, vector<2x32xf32>
    %400 = arith.maximumf %355, %399 : vector<2x32xf32>
    %c0_70 = arith.constant 0 : index
    %c0_71 = arith.constant 0 : index
    %401 = vector.load %arg7[%c0_70, %c0_71] : memref<1x64xf32, #tpu.memory_space<vmem>>, vector<1x64xf32>
    %c0_72 = arith.constant 0 : index
    %c0_73 = arith.constant 0 : index
    %402 = vector.load %arg8[%c0_72, %c0_73] : memref<1x64xf32, #tpu.memory_space<vmem>>, vector<1x64xf32>
    %403 = vector.extract_strided_slice %401 {offsets = [0, 0], sizes = [1, 32], strides = [1, 1]} : vector<1x64xf32> to vector<1x32xf32>
    %404 = vector.broadcast %403 : vector<1x32xf32> to vector<2x32xf32>
    %405 = arith.mulf %393, %404 : vector<2x32xf32>
    %406 = vector.extract_strided_slice %402 {offsets = [0, 0], sizes = [1, 32], strides = [1, 1]} : vector<1x64xf32> to vector<1x32xf32>
    %407 = vector.broadcast %406 : vector<1x32xf32> to vector<2x32xf32>
    %408 = arith.addf %405, %407 : vector<2x32xf32>
    %cst_74 = arith.constant 0.000000e+00 : f32
    %409 = vector.broadcast %cst_74 : f32 to vector<2x32xf32>
    %410 = arith.maximumf %408, %409 : vector<2x32xf32>
    %411 = vector.extract_strided_slice %401 {offsets = [0, 32], sizes = [1, 32], strides = [1, 1]} : vector<1x64xf32> to vector<1x32xf32>
    %412 = vector.broadcast %411 : vector<1x32xf32> to vector<2x32xf32>
    %413 = arith.mulf %400, %412 : vector<2x32xf32>
    %414 = vector.extract_strided_slice %402 {offsets = [0, 32], sizes = [1, 32], strides = [1, 1]} : vector<1x64xf32> to vector<1x32xf32>
    %415 = vector.broadcast %414 : vector<1x32xf32> to vector<2x32xf32>
    %416 = arith.addf %413, %415 : vector<2x32xf32>
    %cst_75 = arith.constant 0.000000e+00 : f32
    %417 = vector.broadcast %cst_75 : f32 to vector<2x32xf32>
    %418 = arith.maximumf %416, %417 : vector<2x32xf32>
    %c0_76 = arith.constant 0 : index
    %c0_77 = arith.constant 0 : index
    %419 = vector.load %arg9[%c0_76, %c0_77] : memref<64x256xbf16, #tpu.memory_space<vmem>>, vector<64x256xbf16>
    %420 = arith.truncf %410 : vector<2x32xf32> to vector<2x32xbf16>
    %421 = vector.extract_strided_slice %419 {offsets = [0, 0], sizes = [32, 256], strides = [1, 1]} : vector<64x256xbf16> to vector<32x256xbf16>
    %cst_78 = arith.constant dense<0.000000e+00> : vector<2x256xf32>
    %422 = tpu.matmul %420, %421, %cst_78 {dimension_numbers = #tpu.dot_dimension_numbers<[1], [0], [0], [1], [0, 0, 1, 1], [], []>} : vector<2x32xbf16>, vector<32x256xbf16>, vector<2x256xf32> -> vector<2x256xf32>
    %423 = arith.truncf %418 : vector<2x32xf32> to vector<2x32xbf16>
    %424 = vector.extract_strided_slice %419 {offsets = [32, 0], sizes = [32, 256], strides = [1, 1]} : vector<64x256xbf16> to vector<32x256xbf16>
    %cst_79 = arith.constant dense<0.000000e+00> : vector<2x256xf32>
    %425 = tpu.matmul %423, %424, %cst_79 {dimension_numbers = #tpu.dot_dimension_numbers<[1], [0], [0], [1], [0, 0, 1, 1], [], []>} : vector<2x32xbf16>, vector<32x256xbf16>, vector<2x256xf32> -> vector<2x256xf32>
    %426 = arith.addf %422, %425 : vector<2x256xf32>
    %c0_80 = arith.constant 0 : index
    %c0_81 = arith.constant 0 : index
    %427 = vector.load %arg10[%c0_80, %c0_81] : memref<1x256xf32, #tpu.memory_space<vmem>>, vector<1x256xf32>
    %428 = vector.broadcast %427 : vector<1x256xf32> to vector<2x256xf32>
    %429 = arith.addf %426, %428 : vector<2x256xf32>
    %c0_82 = arith.constant 0 : index
    %c0_83 = arith.constant 0 : index
    %430 = vector.load %arg11[%c0_82, %c0_83] : memref<1x256xf32, #tpu.memory_space<vmem>>, vector<1x256xf32>
    %431 = vector.broadcast %430 : vector<1x256xf32> to vector<2x256xf32>
    %432 = arith.mulf %429, %431 : vector<2x256xf32>
    %c0_84 = arith.constant 0 : index
    %c0_85 = arith.constant 0 : index
    %433 = vector.load %arg12[%c0_84, %c0_85] : memref<1x256xf32, #tpu.memory_space<vmem>>, vector<1x256xf32>
    %434 = vector.broadcast %433 : vector<1x256xf32> to vector<2x256xf32>
    %435 = arith.addf %432, %434 : vector<2x256xf32>
    %cst_86 = arith.constant 0.000000e+00 : f32
    %436 = vector.broadcast %cst_86 : f32 to vector<2x256xf32>
    %437 = arith.maximumf %435, %436 : vector<2x256xf32>
    %438 = arith.truncf %437 : vector<2x256xf32> to vector<2x256xbf16>
    %c0_87 = arith.constant 0 : index
    %c0_88 = arith.constant 0 : index
    %439 = vector.load %arg13[%c0_87, %c0_88] : memref<256x64xbf16, #tpu.memory_space<vmem>>, vector<256x64xbf16>
    %cst_89 = arith.constant dense<0.000000e+00> : vector<2x64xf32>
    %440 = tpu.matmul %438, %439, %cst_89 {dimension_numbers = #tpu.dot_dimension_numbers<[1], [0], [0], [1], [0, 0, 1, 1], [], []>} : vector<2x256xbf16>, vector<256x64xbf16>, vector<2x64xf32> -> vector<2x64xf32>
    %c0_90 = arith.constant 0 : index
    %c0_91 = arith.constant 0 : index
    %441 = vector.load %arg14[%c0_90, %c0_91] : memref<1x64xf32, #tpu.memory_space<vmem>>, vector<1x64xf32>
    %442 = vector.broadcast %441 : vector<1x64xf32> to vector<2x64xf32>
    %443 = arith.addf %440, %442 : vector<2x64xf32>
    %c0_92 = arith.constant 0 : index
    %c0_93 = arith.constant 0 : index
    %444 = vector.load %arg15[%c0_92, %c0_93] : memref<1x64xf32, #tpu.memory_space<vmem>>, vector<1x64xf32>
    %445 = vector.broadcast %444 : vector<1x64xf32> to vector<2x64xf32>
    %446 = arith.mulf %443, %445 : vector<2x64xf32>
    %c0_94 = arith.constant 0 : index
    %c0_95 = arith.constant 0 : index
    %447 = vector.load %arg16[%c0_94, %c0_95] : memref<1x64xf32, #tpu.memory_space<vmem>>, vector<1x64xf32>
    %448 = vector.broadcast %447 : vector<1x64xf32> to vector<2x64xf32>
    %449 = arith.addf %446, %448 : vector<2x64xf32>
    %cst_96 = arith.constant 0.000000e+00 : f32
    %450 = vector.broadcast %cst_96 : f32 to vector<2x64xf32>
    %451 = arith.maximumf %449, %450 : vector<2x64xf32>
    %452 = arith.truncf %451 : vector<2x64xf32> to vector<2x64xbf16>
    %c0_97 = arith.constant 0 : index
    %c0_98 = arith.constant 0 : index
    %453 = vector.load %arg17[%c0_97, %c0_98] : memref<64x4xbf16, #tpu.memory_space<vmem>>, vector<64x4xbf16>
    %cst_99 = arith.constant dense<0.000000e+00> : vector<2x4xf32>
    %454 = tpu.matmul %452, %453, %cst_99 {dimension_numbers = #tpu.dot_dimension_numbers<[1], [0], [0], [1], [0, 0, 1, 1], [], []>} : vector<2x64xbf16>, vector<64x4xbf16>, vector<2x4xf32> -> vector<2x4xf32>
    %c0_100 = arith.constant 0 : index
    %c0_101 = arith.constant 0 : index
    %455 = vector.load %arg18[%c0_100, %c0_101] : memref<1x4xf32, #tpu.memory_space<vmem>>, vector<1x4xf32>
    %456 = vector.broadcast %455 : vector<1x4xf32> to vector<2x4xf32>
    %457 = arith.addf %454, %456 : vector<2x4xf32>
    %c0_102 = arith.constant 0 : index
    %c0_103 = arith.constant 0 : index
    %458 = vector.load %arg19[%c0_102, %c0_103] : memref<2x4xf32, #tpu.memory_space<vmem>>, vector<2x4xf32>
    tpu.vector_store %arg19[%c0_102, %c0_103], %457 {strides = array<i32>} : memref<2x4xf32, #tpu.memory_space<vmem>>, vector<2x4xf32>,
    return
  }
}

</mosaic_0001>

<bundles_post_ra>
// kernel: final_preln_transformer_forward.3
= control target key start
LH: loop header
LB: loop body
LE: loop exit
PB: predicated region body
PF: predicated region fallthrough
CT: control target
= control target key end

     0   :  { %s2730_s0 = inlined_call_operand.vmem [shape: f32[2,8,32], index: 0, kind: input, shape index: {}]   ;;  %s2731_s1 = inlined_call_operand.vmem [shape: s32[2,1], index: 1, kind: input, shape index: {}]   ;;  %s2732_s2 = inlined_call_operand.vmem [shape: f32[1,32], index: 2, kind: input, shape index: {}]   ;;  %s2733_s3 = inlined_call_operand.vmem [shape: f32[1,32], index: 3, kind: input, shape index: {}]   ;;  %s2734_s4 = inlined_call_operand.vmem [shape: bf16[32,128], index: 4, kind: input, shape index: {}]   ;;  %s2735_s5 = inlined_call_operand.vmem [shape: bf16[32,128], index: 5, kind: input, shape index: {}]   ;;  %s2736_s6 = inlined_call_operand.vmem [shape: f32[1,128], index: 6, kind: input, shape index: {}]   ;;  %s2737_s7 = inlined_call_operand.vmem [shape: f32[1,64], index: 7, kind: input, shape index: {}]   ;;  %s2738_s8 = inlined_call_operand.vmem [shape: f32[1,64], index: 8, kind: input, shape index: {}]   ;;  %s2739_s9 = inlined_call_operand.vmem [shape: bf16[64,256], index: 9, kind: input, shape index: {}]   ;;  %s2740_s10 = inlined_call_operand.vmem [shape: f32[1,256], index: 10, kind: input, shape index: {}]   ;;  %s2741_s11 = inlined_call_operand.vmem [shape: f32[1,256], index: 11, kind: input, shape index: {}]   ;;  %s2742_s12 = inlined_call_operand.vmem [shape: f32[1,256], index: 12, kind: input, shape index: {}]   ;;  %s2743_s13 = inlined_call_operand.vmem [shape: bf16[256,64], index: 13, kind: input, shape index: {}]   ;;  %s2744_s14 = inlined_call_operand.vmem [shape: f32[1,64], index: 14, kind: input, shape index: {}]   ;;  %s2745_s15 = inlined_call_operand.vmem [shape: f32[1,64], index: 15, kind: input, shape index: {}]   ;;  %s2746_s16 = inlined_call_operand.vmem [shape: f32[1,64], index: 16, kind: input, shape index: {}]   ;;  %s2747_s17 = inlined_call_operand.vmem [shape: bf16[64,4], index: 17, kind: input, shape index: {}]   ;;  %s2748_s18 = inlined_call_operand.vmem [shape: f32[1,4], index: 18, kind: input, shape index: {}]   ;;  %s2749_s19 = inlined_call_operand.hbm [shape: f32[2,4], index: 19, kind: output, shape index: {}]  }
   0x1   :  { %2751 = sst [smem:[#allocation5_spill]] %s2730_s0 }
   0x2   :  { %2752 = sst [smem:[#allocation6_spill]] %s2731_s1 }
   0x3   :  { %2753 = sst [smem:[#allocation7_spill]] %s2732_s2 }
   0x4   :  { %2754 = sst [smem:[#allocation8_spill]] %s2733_s3 }
   0x5   :  { %s2755_s20 = sld [smem:[#allocation5_spill]]  ;;  %vm69_vm0 = vcmask 261120  }
   0xb   :  { %v64_v0 = vld [vmem:[%s2755_s20] sm:$0xff]  ;;  %v65_v2 = vld [vmem:[%s2755_s20 + $0x8] sm:$0xff] }
   0xc   :  { %v70_v1 = vsel %vm69_vm0, %v64_v0, 0.0 }
   0xd   :  { %71 = vadd.xlane.f32.xlu0 %v70_v1 }
   0xe   :  { %24 = vsyncpa [#allocation3], 0  ;;  %v73_v3 = vsel %vm69_vm0, %v65_v2, 0.0  ;;  %v2096_v4 = vmov 32.0   ;;  %v1885_v21 = vld [vmem:[%s2734_s4 + $0x8] sm:$0xff]  ;;  %v1884_v24 = vld [vmem:[%s2734_s4] sm:$0xff] }
   0xf   :  { %1934 = vrcp.f32 %v2096_v4  ;;  %v1887_v22 = vld [vmem:[%s2735_s5 + $0x8] sm:$0xff]  ;;  %161 = vmatpush.bf16.msra.mxu0 %v1885_v21  ;;  %v1886_v25 = vld [vmem:[%s2735_s5] sm:$0xff]  ;;  %v2097_v28 = vmov 0   ;;  %s2756_s28 = sld [smem:[#allocation7_spill]]  ;;  %s2098_s22 = smov 64  }
  0x10   :  { %194 = vmatpush.bf16.msra.mxu1 %v1887_v22  ;;  %332 = vmatpush.bf16.msra.mxu2 %v1887_v22  ;;  %s2757_s30 = sld [smem:[#allocation8_spill]]  ;;  %v1927_v58 = vld [vmem:[%s2736_s6] ss:$0 sm:$0xff]  ;;  %s2099_s6 = smov 32  }
  0x11   :  { %475 = vmatpush.bf16.msra.mxu3 %v1887_v22  ;;  %1922 = vset.pattern.permute.xlu0 %v2097_v28  ;;  %s2758_s24 = sld [smem:[#allocation6_spill]]  ;;  %s2100_s5 = smov 96  }
  0x12   :  { %1923 = vset.pattern.permute.xlu1 %v2097_v28  ;;  %1924 = vset.pattern.permute.xlu2 %v2097_v28 }
  0x13   :  { %162 = vmatpush.bf16.msra.mxu0 %v1884_v24 }
  0x14   :  { %195 = vmatpush.bf16.msra.mxu1 %v1886_v25  ;;  %333 = vmatpush.bf16.msra.mxu2 %v1886_v25 }
  0x15   :  { %74 = vadd.xlane.f32.xlu0 %v73_v3  ;;  %v1935_v5 = vpop.eup %1934  ;;  %476 = vmatpush.bf16.msra.mxu3 %v1886_v25  ;;  %v1925_v45 = vld [vmem:[%s2756_s28] ss:$0 sm:$0xff] }
  0x16   :  { %v77_v6 = vmul.f32 32.0, %v1935_v5  ;;  %vm81_vm1 = vweird.f32 %v1935_v5  ;;  %v1926_v50 = vld [vmem:[%s2757_s30] ss:$0 sm:$0xff] }
  0x17   :  { %621 = vmatpush.bf16.msrb.mxu0 %v1887_v22  ;;  %196 = vmatmul.bf16.vlgmr.msra.gmra.mxu1 %v2097_v28 }
  0x18   :  { %v78_v7 = vsub.f32 1.0, %v77_v6  ;;  %767 = vmatpush.bf16.msrb.mxu1 %v1887_v22  ;;  %913 = vmatpush.bf16.msrb.mxu2 %v1887_v22 }
  0x19   :  { %1059 = vmatpush.bf16.msrb.mxu3 %v1887_v22 }
  0x1a   :  { %v79_v8 = vmul.f32 %v1935_v5, %v78_v7 }
  0x1b   :  { %622 = vmatpush.bf16.msrb.mxu0 %v1886_v25 }
  0x1c   :  { %v80_v9 = vadd.f32 %v1935_v5, %v79_v8  ;;  %768 = vmatpush.bf16.msrb.mxu1 %v1886_v25  ;;  %914 = vmatpush.bf16.msrb.mxu2 %v1886_v25 }
  0x1d   :  { %1060 = vmatpush.bf16.msrb.mxu3 %v1886_v25 }
  0x1e   :  { %v82_v10 = vsel %vm81_vm1, %v1935_v5, %v80_v9  ;;  %vm300_vm1 = vcmask 1041409  }
  0x80   :  { %v72_v11 = vpop.xlane.xlu0 %71 }
  0x81   :  { %v83_v12 = vmul.f32 %v82_v10, %v72_v11 }
  0x83   :  { %v85_v13 = vsub.f32 %v64_v0, %v83_v12 }
  0x85   :  { %v87_v14 = vmul.f32 %v85_v13, %v85_v13 }
  0x87   :  { %v89_v15 = vsel %vm69_vm0, %v87_v14, 0.0 }
  0x88   :  { %90 = vadd.xlane.f32.xlu1 %v89_v15  ;;  %v75_v16 = vpop.xlane.xlu0 %74 }
  0x89   :  { %v84_v17 = vmul.f32 %v82_v10, %v75_v16 }
  0x8b   :  { %v86_v18 = vsub.f32 %v65_v2, %v84_v17 }
  0x8d   :  { %v88_v19 = vmul.f32 %v86_v18, %v86_v18 }
  0x8f   :  { %v92_v20 = vsel %vm69_vm0, %v88_v19, 0.0 }
  0x90   :  { %93 = vadd.xlane.f32.xlu1 %v92_v20 }
  0x94   :  { %v197_v55 = vpop.f32.mrf.mxu1 }
  0x95   :  { %v202_v59 = vrot.slane %v197_v55, 1 }
  0x9c   :  { %v199_v56 = vpop.f32.mrf.mxu1 }
  0xfb   :  { %v91_v23 = vpop.xlane.xlu1 %90 }
  0xfc   :  { %v95_v26 = vmul.f32 %v91_v23, %v82_v10 }
  0xfe   :  { %v97_v27 = vadd.f32 1e-05, %v95_v26 }
 0x100   :  { %1936 = vrsqrt.f32 %v97_v27  ;;  %vm105_vm3 = vweird.f32 %v97_v27 }
 0x103   :  { %v94_v29 = vpop.xlane.xlu1 %93 }
 0x104   :  { %v96_v30 = vmul.f32 %v94_v29, %v82_v10 }
 0x106   :  { %v1937_v31 = vpop.eup %1936  ;;  %v98_v32 = vadd.f32 1e-05, %v96_v30 }
 0x107   :  { %v100_v33 = vmul.f32 %v1937_v31, %v97_v27  ;;  %vm106_vm2 = vweird.f32 %v1937_v31 }
 0x108   :  { %1938 = vrsqrt.f32 %v98_v32  ;;  %vm107_vm4 = vmor %vm105_vm3, %vm106_vm2  ;;  %vm115_vm6 = vweird.f32 %v98_v32 }
 0x109   :  { %v101_v34 = vmul.f32 %v1937_v31, %v100_v33 }
 0x10b   :  { %v102_v35 = vmul.f32 0.5, %v101_v34 }
 0x10d   :  { %v103_v36 = vsub.f32 1.5, %v102_v35 }
 0x10e   :  { %v1939_v37 = vpop.eup %1938 }
 0x10f   :  { %v104_v38 = vmul.f32 %v1937_v31, %v103_v36  ;;  %v110_v39 = vmul.f32 %v1939_v37, %v98_v32  ;;  %vm116_vm5 = vweird.f32 %v1939_v37 }
 0x110   :  { %vm117_vm7 = vmor %vm115_vm6, %vm116_vm5 }
 0x111   :  { %v111_v40 = vmul.f32 %v1939_v37, %v110_v39  ;;  %v108_v41 = vsel %vm107_vm4, %v1937_v31, %v104_v38 }
 0x112   :  { %v119_v44 = vmul.f32 %v108_v41, %v85_v13 }
 0x113   :  { %v112_v42 = vmul.f32 0.5, %v111_v40 }
 0x114   :  { %v124_v49 = vmul.f32 %v1925_v45, %v119_v44 }
 0x115   :  { %v113_v43 = vsub.f32 1.5, %v112_v42 }
 0x116   :  { %v129_v52 = vadd.f32 %v1926_v50, %v124_v49 }
 0x117   :  { %v114_v46 = vmul.f32 %v1939_v37, %v113_v43 }
 0x119   :  { %v118_v47 = vsel %vm117_vm7, %v1939_v37, %v114_v46 }
 0x11a   :  { %v120_v48 = vmul.f32 %v118_v47, %v86_v18 }
 0x11c   :  { %v125_v51 = vmul.f32 %v1925_v45, %v120_v48 }
 0x11e   :  { %v130_v53 = vadd.f32 %v1926_v50, %v125_v51 }
 0x120   :  { %v131_v54 = vpack.c.bf16 %v130_v53, %v129_v52 }
 0x122   :  { %1735 = vmatmul.msk.bf16.vlgmr.msra.gmra.mxu0 %vm69_vm0, %v131_v54 }
 0x123   :  { %1205 = vmatpush.bf16.msra.mxu0 %v1887_v22 }
 0x127   :  { %1206 = vmatpush.bf16.msra.mxu0 %v1886_v25 }
 0x19f   :  { %v164_v57 = vpop.f32.mrf.mxu0 }
 0x1a0   :  { %v2241_v63 = vadd.f32 %v1927_v58, %v164_v57 }
 0x1a2   :  { %v205_v0 = vadd.f32 %v197_v55, %v2241_v63 }
 0x1a4   :  { %v1744_v4 = vmul.f32 -1.442695, %v205_v0 }
 0x1a7   :  { %v166_v60 = vpop.f32.mrf.mxu0 }
 0x1a8   :  { %v2238_v61 = vadd.f32 %v1927_v58, %v166_v60 }
 0x1aa   :  { %v206_v62 = vadd.f32 %v202_v59, %v2238_v61 }
 0x1ac   :  { %1940 = vtanh.f32 %v206_v62  ;;  %v1745_v3 = vmul.f32 -1.442695, %v206_v62 }
 0x1ad   :  { %1942 = vtanh.f32 %v205_v0 }
 0x1ae   :  { %1944 = vpow2.f32 %v1745_v3 }
 0x1af   :  { %1946 = vpow2.f32 %v1744_v4 }
 0x1b2   :  { %v1941_v1 = vpop.eup %1940 }
 0x1b3   :  { %253 = vrot.lane.b32.xlu2 %v1941_v1, %s2098_s22  ;;  %v1943_v2 = vpop.eup %1942 }
 0x1b4   :  { %v1945_v5 = vpop.eup %1944 }
 0x1b5   :  { %v214_v6 = vadd.f32 1.0, %v1945_v5  ;;  %v1947_v7 = vpop.eup %1946 }
 0x1b6   :  { %v213_v8 = vadd.f32 1.0, %v1947_v7 }
 0x1b7   :  { %1948 = vrcp.f32 %v214_v6  ;;  %v241_v17 = vand.u32 2147483648, %v214_v6  ;;  %vm235_vm9 = vweird.f32 %v214_v6  ;;  %v239_v18 = vand.u32 2147483647, %v214_v6 }
 0x1b8   :  { %1950 = vrcp.f32 %v213_v8  ;;  %v226_v26 = vand.u32 2147483648, %v213_v8  ;;  %vm220_vm13 = vweird.f32 %v213_v8  ;;  %v224_v27 = vand.u32 2147483647, %v213_v8 }
 0x1b9   :  { %v242_v21 = vor.u32 1.1754944e-38, %v241_v17  ;;  %vm240_vm11 = vcmp.eq.f32.partialorder %v239_v18, 8.507059e+37 }
 0x1ba   :  { %v227_v30 = vor.u32 1.1754944e-38, %v226_v26  ;;  %vm225_vm15 = vcmp.eq.f32.partialorder %v224_v27, 8.507059e+37 }
 0x1bb   :  { %251 = vrot.lane.b32.xlu2 %v1943_v2, %s2098_s22 }
 0x1bd   :  { %v1949_v9 = vpop.eup %1948 }
 0x1be   :  { %v231_v10 = vmul.f32 %v1949_v9, %v214_v6  ;;  %v1951_v12 = vpop.eup %1950  ;;  %vm236_vm8 = vweird.f32 %v1949_v9 }
 0x1bf   :  { %v216_v14 = vmul.f32 %v1951_v12, %v213_v8  ;;  %vm237_vm10 = vmor %vm235_vm9, %vm236_vm8  ;;  %vm221_vm12 = vweird.f32 %v1951_v12 }
 0x1c0   :  { %v232_v11 = vsub.f32 1.0, %v231_v10  ;;  %vm222_vm14 = vmor %vm220_vm13, %vm221_vm12 }
 0x1c1   :  { %v217_v16 = vsub.f32 1.0, %v216_v14 }
 0x1c2   :  { %v233_v13 = vmul.f32 %v1949_v9, %v232_v11 }
 0x1c3   :  { %v218_v20 = vmul.f32 %v1951_v12, %v217_v16 }
 0x1c4   :  { %v234_v15 = vadd.f32 %v1949_v9, %v233_v13 }
 0x1c5   :  { %v219_v25 = vadd.f32 %v1951_v12, %v218_v20 }
 0x1c6   :  { %v238_v19 = vsel %vm237_vm10, %v1949_v9, %v234_v15 }
 0x1c7   :  { %v243_v23 = vsel %vm240_vm11, %v242_v21, %v238_v19  ;;  %v223_v29 = vsel %vm222_vm14, %v1951_v12, %v219_v25 }
 0x1c8   :  { %v228_v32 = vsel %vm225_vm15, %v227_v30, %v223_v29  ;;  %v248_v34 = vmul.f32 0.0, %v243_v23 }
 0x1c9   :  { %v247_v37 = vmul.f32 0.0, %v228_v32 }
 0x20d   :  { %v254_v22 = vpop.permute.xlu2 %253 }
 0x20e   :  { %v258_v24 = vmul.f32 %v254_v22, %v243_v23 }
 0x210   :  { %263 = vrot.lane.b32.xlu0 %v258_v24, %s2099_s6 }
 0x215   :  { %v252_v31 = vpop.permute.xlu2 %251 }
 0x216   :  { %v257_v33 = vmul.f32 %v252_v31, %v228_v32 }
 0x218   :  { %261 = vrot.lane.b32.xlu1 %v257_v33, %s2099_s6 }
 0x282   :  { %v264_v35 = vpop.permute.xlu0 %263 }
 0x283   :  { %v2248_v36 = vadd.f32 %v264_v35, %v248_v34 }
 0x285   :  { %1952 = vtanh.f32 %v2248_v36  ;;  %v388_v30 = vrot.slane %v2248_v36, 7 }
 0x28a   :  { %v262_v38 = vpop.permute.xlu1 %261 }
 0x28b   :  { %v1953_v39 = vpop.eup %1952  ;;  %v2251_v40 = vadd.f32 %v262_v38, %v247_v37 }
 0x28c   :  { %275 = vrot.lane.b32.xlu2 %v1953_v39, %s2098_s22 }
 0x28d   :  { %1954 = vtanh.f32 %v2251_v40  ;;  %v387_v35 = vrot.slane %v2251_v40, 7 }
 0x293   :  { %v1955_v41 = vpop.eup %1954 }
 0x294   :  { %273 = vrot.lane.b32.xlu2 %v1955_v41, %s2098_s22 }
 0x2e6   :  { %v276_v42 = vpop.permute.xlu2 %275 }
 0x2e7   :  { %v2256_v43 = vmul.f32 %v276_v42, %v243_v23 }
 0x2e9   :  { %v313_v44 = vpack.c.bf16 %v2256_v43, %v2256_v43 }
 0x2eb   :  { %v317_v46 = vunpack.c.l.b16 %v313_v44 }
 0x2ed   :  { %v318_v49 = vrot.slane %v317_v46, 7 }
 0x2ee   :  { %v274_v45 = vpop.permute.xlu2 %273 }
 0x2ef   :  { %v2260_v47 = vmul.f32 %v274_v45, %v228_v32 }
 0x2f1   :  { %v312_v48 = vpack.c.bf16 %v2260_v47, %v2260_v47 }
 0x2f3   :  { %v316_v50 = vunpack.c.l.b16 %v312_v48 }
 0x2f5   :  { %v319_v51 = vsel %vm300_vm1, %v318_v49, %v316_v50 }
 0x2f6   :  { %v320_v52 = vpack.c.b16 %v319_v51, %v319_v51 }
 0x2f8   :  { %321 = vrot.lane.b32.xlu2 %v320_v52, %s2099_s6 }
 0x352   :  { %v322_v53 = vpop.permute.xlu2 %321 }
 0x353   :  { %1746 = vmatmul.msk.bf16.vlgmr.msra.gmra.mxu2 %vm69_vm0, %v322_v53 }
 0x3d6   :  { %v335_v54 = vpop.f32.mrf.mxu2 }
 0x3d7   :  { %v340_v55 = vrot.slane %v335_v54, 7  ;;  %v344_v56 = vadd.f32 %v335_v54, %v2238_v61 }
 0x3d9   :  { %v343_v57 = vadd.f32 %v340_v55, %v2241_v63  ;;  %1956 = vtanh.f32 %v344_v56  ;;  %v1748_v62 = vmul.f32 -1.442695, %v344_v56 }
 0x3db   :  { %1958 = vtanh.f32 %v343_v57  ;;  %v1747_v4 = vmul.f32 -1.442695, %v343_v57 }
 0x3dc   :  { %1960 = vpow2.f32 %v1748_v62 }
 0x3de   :  { %v337_v58 = vpop.f32.mrf.mxu2 }
 0x3df   :  { %v1957_v59 = vpop.eup %1956 }
 0x3e0   :  { %397 = vrot.lane.b32.xlu2 %v1957_v59, %s2098_s22 }
 0x3e1   :  { %v1959_v60 = vpop.eup %1958 }
 0x3e2   :  { %395 = vrot.lane.b32.xlu0 %v1959_v60, %s2098_s22  ;;  %v1961_v0 = vpop.eup %1960 }
 0x3e3   :  { %v352_v1 = vadd.f32 1.0, %v1961_v0 }
 0x3e5   :  { %1962 = vrcp.f32 %v352_v1  ;;  %v379_v9 = vand.u32 2147483648, %v352_v1  ;;  %vm373_vm3 = vweird.f32 %v352_v1  ;;  %v377_v11 = vand.u32 2147483647, %v352_v1 }
 0x3e6   :  { %1964 = vpow2.f32 %v1747_v4 }
 0x3e7   :  { %v380_v13 = vor.u32 1.1754944e-38, %v379_v9  ;;  %vm378_vm5 = vcmp.eq.f32.partialorder %v377_v11, 8.507059e+37 }
 0x3eb   :  { %v1963_v2 = vpop.eup %1962 }
 0x3ec   :  { %v369_v3 = vmul.f32 %v1963_v2, %v352_v1  ;;  %v1965_v7 = vpop.eup %1964  ;;  %vm374_vm2 = vweird.f32 %v1963_v2 }
 0x3ed   :  { %v351_v10 = vadd.f32 1.0, %v1965_v7  ;;  %vm375_vm4 = vmor %vm373_vm3, %vm374_vm2 }
 0x3ee   :  { %v370_v5 = vsub.f32 1.0, %v369_v3 }
 0x3ef   :  { %1966 = vrcp.f32 %v351_v10  ;;  %v364_v22 = vand.u32 2147483648, %v351_v10  ;;  %vm358_vm7 = vweird.f32 %v351_v10  ;;  %v362_v23 = vand.u32 2147483647, %v351_v10 }
 0x3f0   :  { %v371_v6 = vmul.f32 %v1963_v2, %v370_v5 }
 0x3f1   :  { %v365_v25 = vor.u32 1.1754944e-38, %v364_v22  ;;  %vm363_vm9 = vcmp.eq.f32.partialorder %v362_v23, 8.507059e+37 }
 0x3f2   :  { %v372_v8 = vadd.f32 %v1963_v2, %v371_v6 }
 0x3f4   :  { %v376_v12 = vsel %vm375_vm4, %v1963_v2, %v372_v8 }
 0x3f5   :  { %v381_v15 = vsel %vm378_vm5, %v380_v13, %v376_v12  ;;  %v1967_v17 = vpop.eup %1966 }
 0x3f6   :  { %v354_v18 = vmul.f32 %v1967_v17, %v351_v10  ;;  %vm359_vm6 = vweird.f32 %v1967_v17  ;;  %v392_v31 = vmul.f32 %v388_v30, %v381_v15 }
 0x3f7   :  { %vm360_vm8 = vmor %vm358_vm7, %vm359_vm6 }
 0x3f8   :  { %v355_v19 = vsub.f32 1.0, %v354_v18 }
 0x3fa   :  { %v356_v20 = vmul.f32 %v1967_v17, %v355_v19 }
 0x3fc   :  { %v357_v21 = vadd.f32 %v1967_v17, %v356_v20 }
 0x3fe   :  { %v361_v24 = vsel %vm360_vm8, %v1967_v17, %v357_v21 }
 0x3ff   :  { %v366_v27 = vsel %vm363_vm9, %v365_v25, %v361_v24 }
 0x400   :  { %v391_v37 = vmul.f32 %v387_v35, %v366_v27 }
 0x43a   :  { %v398_v14 = vpop.permute.xlu2 %397 }
 0x43b   :  { %v402_v16 = vmul.f32 %v398_v14, %v381_v15 }
 0x43d   :  { %407 = vrot.lane.b32.xlu0 %v402_v16, %s2099_s6 }
 0x454   :  { %v396_v26 = vpop.permute.xlu0 %395 }
 0x455   :  { %v401_v29 = vmul.f32 %v396_v26, %v366_v27 }
 0x457   :  { %405 = vrot.lane.b32.xlu1 %v401_v29, %s2099_s6 }
 0x4af   :  { %v408_v32 = vpop.permute.xlu0 %407 }
 0x4b0   :  { %v2274_v33 = vadd.f32 %v408_v32, %v392_v31 }
 0x4b2   :  { %1968 = vtanh.f32 %v2274_v33  ;;  %v532_v32 = vrot.slane %v2274_v33, 7 }
 0x4b8   :  { %v1969_v34 = vpop.eup %1968 }
 0x4b9   :  { %419 = vrot.lane.b32.xlu1 %v1969_v34, %s2098_s22 }
 0x4c9   :  { %v406_v38 = vpop.permute.xlu1 %405 }
 0x4ca   :  { %v2279_v39 = vadd.f32 %v406_v38, %v391_v37 }
 0x4cc   :  { %1970 = vtanh.f32 %v2279_v39  ;;  %v531_v31 = vrot.slane %v2279_v39, 7 }
 0x4d2   :  { %v1971_v41 = vpop.eup %1970 }
 0x4d3   :  { %417 = vrot.lane.b32.xlu2 %v1971_v41, %s2098_s22 }
 0x52b   :  { %v420_v36 = vpop.permute.xlu1 %419 }
 0x52c   :  { %v2283_v42 = vmul.f32 %v420_v36, %v381_v15 }
 0x52d   :  { %v418_v44 = vpop.permute.xlu2 %417 }
 0x52e   :  { %v2285_v45 = vmul.f32 %v418_v44, %v366_v27  ;;  %v456_v46 = vpack.c.bf16 %v2283_v42, %v2283_v42 }
 0x530   :  { %v455_v40 = vpack.c.bf16 %v2285_v45, %v2285_v45  ;;  %v460_v49 = vunpack.c.l.b16 %v456_v46 }
 0x532   :  { %v459_v48 = vunpack.c.l.b16 %v455_v40 }
 0x534   :  { %v461_v50 = vrot.slane %v459_v48, 1 }
 0x536   :  { %v462_v51 = vsel %vm300_vm1, %v460_v49, %v461_v50 }
 0x537   :  { %v463_v52 = vpack.c.b16 %v462_v51, %v462_v51 }
 0x539   :  { %464 = vrot.lane.b32.xlu0 %v463_v52, %s2099_s6 }
 0x5ab   :  { %v465_v53 = vpop.permute.xlu0 %464 }
 0x5ac   :  { %1749 = vmatmul.msk.bf16.vlgmr.msra.gmra.mxu3 %vm69_vm0, %v465_v53 }
 0x62f   :  { %v478_v54 = vpop.f32.mrf.mxu3 }
 0x630   :  { %v483_v55 = vrot.slane %v478_v54, 6  ;;  %v484_v56 = vrot.slane %v478_v54, 7 }
 0x632   :  { %v487_v57 = vadd.f32 %v483_v55, %v2241_v63  ;;  %v488_v58 = vadd.f32 %v484_v56, %v2238_v61 }
 0x634   :  { %1972 = vtanh.f32 %v487_v57  ;;  %v1750_v0 = vmul.f32 -1.442695, %v487_v57  ;;  %v1751_v4 = vmul.f32 -1.442695, %v488_v58 }
 0x635   :  { %1974 = vtanh.f32 %v488_v58 }
 0x636   :  { %1976 = vpow2.f32 %v1750_v0 }
 0x637   :  { %v480_v59 = vpop.f32.mrf.mxu3 }
 0x63a   :  { %v1973_v60 = vpop.eup %1972 }
 0x63b   :  { %v1975_v62 = vpop.eup %1974  ;;  %539 = vrot.lane.b32.xlu2 %v1973_v60, %s2098_s22 }
 0x63c   :  { %541 = vrot.lane.b32.xlu1 %v1975_v62, %s2098_s22  ;;  %v1977_v1 = vpop.eup %1976 }
 0x63d   :  { %v495_v2 = vadd.f32 1.0, %v1977_v1 }
 0x63f   :  { %1978 = vrcp.f32 %v495_v2  ;;  %v508_v11 = vand.u32 2147483648, %v495_v2  ;;  %vm502_vm11 = vweird.f32 %v495_v2  ;;  %v506_v12 = vand.u32 2147483647, %v495_v2 }
 0x640   :  { %1980 = vpow2.f32 %v1751_v4 }
 0x641   :  { %v509_v14 = vor.u32 1.1754944e-38, %v508_v11  ;;  %vm507_vm13 = vcmp.eq.f32.partialorder %v506_v12, 8.507059e+37 }
 0x645   :  { %v1979_v3 = vpop.eup %1978 }
 0x646   :  { %v498_v5 = vmul.f32 %v1979_v3, %v495_v2  ;;  %v1981_v8 = vpop.eup %1980  ;;  %vm503_vm10 = vweird.f32 %v1979_v3 }
 0x647   :  { %v496_v9 = vadd.f32 1.0, %v1981_v8  ;;  %vm504_vm12 = vmor %vm502_vm11, %vm503_vm10 }
 0x648   :  { %v499_v6 = vsub.f32 1.0, %v498_v5 }
 0x649   :  { %1982 = vrcp.f32 %v496_v9  ;;  %v523_v23 = vand.u32 2147483648, %v496_v9  ;;  %vm517_vm15 = vweird.f32 %v496_v9  ;;  %v521_v24 = vand.u32 2147483647, %v496_v9 }
 0x64a   :  { %v500_v7 = vmul.f32 %v1979_v3, %v499_v6 }
 0x64b   :  { %v524_v26 = vor.u32 1.1754944e-38, %v523_v23  ;;  %vm522_vm3 = vcmp.eq.f32.partialorder %v521_v24, 8.507059e+37 }
 0x64c   :  { %v501_v10 = vadd.f32 %v1979_v3, %v500_v7 }
 0x64e   :  { %v505_v13 = vsel %vm504_vm12, %v1979_v3, %v501_v10 }
 0x64f   :  { %v510_v16 = vsel %vm507_vm13, %v509_v14, %v505_v13  ;;  %v1983_v18 = vpop.eup %1982 }
 0x650   :  { %v513_v19 = vmul.f32 %v1983_v18, %v496_v9  ;;  %vm518_vm14 = vweird.f32 %v1983_v18  ;;  %v535_v34 = vmul.f32 %v531_v31, %v510_v16 }
 0x651   :  { %vm519_vm2 = vmor %vm517_vm15, %vm518_vm14 }
 0x652   :  { %v514_v20 = vsub.f32 1.0, %v513_v19 }
 0x654   :  { %v515_v21 = vmul.f32 %v1983_v18, %v514_v20 }
 0x656   :  { %v516_v22 = vadd.f32 %v1983_v18, %v515_v21 }
 0x658   :  { %v520_v25 = vsel %vm519_vm2, %v1983_v18, %v516_v22 }
 0x659   :  { %v525_v29 = vsel %vm522_vm3, %v524_v26, %v520_v25 }
 0x65a   :  { %v536_v35 = vmul.f32 %v532_v32, %v525_v29 }
 0x695   :  { %v540_v15 = vpop.permute.xlu2 %539 }
 0x696   :  { %v545_v17 = vmul.f32 %v540_v15, %v510_v16 }
 0x698   :  { %549 = vrot.lane.b32.xlu0 %v545_v17, %s2099_s6 }
 0x6ae   :  { %v542_v27 = vpop.permute.xlu1 %541 }
 0x6af   :  { %v546_v30 = vmul.f32 %v542_v27, %v525_v29 }
 0x6b1   :  { %551 = vrot.lane.b32.xlu2 %v546_v30, %s2099_s6 }
 0x70a   :  { %v550_v37 = vpop.permute.xlu0 %549 }
 0x70b   :  { %v552_v38 = vpop.permute.xlu2 %551  ;;  %v2302_v41 = vadd.f32 %v550_v37, %v535_v34 }
 0x70c   :  { %v2304_v36 = vadd.f32 %v552_v38, %v536_v35 }
 0x70d   :  { %1984 = vtanh.f32 %v2302_v41  ;;  %v677_v37 = vrot.slane %v2302_v41, 7 }
 0x70e   :  { %1986 = vtanh.f32 %v2304_v36 }
 0x713   :  { %v1985_v44 = vpop.eup %1984 }
 0x714   :  { %v1987_v46 = vpop.eup %1986  ;;  %561 = vrot.lane.b32.xlu1 %v1985_v44, %s2098_s22 }
 0x715   :  { %563 = vrot.lane.b32.xlu0 %v1987_v46, %s2098_s22 }
 0x786   :  { %v562_v39 = vpop.permute.xlu1 %561 }
 0x787   :  { %v564_v33 = vpop.permute.xlu0 %563  ;;  %v2310_v40 = vmul.f32 %v562_v39, %v510_v16 }
 0x788   :  { %v2312_v48 = vmul.f32 %v564_v33, %v525_v29  ;;  %v678_v33 = vrot.slane %v2304_v36, 7 }
 0x789   :  { %v600_v49 = vpack.c.bf16 %v2310_v40, %v2310_v40 }
 0x78a   :  { %v601_v50 = vpack.c.bf16 %v2312_v48, %v2312_v48 }
 0x78b   :  { %v604_v51 = vunpack.c.l.b16 %v600_v49 }
 0x78c   :  { %v605_v52 = vunpack.c.l.b16 %v601_v50 }
 0x78d   :  { %v606_v53 = vrot.slane %v604_v51, 2 }
 0x78e   :  { %v607_v54 = vrot.slane %v605_v52, 1 }
 0x790   :  { %v608_v55 = vsel %vm300_vm1, %v607_v54, %v606_v53 }
 0x791   :  { %v609_v56 = vpack.c.b16 %v608_v55, %v608_v55 }
 0x793   :  { %610 = vrot.lane.b32.xlu2 %v609_v56, %s2099_s6 }
 0x7ed   :  { %v611_v57 = vpop.permute.xlu2 %610 }
 0x7ee   :  { %1752 = vmatmul.msk.bf16.vlgmr.msrb.gmra.mxu0 %vm69_vm0, %v611_v57 }
 0x86b   :  { %v624_v58 = vpop.f32.mrf.mxu0 }
 0x86c   :  { %v629_v59 = vrot.slane %v624_v58, 5  ;;  %v630_v60 = vrot.slane %v624_v58, 6 }
 0x86e   :  { %v633_v62 = vadd.f32 %v629_v59, %v2241_v63  ;;  %v634_v0 = vadd.f32 %v630_v60, %v2238_v61 }
 0x870   :  { %1988 = vtanh.f32 %v633_v62  ;;  %v1753_v4 = vmul.f32 -1.442695, %v633_v62  ;;  %v1754_v5 = vmul.f32 -1.442695, %v634_v0 }
 0x871   :  { %1990 = vtanh.f32 %v634_v0 }
 0x872   :  { %1992 = vpow2.f32 %v1753_v4 }
 0x873   :  { %v626_v1 = vpop.f32.mrf.mxu0  ;;  %1994 = vpow2.f32 %v1754_v5 }
 0x876   :  { %v1989_v2 = vpop.eup %1988 }
 0x877   :  { %v1991_v3 = vpop.eup %1990  ;;  %685 = vrot.lane.b32.xlu1 %v1989_v2, %s2098_s22 }
 0x878   :  { %687 = vrot.lane.b32.xlu0 %v1991_v3, %s2098_s22  ;;  %v1993_v6 = vpop.eup %1992 }
 0x879   :  { %v1995_v7 = vpop.eup %1994  ;;  %v641_v8 = vadd.f32 1.0, %v1993_v6 }
 0x87a   :  { %v642_v9 = vadd.f32 1.0, %v1995_v7 }
 0x87b   :  { %1996 = vrcp.f32 %v641_v8  ;;  %v654_v20 = vand.u32 2147483648, %v641_v8  ;;  %vm648_vm6 = vweird.f32 %v641_v8  ;;  %v652_v22 = vand.u32 2147483647, %v641_v8 }
 0x87c   :  { %1998 = vrcp.f32 %v642_v9  ;;  %v669_v21 = vand.u32 2147483648, %v642_v9  ;;  %vm663_vm7 = vweird.f32 %v642_v9  ;;  %v667_v23 = vand.u32 2147483647, %v642_v9 }
 0x87d   :  { %v655_v26 = vor.u32 1.1754944e-38, %v654_v20  ;;  %vm653_vm10 = vcmp.eq.f32.partialorder %v652_v22, 8.507059e+37 }
 0x87e   :  { %v670_v27 = vor.u32 1.1754944e-38, %v669_v21  ;;  %vm668_vm11 = vcmp.eq.f32.partialorder %v667_v23, 8.507059e+37 }
 0x881   :  { %v1997_v10 = vpop.eup %1996 }
 0x882   :  { %v1999_v11 = vpop.eup %1998  ;;  %v644_v12 = vmul.f32 %v1997_v10, %v641_v8  ;;  %vm649_vm4 = vweird.f32 %v1997_v10 }
 0x883   :  { %v659_v13 = vmul.f32 %v1999_v11, %v642_v9  ;;  %vm664_vm5 = vweird.f32 %v1999_v11  ;;  %vm650_vm8 = vmor %vm648_vm6, %vm649_vm4 }
 0x884   :  { %v645_v14 = vsub.f32 1.0, %v644_v12  ;;  %vm665_vm9 = vmor %vm663_vm7, %vm664_vm5 }
 0x885   :  { %v660_v15 = vsub.f32 1.0, %v659_v13 }
 0x886   :  { %v646_v16 = vmul.f32 %v1997_v10, %v645_v14 }
 0x887   :  { %v661_v17 = vmul.f32 %v1999_v11, %v660_v15 }
 0x888   :  { %v647_v18 = vadd.f32 %v1997_v10, %v646_v16 }
 0x889   :  { %v662_v19 = vadd.f32 %v1999_v11, %v661_v17 }
 0x88a   :  { %v651_v24 = vsel %vm650_vm8, %v1997_v10, %v647_v18 }
 0x88b   :  { %v666_v25 = vsel %vm665_vm9, %v1999_v11, %v662_v19  ;;  %v656_v30 = vsel %vm653_vm10, %v655_v26, %v651_v24 }
 0x88c   :  { %v671_v32 = vsel %vm668_vm11, %v670_v27, %v666_v25  ;;  %v681_v38 = vmul.f32 %v677_v37, %v656_v30 }
 0x88d   :  { %v682_v49 = vmul.f32 %v678_v33, %v671_v32 }
 0x8e9   :  { %v686_v29 = vpop.permute.xlu1 %685 }
 0x8ea   :  { %v688_v31 = vpop.permute.xlu0 %687  ;;  %v691_v34 = vmul.f32 %v686_v29, %v656_v30 }
 0x8eb   :  { %v692_v35 = vmul.f32 %v688_v31, %v671_v32 }
 0x8ec   :  { %695 = vrot.lane.b32.xlu2 %v691_v34, %s2099_s6 }
 0x8ed   :  { %697 = vrot.lane.b32.xlu1 %v692_v35, %s2099_s6 }
 0x946   :  { %v696_v44 = vpop.permute.xlu2 %695 }
 0x947   :  { %v2328_v46 = vadd.f32 %v696_v44, %v681_v38 }
 0x949   :  { %2000 = vtanh.f32 %v2328_v46 }
 0x94f   :  { %v2001_v39 = vpop.eup %2000 }
 0x950   :  { %707 = vrot.lane.b32.xlu0 %v2001_v39, %s2098_s22 }
 0x95f   :  { %v698_v50 = vpop.permute.xlu1 %697 }
 0x960   :  { %v2333_v51 = vadd.f32 %v698_v50, %v682_v49 }
 0x962   :  { %2002 = vtanh.f32 %v2333_v51  ;;  %v824_v50 = vrot.slane %v2333_v51, 7 }
 0x968   :  { %v2003_v52 = vpop.eup %2002 }
 0x969   :  { %709 = vrot.lane.b32.xlu2 %v2003_v52, %s2098_s22 }
 0x9c2   :  { %v708_v41 = vpop.permute.xlu0 %707 }
 0x9c3   :  { %v710_v53 = vpop.permute.xlu2 %709  ;;  %v2337_v54 = vmul.f32 %v708_v41, %v656_v30 }
 0x9c4   :  { %v2339_v55 = vmul.f32 %v710_v53, %v671_v32 }
 0x9c5   :  { %v746_v56 = vpack.c.bf16 %v2337_v54, %v2337_v54 }
 0x9c6   :  { %v747_v36 = vpack.c.bf16 %v2339_v55, %v2339_v55 }
 0x9c7   :  { %v750_v57 = vunpack.c.l.b16 %v746_v56 }
 0x9c8   :  { %v751_v58 = vunpack.c.l.b16 %v747_v36  ;;  %v823_v36 = vrot.slane %v2328_v46, 7 }
 0x9c9   :  { %v752_v59 = vrot.slane %v750_v57, 3 }
 0x9ca   :  { %v753_v60 = vrot.slane %v751_v58, 2 }
 0x9cc   :  { %v754_v62 = vsel %vm300_vm1, %v753_v60, %v752_v59 }
 0x9cd   :  { %v755_v0 = vpack.c.b16 %v754_v62, %v754_v62 }
 0x9cf   :  { %756 = vrot.lane.b32.xlu1 %v755_v0, %s2099_s6 }
 0xa41   :  { %v757_v1 = vpop.permute.xlu1 %756 }
 0xa42   :  { %1755 = vmatmul.msk.bf16.vlgmr.msrb.gmra.mxu1 %vm69_vm0, %v757_v1 }
 0xabf   :  { %v770_v2 = vpop.f32.mrf.mxu1 }
 0xac0   :  { %v775_v3 = vrot.slane %v770_v2, 4  ;;  %v776_v4 = vrot.slane %v770_v2, 5 }
 0xac2   :  { %v779_v5 = vadd.f32 %v775_v3, %v2241_v63  ;;  %v780_v6 = vadd.f32 %v776_v4, %v2238_v61 }
 0xac4   :  { %2004 = vtanh.f32 %v779_v5  ;;  %v1757_v10 = vmul.f32 -1.442695, %v780_v6  ;;  %v1756_v14 = vmul.f32 -1.442695, %v779_v5 }
 0xac5   :  { %2006 = vtanh.f32 %v780_v6 }
 0xac6   :  { %2008 = vpow2.f32 %v1757_v10 }
 0xac7   :  { %v772_v7 = vpop.f32.mrf.mxu1 }
 0xaca   :  { %v2005_v8 = vpop.eup %2004 }
 0xacb   :  { %v2007_v9 = vpop.eup %2006  ;;  %831 = vrot.lane.b32.xlu0 %v2005_v8, %s2098_s22 }
 0xacc   :  { %833 = vrot.lane.b32.xlu2 %v2007_v9, %s2098_s22  ;;  %v2009_v11 = vpop.eup %2008 }
 0xacd   :  { %v788_v12 = vadd.f32 1.0, %v2009_v11 }
 0xacf   :  { %2010 = vrcp.f32 %v788_v12  ;;  %v815_v21 = vand.u32 2147483648, %v788_v12  ;;  %vm809_vm13 = vweird.f32 %v788_v12  ;;  %v813_v22 = vand.u32 2147483647, %v788_v12 }
 0xad0   :  { %2012 = vpow2.f32 %v1756_v14 }
 0xad1   :  { %v816_v24 = vor.u32 1.1754944e-38, %v815_v21  ;;  %vm814_vm15 = vcmp.eq.f32.partialorder %v813_v22, 8.507059e+37 }
 0xad5   :  { %v2011_v13 = vpop.eup %2010 }
 0xad6   :  { %v805_v15 = vmul.f32 %v2011_v13, %v788_v12  ;;  %v2013_v17 = vpop.eup %2012  ;;  %vm810_vm12 = vweird.f32 %v2011_v13 }
 0xad7   :  { %v787_v19 = vadd.f32 1.0, %v2013_v17  ;;  %vm811_vm14 = vmor %vm809_vm13, %vm810_vm12 }
 0xad8   :  { %v806_v16 = vsub.f32 1.0, %v805_v15 }
 0xad9   :  { %2014 = vrcp.f32 %v787_v19  ;;  %v800_v35 = vand.u32 2147483648, %v787_v19  ;;  %vm794_vm3 = vweird.f32 %v787_v19  ;;  %v798_v37 = vand.u32 2147483647, %v787_v19 }
 0xada   :  { %v807_v18 = vmul.f32 %v2011_v13, %v806_v16 }
 0xadb   :  { %v801_v44 = vor.u32 1.1754944e-38, %v800_v35  ;;  %vm799_vm5 = vcmp.eq.f32.partialorder %v798_v37, 8.507059e+37 }
 0xadc   :  { %v808_v20 = vadd.f32 %v2011_v13, %v807_v18 }
 0xade   :  { %v812_v23 = vsel %vm811_vm14, %v2011_v13, %v808_v20 }
 0xadf   :  { %v817_v26 = vsel %vm814_vm15, %v816_v24, %v812_v23  ;;  %v2015_v27 = vpop.eup %2014 }
 0xae0   :  { %v790_v30 = vmul.f32 %v2015_v27, %v787_v19  ;;  %vm795_vm2 = vweird.f32 %v2015_v27  ;;  %v828_v52 = vmul.f32 %v824_v50, %v817_v26 }
 0xae1   :  { %vm796_vm4 = vmor %vm794_vm3, %vm795_vm2 }
 0xae2   :  { %v791_v31 = vsub.f32 1.0, %v790_v30 }
 0xae4   :  { %v792_v32 = vmul.f32 %v2015_v27, %v791_v31 }
 0xae6   :  { %v793_v34 = vadd.f32 %v2015_v27, %v792_v32 }
 0xae8   :  { %v797_v38 = vsel %vm796_vm4, %v2015_v27, %v793_v34 }
 0xae9   :  { %v802_v33 = vsel %vm799_vm5, %v801_v44, %v797_v38 }
 0xaea   :  { %v827_v57 = vmul.f32 %v823_v36, %v802_v33 }
 0xb26   :  { %v834_v25 = vpop.permute.xlu2 %833 }
 0xb27   :  { %v838_v29 = vmul.f32 %v834_v25, %v817_v26 }
 0xb29   :  { %843 = vrot.lane.b32.xlu0 %v838_v29, %s2099_s6 }
 0xb3d   :  { %v832_v39 = vpop.permute.xlu0 %831 }
 0xb3e   :  { %v837_v49 = vmul.f32 %v832_v39, %v802_v33 }
 0xb40   :  { %841 = vrot.lane.b32.xlu1 %v837_v49, %s2099_s6 }
 0xb9b   :  { %v844_v41 = vpop.permute.xlu0 %843 }
 0xb9c   :  { %v2355_v53 = vadd.f32 %v844_v41, %v828_v52 }
 0xb9e   :  { %2016 = vtanh.f32 %v2355_v53 }
 0xba4   :  { %v2017_v56 = vpop.eup %2016 }
 0xba5   :  { %855 = vrot.lane.b32.xlu1 %v2017_v56, %s2098_s22 }
 0xbb2   :  { %v842_v58 = vpop.permute.xlu1 %841 }
 0xbb3   :  { %v2360_v59 = vadd.f32 %v842_v58, %v827_v57 }
 0xbb5   :  { %2018 = vtanh.f32 %v2360_v59 }
 0xbbb   :  { %v2019_v60 = vpop.eup %2018 }
 0xbbc   :  { %853 = vrot.lane.b32.xlu2 %v2019_v60, %s2098_s22 }
 0xc16   :  { %v854_v51 = vpop.permute.xlu2 %853 }
 0xc17   :  { %v856_v62 = vpop.permute.xlu1 %855  ;;  %v2364_v0 = vmul.f32 %v854_v51, %v802_v33  ;;  %v969_v51 = vrot.slane %v2360_v59, 7 }
 0xc18   :  { %v2366_v1 = vmul.f32 %v856_v62, %v817_v26  ;;  %v970_v62 = vrot.slane %v2355_v53, 7 }
 0xc19   :  { %v892_v2 = vpack.c.bf16 %v2364_v0, %v2364_v0 }
 0xc1a   :  { %v893_v46 = vpack.c.bf16 %v2366_v1, %v2366_v1 }
 0xc1b   :  { %v896_v3 = vunpack.c.l.b16 %v892_v2 }
 0xc1c   :  { %v897_v4 = vunpack.c.l.b16 %v893_v46 }
 0xc1d   :  { %v898_v5 = vrot.slane %v896_v3, 4 }
 0xc1e   :  { %v899_v6 = vrot.slane %v897_v4, 3 }
 0xc20   :  { %v900_v7 = vsel %vm300_vm1, %v899_v6, %v898_v5 }
 0xc21   :  { %v901_v8 = vpack.c.b16 %v900_v7, %v900_v7 }
 0xc23   :  { %902 = vrot.lane.b32.xlu0 %v901_v8, %s2099_s6 }
 0xc95   :  { %v903_v9 = vpop.permute.xlu0 %902 }
 0xc96   :  { %1758 = vmatmul.msk.bf16.vlgmr.msrb.gmra.mxu2 %vm69_vm0, %v903_v9 }
 0xd19   :  { %v916_v10 = vpop.f32.mrf.mxu2 }
 0xd1a   :  { %v921_v11 = vrot.slane %v916_v10, 3  ;;  %v922_v12 = vrot.slane %v916_v10, 4 }
 0xd1c   :  { %v925_v13 = vadd.f32 %v921_v11, %v2241_v63  ;;  %v926_v14 = vadd.f32 %v922_v12, %v2238_v61 }
 0xd1e   :  { %2020 = vtanh.f32 %v925_v13  ;;  %v1759_v18 = vmul.f32 -1.442695, %v925_v13  ;;  %v1760_v22 = vmul.f32 -1.442695, %v926_v14 }
 0xd1f   :  { %2022 = vtanh.f32 %v926_v14 }
 0xd20   :  { %2024 = vpow2.f32 %v1759_v18 }
 0xd21   :  { %v918_v15 = vpop.f32.mrf.mxu2 }
 0xd24   :  { %v2021_v16 = vpop.eup %2020 }
 0xd25   :  { %v2023_v17 = vpop.eup %2022  ;;  %977 = vrot.lane.b32.xlu2 %v2021_v16, %s2098_s22 }
 0xd26   :  { %979 = vrot.lane.b32.xlu1 %v2023_v17, %s2098_s22  ;;  %v2025_v19 = vpop.eup %2024 }
 0xd27   :  { %v933_v20 = vadd.f32 1.0, %v2025_v19 }
 0xd29   :  { %2026 = vrcp.f32 %v933_v20  ;;  %v946_v30 = vand.u32 2147483648, %v933_v20  ;;  %vm940_vm7 = vweird.f32 %v933_v20  ;;  %v944_v31 = vand.u32 2147483647, %v933_v20 }
 0xd2a   :  { %2028 = vpow2.f32 %v1760_v22 }
 0xd2b   :  { %v947_v34 = vor.u32 1.1754944e-38, %v946_v30  ;;  %vm945_vm9 = vcmp.eq.f32.partialorder %v944_v31, 8.507059e+37 }
 0xd2f   :  { %v2027_v21 = vpop.eup %2026 }
 0xd30   :  { %v936_v23 = vmul.f32 %v2027_v21, %v933_v20  ;;  %v2029_v26 = vpop.eup %2028  ;;  %vm941_vm6 = vweird.f32 %v2027_v21 }
 0xd31   :  { %v934_v27 = vadd.f32 1.0, %v2029_v26  ;;  %vm942_vm8 = vmor %vm940_vm7, %vm941_vm6 }
 0xd32   :  { %v937_v24 = vsub.f32 1.0, %v936_v23 }
 0xd33   :  { %2030 = vrcp.f32 %v934_v27  ;;  %v961_v52 = vand.u32 2147483648, %v934_v27  ;;  %vm955_vm11 = vweird.f32 %v934_v27  ;;  %v959_v41 = vand.u32 2147483647, %v934_v27 }
 0xd34   :  { %v938_v25 = vmul.f32 %v2027_v21, %v937_v24 }
 0xd35   :  { %v962_v36 = vor.u32 1.1754944e-38, %v961_v52  ;;  %vm960_vm13 = vcmp.eq.f32.partialorder %v959_v41, 8.507059e+37 }
 0xd36   :  { %v939_v29 = vadd.f32 %v2027_v21, %v938_v25 }
 0xd38   :  { %v943_v32 = vsel %vm942_vm8, %v2027_v21, %v939_v29 }
 0xd39   :  { %v948_v37 = vsel %vm945_vm9, %v947_v34, %v943_v32  ;;  %v2031_v44 = vpop.eup %2030 }
 0xd3a   :  { %v951_v39 = vmul.f32 %v2031_v44, %v934_v27  ;;  %vm956_vm10 = vweird.f32 %v2031_v44  ;;  %v973_v2 = vmul.f32 %v969_v51, %v948_v37 }
 0xd3b   :  { %vm957_vm12 = vmor %vm955_vm11, %vm956_vm10 }
 0xd3c   :  { %v952_v33 = vsub.f32 1.0, %v951_v39 }
 0xd3e   :  { %v953_v49 = vmul.f32 %v2031_v44, %v952_v33 }
 0xd40   :  { %v954_v50 = vadd.f32 %v2031_v44, %v953_v49 }
 0xd42   :  { %v958_v56 = vsel %vm957_vm12, %v2031_v44, %v954_v50 }
 0xd43   :  { %v963_v58 = vsel %vm960_vm13, %v962_v36, %v958_v56 }
 0xd44   :  { %v974_v46 = vmul.f32 %v970_v62, %v963_v58 }
 0xd7f   :  { %v978_v35 = vpop.permute.xlu2 %977 }
 0xd80   :  { %v983_v38 = vmul.f32 %v978_v35, %v948_v37 }
 0xd82   :  { %987 = vrot.lane.b32.xlu0 %v983_v38, %s2099_s6 }
 0xd98   :  { %v980_v57 = vpop.permute.xlu1 %979 }
 0xd99   :  { %v984_v60 = vmul.f32 %v980_v57, %v963_v58 }
 0xd9b   :  { %989 = vrot.lane.b32.xlu2 %v984_v60, %s2099_s6 }
 0xdf4   :  { %v988_v3 = vpop.permute.xlu0 %987 }
 0xdf5   :  { %v990_v4 = vpop.permute.xlu2 %989  ;;  %v2383_v5 = vadd.f32 %v988_v3, %v973_v2 }
 0xdf6   :  { %v2385_v6 = vadd.f32 %v990_v4, %v974_v46 }
 0xdf7   :  { %2032 = vtanh.f32 %v2383_v5 }
 0xdf8   :  { %2034 = vtanh.f32 %v2385_v6 }
 0xdfd   :  { %v2033_v7 = vpop.eup %2032 }
 0xdfe   :  { %v2035_v8 = vpop.eup %2034  ;;  %999 = vrot.lane.b32.xlu1 %v2033_v7, %s2098_s22 }
 0xdff   :  { %1001 = vrot.lane.b32.xlu0 %v2035_v8, %s2098_s22 }
 0xe70   :  { %v1000_v59 = vpop.permute.xlu1 %999 }
 0xe71   :  { %v1002_v53 = vpop.permute.xlu0 %1001  ;;  %v2391_v9 = vmul.f32 %v1000_v59, %v948_v37 }
 0xe72   :  { %v2393_v10 = vmul.f32 %v1002_v53, %v963_v58 }
 0xe73   :  { %v1038_v11 = vpack.c.bf16 %v2391_v9, %v2391_v9 }
 0xe74   :  { %v1039_v12 = vpack.c.bf16 %v2393_v10, %v2393_v10 }
 0xe75   :  { %v1042_v13 = vunpack.c.l.b16 %v1038_v11  ;;  %v1115_v11 = vrot.slane %v2383_v5, 7 }
 0xe76   :  { %v1043_v14 = vunpack.c.l.b16 %v1039_v12 }
 0xe77   :  { %v1044_v15 = vrot.slane %v1042_v13, 5 }
 0xe78   :  { %v1045_v16 = vrot.slane %v1043_v14, 4 }
 0xe7a   :  { %v1046_v17 = vsel %vm300_vm1, %v1045_v16, %v1044_v15  ;;  %v1116_v16 = vrot.slane %v2385_v6, 7 }
 0xe7b   :  { %v1047_v18 = vpack.c.b16 %v1046_v17, %v1046_v17 }
 0xe7d   :  { %1048 = vrot.lane.b32.xlu2 %v1047_v18, %s2099_s6 }
 0xed7   :  { %v1049_v19 = vpop.permute.xlu2 %1048 }
 0xed8   :  { %1761 = vmatmul.msk.bf16.vlgmr.msrb.gmra.mxu3 %vm69_vm0, %v1049_v19 }
 0xf5b   :  { %v1062_v20 = vpop.f32.mrf.mxu3 }
 0xf5c   :  { %v1067_v21 = vrot.slane %v1062_v20, 2  ;;  %v1068_v22 = vrot.slane %v1062_v20, 3 }
 0xf5e   :  { %v1071_v23 = vadd.f32 %v1067_v21, %v2241_v63  ;;  %v1072_v24 = vadd.f32 %v1068_v22, %v2238_v61 }
 0xf60   :  { %2036 = vtanh.f32 %v1071_v23  ;;  %v1762_v29 = vmul.f32 -1.442695, %v1071_v23  ;;  %v1763_v30 = vmul.f32 -1.442695, %v1072_v24 }
 0xf61   :  { %2038 = vtanh.f32 %v1072_v24 }
 0xf62   :  { %2040 = vpow2.f32 %v1762_v29 }
 0xf63   :  { %v1064_v25 = vpop.f32.mrf.mxu3  ;;  %2042 = vpow2.f32 %v1763_v30 }
 0xf66   :  { %v2037_v26 = vpop.eup %2036 }
 0xf67   :  { %v2039_v27 = vpop.eup %2038  ;;  %1123 = vrot.lane.b32.xlu1 %v2037_v26, %s2098_s22 }
 0xf68   :  { %1125 = vrot.lane.b32.xlu0 %v2039_v27, %s2098_s22  ;;  %v2041_v31 = vpop.eup %2040 }
 0xf69   :  { %v2043_v32 = vpop.eup %2042  ;;  %v1079_v34 = vadd.f32 1.0, %v2041_v31 }
 0xf6a   :  { %v1080_v35 = vadd.f32 1.0, %v2043_v32 }
 0xf6b   :  { %2044 = vrcp.f32 %v1079_v34  ;;  %v1092_v36 = vand.u32 2147483648, %v1079_v34  ;;  %vm1086_vm2 = vweird.f32 %v1079_v34  ;;  %v1090_v58 = vand.u32 2147483647, %v1079_v34 }
 0xf6c   :  { %2046 = vrcp.f32 %v1080_v35  ;;  %v1107_v57 = vand.u32 2147483648, %v1080_v35  ;;  %vm1101_vm3 = vweird.f32 %v1080_v35  ;;  %v1105_v60 = vand.u32 2147483647, %v1080_v35 }
 0xf6d   :  { %v1093_v2 = vor.u32 1.1754944e-38, %v1092_v36  ;;  %vm1091_vm6 = vcmp.eq.f32.partialorder %v1090_v58, 8.507059e+37 }
 0xf6e   :  { %v1108_v46 = vor.u32 1.1754944e-38, %v1107_v57  ;;  %vm1106_vm7 = vcmp.eq.f32.partialorder %v1105_v60, 8.507059e+37 }
 0xf71   :  { %v2045_v37 = vpop.eup %2044 }
 0xf72   :  { %v2047_v38 = vpop.eup %2046  ;;  %v1082_v44 = vmul.f32 %v2045_v37, %v1079_v34  ;;  %vm1087_vm14 = vweird.f32 %v2045_v37 }
 0xf73   :  { %v1097_v39 = vmul.f32 %v2047_v38, %v1080_v35  ;;  %vm1102_vm15 = vweird.f32 %v2047_v38  ;;  %vm1088_vm4 = vmor %vm1086_vm2, %vm1087_vm14 }
 0xf74   :  { %v1083_v33 = vsub.f32 1.0, %v1082_v44  ;;  %vm1103_vm5 = vmor %vm1101_vm3, %vm1102_vm15 }
 0xf75   :  { %v1098_v49 = vsub.f32 1.0, %v1097_v39 }
 0xf76   :  { %v1084_v50 = vmul.f32 %v2045_v37, %v1083_v33 }
 0xf77   :  { %v1099_v52 = vmul.f32 %v2047_v38, %v1098_v49 }
 0xf78   :  { %v1085_v41 = vadd.f32 %v2045_v37, %v1084_v50 }
 0xf79   :  { %v1100_v56 = vadd.f32 %v2047_v38, %v1099_v52 }
 0xf7a   :  { %v1089_v51 = vsel %vm1088_vm4, %v2045_v37, %v1085_v41 }
 0xf7b   :  { %v1104_v62 = vsel %vm1103_vm5, %v2047_v38, %v1100_v56  ;;  %v1094_v4 = vsel %vm1091_vm6, %v1093_v2, %v1089_v51 }
 0xf7c   :  { %v1109_v8 = vsel %vm1106_vm7, %v1108_v46, %v1104_v62  ;;  %v1119_v12 = vmul.f32 %v1115_v11, %v1094_v4 }
 0xf7d   :  { %v1120_v17 = vmul.f32 %v1116_v16, %v1109_v8 }
 0xfd9   :  { %v1124_v3 = vpop.permute.xlu1 %1123 }
 0xfda   :  { %v1126_v7 = vpop.permute.xlu0 %1125  ;;  %v1129_v59 = vmul.f32 %v1124_v3, %v1094_v4 }
 0xfdb   :  { %v1130_v53 = vmul.f32 %v1126_v7, %v1109_v8  ;;  %v2450_v7 = vld [vmem:[%s2758_s24] sm:$0x3] }
 0xfdc   :  { %1133 = vrot.lane.b32.xlu2 %v1129_v59, %s2099_s6  ;;  %vm304_vm12 = vcmp.gt.s32.totalorder %v2450_v7, 0  ;;  %vm447_vm3 = vcmp.gt.s32.totalorder %v2450_v7, 1  ;;  %vm592_vm4 = vcmp.gt.s32.totalorder %v2450_v7, 2  ;;  %vm291_vm5 = vcmp.eq.s32.totalorder %v2450_v7, 1 }
 0xfdd   :  { %1135 = vrot.lane.b32.xlu1 %v1130_v53, %s2099_s6  ;;  %v305_v59 = vsel %vm304_vm12, 1, %v2097_v28  ;;  %vm579_vm6 = vcmp.eq.s32.totalorder %v2450_v7, 3  ;;  %vm738_vm7 = vcmp.gt.s32.totalorder %v2450_v7, 3  ;;  %vm1322_vm12 = vcmp.gt.s32.totalorder %v2450_v7, 7 }
0x1036   :  { %v1134_v13 = vpop.permute.xlu2 %1133 }
0x1037   :  { %v2409_v14 = vadd.f32 %v1134_v13, %v1119_v12 }
0x1039   :  { %2048 = vtanh.f32 %v2409_v14 }
0x103f   :  { %v2049_v15 = vpop.eup %2048 }
0x1040   :  { %1145 = vrot.lane.b32.xlu0 %v2049_v15, %s2098_s22 }
0x104f   :  { %v1136_v18 = vpop.permute.xlu1 %1135 }
0x1050   :  { %v2414_v19 = vadd.f32 %v1136_v18, %v1120_v17  ;;  %v448_v18 = vsel %vm447_vm3, 1, %v2097_v28  ;;  %vm725_vm3 = vcmp.eq.s32.totalorder %v2450_v7, 4 }
0x1052   :  { %2050 = vtanh.f32 %v2414_v19 }
0x1058   :  { %v2051_v20 = vpop.eup %2050 }
0x1059   :  { %1147 = vrot.lane.b32.xlu2 %v2051_v20, %s2098_s22 }
0x10b2   :  { %v1146_v5 = vpop.permute.xlu0 %1145 }
0x10b3   :  { %v1148_v21 = vpop.permute.xlu2 %1147  ;;  %v2418_v22 = vmul.f32 %v1146_v5, %v1094_v4  ;;  %v580_v5 = vsel %vm579_vm6, 1, %v2097_v28 }
0x10b4   :  { %v2420_v23 = vmul.f32 %v1148_v21, %v1109_v8 }
0x10b5   :  { %v1184_v24 = vpack.c.bf16 %v2418_v22, %v2418_v22 }
0x10b6   :  { %v1185_v6 = vpack.c.bf16 %v2420_v23, %v2420_v23 }
0x10b7   :  { %v1188_v25 = vunpack.c.l.b16 %v1184_v24  ;;  %v739_v24 = vsel %vm738_vm7, 1, %v2097_v28  ;;  %vm1309_vm7 = vcmp.eq.s32.totalorder %v2450_v7, 8 }
0x10b8   :  { %v1189_v26 = vunpack.c.l.b16 %v1185_v6 }
0x10b9   :  { %v1190_v27 = vrot.slane %v1188_v25, 6 }
0x10ba   :  { %v1191_v29 = vrot.slane %v1189_v26, 5 }
0x10bc   :  { %v1192_v30 = vsel %vm300_vm1, %v1191_v29, %v1190_v27 }
0x10bd   :  { %v1193_v31 = vpack.c.b16 %v1192_v30, %v1192_v30 }
0x10bf   :  { %1194 = vrot.lane.b32.xlu1 %v1193_v31, %s2099_s6 }
0x1131   :  { %v1195_v32 = vpop.permute.xlu1 %1194 }
0x1132   :  { %1764 = vmatmul.msk.bf16.vlgmr.msra.gmra.mxu0 %vm69_vm0, %v1195_v32 }
0x11af   :  { %v1208_v34 = vpop.f32.mrf.mxu0 }
0x11b0   :  { %v1213_v35 = vrot.slane %v1208_v34, 1  ;;  %v1214_v37 = vrot.slane %v1208_v34, 2 }
0x11b2   :  { %v1217_v38 = vadd.f32 %v1213_v35, %v2241_v63  ;;  %v1218_v44 = vadd.f32 %v1214_v37, %v2238_v61  ;;  %v2501_v37 = vld [vmem:[%s2755_s20 + $0x8] sm:$0xff] }
0x11b4   :  { %2052 = vtanh.f32 %v1217_v38  ;;  %v1766_v61 = vmul.f32 -1.442695, %v1218_v44  ;;  %v1765_v41 = vmul.f32 -1.442695, %v1217_v38 }
0x11b5   :  { %2054 = vtanh.f32 %v1218_v44 }
0x11b6   :  { %2056 = vpow2.f32 %v1766_v61 }
0x11b7   :  { %v1210_v39 = vpop.f32.mrf.mxu0 }
0x11ba   :  { %v2053_v33 = vpop.eup %2052 }
0x11bb   :  { %v2055_v49 = vpop.eup %2054  ;;  %1269 = vrot.lane.b32.xlu0 %v2053_v33, %s2098_s22 }
0x11bc   :  { %1271 = vrot.lane.b32.xlu2 %v2055_v49, %s2098_s22  ;;  %v2057_v63 = vpop.eup %2056 }
0x11bd   :  { %v1226_v50 = vadd.f32 1.0, %v2057_v63 }
0x11bf   :  { %2058 = vrcp.f32 %v1226_v50  ;;  %v1253_v58 = vand.u32 2147483648, %v1226_v50  ;;  %vm1247_vm9 = vweird.f32 %v1226_v50 }
0x11c0   :  { %2060 = vpow2.f32 %v1765_v41 }
0x11c1   :  { %v1254_v60 = vor.u32 1.1754944e-38, %v1253_v58 }
0x11c4   :  { %283 = vrot.lane.b32.xlu2 %v2260_v47, %s2099_s6 }
0x11c5   :  { %v2059_v52 = vpop.eup %2058 }
0x11c6   :  { %v1243_v47 = vmul.f32 %v2059_v52, %v1226_v50  ;;  %vm1248_vm8 = vweird.f32 %v2059_v52 }
0x11c7   :  { %vm1249_vm10 = vmor %vm1247_vm9, %vm1248_vm8  ;;  %vm884_vm8 = vcmp.gt.s32.totalorder %v2450_v7, 4  ;;  %vm1030_vm9 = vcmp.gt.s32.totalorder %v2450_v7, 5 }
0x11c8   :  { %v1244_v56 = vsub.f32 1.0, %v1243_v47  ;;  %v885_v26 = vsel %vm884_vm8, 1, %v2097_v28  ;;  %v1031_v32 = vsel %vm1030_vm9, 1, %v2097_v28 }
0x11ca   :  { %v1245_v36 = vmul.f32 %v2059_v52, %v1244_v56 }
0x11cc   :  { %429 = vrot.lane.b32.xlu2 %v2283_v42, %s2099_s6  ;;  %v2061_v42 = vpop.eup %2060 }
0x11cd   :  { %v1225_v57 = vadd.f32 1.0, %v2061_v42 }
0x11cf   :  { %2062 = vrcp.f32 %v1225_v57  ;;  %v1238_v11 = vand.u32 2147483648, %v1225_v57  ;;  %vm1232_vm14 = vweird.f32 %v1225_v57  ;;  %v1236_v12 = vand.u32 2147483647, %v1225_v57 }
0x11d1   :  { %v1239_v15 = vor.u32 1.1754944e-38, %v1238_v11  ;;  %vm1237_vm2 = vcmp.eq.f32.partialorder %v1236_v12, 8.507059e+37 }
0x11d4   :  { %573 = vrot.lane.b32.xlu2 %v2312_v48, %s2099_s6  ;;  %v1246_v48 = vadd.f32 %v2059_v52, %v1245_v36 }
0x11d5   :  { %v2063_v2 = vpop.eup %2062 }
0x11d6   :  { %v1228_v3 = vmul.f32 %v2063_v2, %v1225_v57  ;;  %vm1233_vm13 = vweird.f32 %v2063_v2 }
0x11d7   :  { %vm1234_vm15 = vmor %vm1232_vm14, %vm1233_vm13  ;;  %vm435_vm14 = vcmp.eq.s32.totalorder %v2450_v7, 2 }
0x11d8   :  { %v1229_v4 = vsub.f32 1.0, %v1228_v3 }
0x11da   :  { %v1230_v8 = vmul.f32 %v2063_v2, %v1229_v4 }
0x11dc   :  { %719 = vrot.lane.b32.xlu2 %v2339_v55, %s2099_s6  ;;  %v1251_v55 = vand.u32 2147483647, %v1226_v50  ;;  %v1231_v53 = vadd.f32 %v2063_v2, %v1230_v8 }
0x11de   :  { %vm1252_vm11 = vcmp.eq.f32.partialorder %v1251_v55, 8.507059e+37  ;;  %v1235_v13 = vsel %vm1234_vm15, %v2063_v2, %v1231_v53  ;;  %vm871_vm15 = vcmp.eq.s32.totalorder %v2450_v7, 5  ;;  %v436_v2 = vsel %vm435_vm14, 1, %v2097_v28 }
0x11df   :  { %v2456_v17 = vsel %vm1237_vm2, %v1239_v15, %v1235_v13  ;;  %v872_v3 = vsel %vm871_vm15, 1, %v2097_v28 }
0x11e4   :  { %865 = vrot.lane.b32.xlu2 %v2366_v1, %s2099_s6  ;;  %v1250_v1 = vsel %vm1249_vm10, %v2059_v52, %v1246_v48  ;;  %vm1176_vm10 = vcmp.gt.s32.totalorder %v2450_v7, 6 }
0x11e5   :  { %v2443_v62 = vsel %vm1252_vm11, %v1254_v60, %v1250_v1  ;;  %v1177_v52 = vsel %vm1176_vm10, 1, %v2097_v28  ;;  %v1323_v1 = vsel %vm1322_vm12, 1, %v2097_v28 }
0x1216   :  { %v1272_v51 = vpop.permute.xlu2 %1271 }
0x1217   :  { %v1276_v46 = vmul.f32 %v1272_v51, %v2443_v62 }
0x1219   :  { %1281 = vrot.lane.b32.xlu0 %v1276_v46, %s2099_s6 }
0x1221   :  { %285 = vrot.lane.b32.xlu0 %v2256_v43, %s2099_s6 }
0x1229   :  { %307 = vperm.xlu0 %1922, %v305_v59  }
0x122d   :  { %v1270_v16 = vpop.permute.xlu0 %1269 }
0x122e   :  { %v1275_v43 = vmul.f32 %v1270_v16, %v2456_v17 }
0x1230   :  { %1279 = vrot.lane.b32.xlu1 %v1275_v43, %s2099_s6 }
0x1231   :  { %717 = vrot.lane.b32.xlu0 %v2337_v54, %s2099_s6  ;;  %v292_v54 = vsel %vm291_vm5, 1, %v2097_v28  ;;  %vm1017_vm5 = vcmp.eq.s32.totalorder %v2450_v7, 6 }
0x1238   :  { %427 = vrot.lane.b32.xlu1 %v2285_v45, %s2099_s6  ;;  %v593_v45 = vsel %vm592_vm4, 1, %v2097_v28  ;;  %vm1163_vm4 = vcmp.eq.s32.totalorder %v2450_v7, 7 }
0x1239   :  { %863 = vrot.lane.b32.xlu0 %v2364_v0, %s2099_s6  ;;  %v1164_v59 = vsel %vm1163_vm4, 1, %v2097_v28 }
0x1240   :  { %571 = vrot.lane.b32.xlu1 %v2310_v40, %s2099_s6  ;;  %v1262_v40 = vrot.slane %v2414_v19, 7  ;;  %v1261_v19 = vrot.slane %v2409_v14, 7  ;;  %v2494_v14 = vld [vmem:[%s2755_s20] sm:$0xff] }
0x1241   :  { %1009 = vrot.lane.b32.xlu0 %v2391_v9, %s2099_s6 }
0x1242   :  { %v1266_v0 = vmul.f32 %v1262_v40, %v2443_v62  ;;  %v1265_v6 = vmul.f32 %v1261_v19, %v2456_v17 }
0x1248   :  { %450 = vperm.xlu1 %1923, %v448_v18  }
0x1249   :  { %1155 = vrot.lane.b32.xlu0 %v2418_v22, %s2099_s6  ;;  %v284_v22 = vpop.permute.xlu2 %283 }
0x124a   :  { %v289_v56 = vadd.f32 %v2494_v14, %v284_v22 }
0x1250   :  { %595 = vperm.xlu1 %1923, %v593_v45  }
0x1251   :  { %294 = vperm.xlu0 %1922, %v292_v54   ;;  %v430_v29 = vpop.permute.xlu2 %429 }
0x1252   :  { %v434_v38 = vadd.f32 %v2501_v37, %v430_v29 }
0x1259   :  { %582 = vperm.xlu0 %1922, %v580_v5   ;;  %v574_v39 = vpop.permute.xlu2 %573 }
0x125a   :  { %v578_v61 = vadd.f32 %v2501_v37, %v574_v39  ;;  %v1779_v39 = vld [vmem:[%s2739_s9 + $0x38] sm:$0xf0] }
0x125c   :  { %v588_v42 = vrot.slane %v578_v61, 1  ;;  %v1895_v61 = vld [vmem:[%s2739_s9 + $0x34] sm:$0xf0] }
0x1261   :  { %v720_v11 = vpop.permute.xlu2 %719 }
0x1269   :  { %v2538_v13 = vpop.permute.xlu2 %865 }
0x128b   :  { %v1282_v9 = vpop.permute.xlu0 %1281 }
0x128c   :  { %v1286_v20 = vadd.f32 %v1282_v9, %v1266_v0  ;;  %v724_v0 = vadd.f32 %v2501_v37, %v720_v11 }
0x128e   :  { %2064 = vtanh.f32 %v1286_v20  ;;  %v734_v20 = vrot.slane %v724_v0, 2  ;;  %v1903_v0 = vld [vmem:[%s2743_s13 + $0x38] sm:$0xff] }
0x1293   :  { %v286_v30 = vpop.permute.xlu0 %285 }
0x1294   :  { %v2065_v21 = vpop.eup %2064  ;;  %v290_v33 = vadd.f32 %v2501_v37, %v286_v30 }
0x1295   :  { %1293 = vrot.lane.b32.xlu1 %v2065_v21, %s2098_s22  ;;  %v1018_v21 = vsel %vm1017_vm5, 1, %v2097_v28 }
0x1296   :  { %v299_v41 = vrot.slane %v290_v33, 7  ;;  %v1777_v33 = vld [vmem:[%s2739_s9 + $0x30] sm:$0xf] }
0x1298   :  { %v2516_v57 = vsel %vm300_vm1, %v299_v41, %v289_v56  ;;  %v1771_v56 = vld [vmem:[%s2739_s9 + $0x28] sm:$0xf0] }
0x129b   :  { %v308_v63 = vpop.permute.xlu0 %307 }
0x129c   :  { %vm309_vm11 = vcmp.eq.s32.totalorder %v308_v63, 1  ;;  %v1778_v63 = vor.u32 %v1895_v61, %v1777_v33 }
0x129d   :  { %741 = vperm.xlu1 %1923, %v739_v24   ;;  %v310_v58 = vsel %vm309_vm11, %v2516_v57, -1e+30 }
0x129e   :  { %1389 = vmatpush.bf16.msra.mxu1 %v1778_v63 }
0x12a2   :  { %v1280_v25 = vpop.permute.xlu1 %1279 }
0x12a3   :  { %v1285_v27 = vadd.f32 %v1280_v25, %v1265_v6  ;;  %v718_v53 = vpop.permute.xlu0 %717 }
0x12a4   :  { %v723_v45 = vadd.f32 %v2494_v14, %v718_v53 }
0x12a5   :  { %2066 = vtanh.f32 %v1285_v27  ;;  %887 = vperm.xlu1 %1923, %v885_v26   ;;  %v1310_v26 = vsel %vm1309_vm7, 1, %v2097_v28  ;;  %v2566_v27 = vld [vmem:[%s2738_s8] ss:$0 sm:$0xff]  ;;  %s1718_s8 = sshll.u32 %s2749_s19, 4  ;;  %s1719_s8 = int_to_ptr.hbm [resolvable:$true] %s1718_s8 }
0x12a6   :  { %v733_v9 = vrot.slane %v723_v45, 3 }
0x12a8   :  { %v735_v22 = vsel %vm300_vm1, %v734_v20, %v733_v9 }
0x12aa   :  { %v428_v31 = vpop.permute.xlu1 %427 }
0x12ab   :  { %v2067_v34 = vpop.eup %2066  ;;  %v433_v35 = vadd.f32 %v2494_v14, %v428_v31  ;;  %v2536_v12 = vpop.permute.xlu0 %863 }
0x12ac   :  { %1291 = vrot.lane.b32.xlu2 %v2067_v34, %s2098_s22 }
0x12ad   :  { %v443_v44 = vrot.slane %v433_v35, 1  ;;  %1033 = vperm.xlu1 %1923, %v1031_v32  }
0x12af   :  { %v2507_v49 = vsel %vm300_vm1, %v434_v38, %v443_v44  ;;  %v1894_v44 = vld [vmem:[%s2739_s9 + $0x34] sm:$0xf] }
0x12b2   :  { %v572_v50 = vpop.permute.xlu1 %571 }
0x12b3   :  { %v577_v47 = vadd.f32 %v2494_v14, %v572_v50  ;;  %v2540_v15 = vpop.permute.xlu0 %1009  ;;  %v1769_v50 = vld [vmem:[%s2739_s9 + $0x20] sm:$0xf] }
0x12b4   :  { %1011 = vrot.lane.b32.xlu2 %v2393_v10, %s2099_s6  ;;  %v311_v10 = vmax.f32 %v310_v58, -1e+30  ;;  %v1890_v58 = vld [vmem:[%s2739_s9 + $0x14] sm:$0xf] }
0x12b5   :  { %v587_v36 = vrot.slane %v577_v47, 2  ;;  %1179 = vperm.xlu1 %1923, %v1177_v52   ;;  %v1893_v52 = vld [vmem:[%s2739_s9 + $0x24] sm:$0xf0]  ;;  %v1892_v47 = vld [vmem:[%s2739_s9 + $0x24] sm:$0xf] }
0x12b6   :  { %v1770_v41 = vor.u32 %v1893_v52, %v1769_v50 }
0x12b7   :  { %v2520_v48 = vsel %vm300_vm1, %v588_v42, %v587_v36  ;;  %v1774_v42 = vor.u32 %v1892_v47, %v1771_v56 }
0x12b8   :  { %1390 = vmatpush.bf16.msra.mxu1 %v1770_v41 }
0x12ba   :  { %v451_v55 = vpop.permute.xlu1 %450 }
0x12bb   :  { %vm452_vm13 = vcmp.eq.s32.totalorder %v451_v55, 1  ;;  %v2545_v40 = vpop.permute.xlu0 %1155 }
0x12bc   :  { %v453_v60 = vsel %vm452_vm13, %v2507_v49, -1e+30  ;;  %1157 = vrot.lane.b32.xlu2 %v2420_v23, %s2099_s6  ;;  %v726_v23 = vsel %vm725_vm3, 1, %v2097_v28  ;;  %1618 = vmatpush.bf16.msrb.mxu1 %v1903_v0 }
0x12bd   :  { %v454_v51 = vmax.f32 %v311_v10, %v453_v60  ;;  %1325 = vperm.xlu1 %1923, %v1323_v1   ;;  %v1797_v1 = vld [vmem:[%s2739_s9 + $0x18] sm:$0xf0]  ;;  %v869_v60 = vadd.f32 %v2494_v14, %v2536_v12  ;;  %v1015_v12 = vadd.f32 %v2494_v14, %v2540_v15 }
0x12be   :  { %v1800_v10 = vor.u32 %v1890_v58, %v1797_v1  ;;  %v1907_v1 = vld [vmem:[%s2743_s13 + $0x58] sm:$0xff] }
0x12bf   :  { %v879_v11 = vrot.slane %v869_v60, 4  ;;  %v1025_v15 = vrot.slane %v1015_v12, 5  ;;  %v1906_v60 = vld [vmem:[%s2743_s13 + $0x50] sm:$0xff] }
0x12c0   :  { %1451 = vmatpush.bf16.msrb.mxu0 %v1800_v10  ;;  %v1900_v10 = vld [vmem:[%s2743_s13 + $0x20] sm:$0xff] }
0x12c2   :  { %v596_v46 = vpop.permute.xlu1 %595 }
0x12c3   :  { %vm597_vm2 = vcmp.eq.s32.totalorder %v596_v46, 1  ;;  %v295_v6 = vpop.permute.xlu0 %294  ;;  %v1889_v46 = vld [vmem:[%s2739_s9 + $0x4] sm:$0xf0] }
0x12c4   :  { %v598_v4 = vsel %vm597_vm2, %v2520_v48, -1e+30  ;;  %438 = vperm.xlu2 %1924, %v436_v2   ;;  %vm296_vm8 = vcmp.eq.s32.totalorder %v295_v6, 1  ;;  %v1787_v2 = vld [vmem:[%s2739_s9] sm:$0xf] }
0x12c5   :  { %v599_v8 = vmax.f32 %v454_v51, %v598_v4  ;;  %874 = vperm.xlu1 %1923, %v872_v3   ;;  %v303_v31 = vsel %vm296_vm8, %v2516_v57, 0.0  ;;  %v1795_v57 = vld [vmem:[%s2739_s9 + $0x10] sm:$0xf]  ;;  %v1888_v3 = vld [vmem:[%s2739_s9 + $0x4] sm:$0xf]  ;;  %v870_v4 = vadd.f32 %v2501_v37, %v2538_v13  ;;  %v1161_v13 = vadd.f32 %v2494_v14, %v2545_v40 }
0x12c6   :  { %v1910_v40 = vld [vmem:[%s2743_s13 + $0x70] sm:$0xff] }
0x12cb   :  { %v583_v29 = vpop.permute.xlu0 %582 }
0x12cc   :  { %728 = vperm.xlu2 %1924, %v726_v23   ;;  %vm584_vm9 = vcmp.eq.s32.totalorder %v583_v29, 1  ;;  %v1788_v23 = vor.u32 %v1889_v46, %v1787_v2  ;;  %v1905_v2 = vld [vmem:[%s2743_s13 + $0x48] sm:$0xff]  ;;  %v1898_v46 = vld [vmem:[%s2743_s13 + $0x10] sm:$0xff] }
0x12cd   :  { %1166 = vperm.xlu1 %1923, %v1164_v59   ;;  %v1789_v59 = vld [vmem:[%s2739_s9 + $0x8] sm:$0xf0] }
0x12ce   :  { %v1792_v53 = vor.u32 %v1888_v3, %v1789_v59  ;;  %v1904_v3 = vld [vmem:[%s2743_s13 + $0x40] sm:$0xff] }
0x12d0   :  { %1452 = vmatpush.bf16.msrb.mxu0 %v1792_v53 }
0x1306   :  { %v1292_v16 = vpop.permute.xlu2 %1291 }
0x1307   :  { %v1294_v43 = vpop.permute.xlu1 %1293  ;;  %v1297_v18 = vmul.f32 %v1292_v16, %v2456_v17  ;;  %v2555_v17 = vld [vmem:[%s2737_s7] ss:$0 sm:$0xff] }
0x1308   :  { %v1298_v54 = vmul.f32 %v1294_v43, %v2443_v62 }
0x1309   :  { %1301 = vrot.lane.b32.xlu0 %v1297_v18, %s2099_s6  ;;  %v880_v18 = vrot.slane %v870_v4, 3  ;;  %v1897_v4 = vld [vmem:[%s2743_s13 + $0x8] sm:$0xff] }
0x130a   :  { %1303 = vrot.lane.b32.xlu2 %v1298_v54, %s2099_s6  ;;  %v1911_v54 = vld [vmem:[%s2743_s13 + $0x78] sm:$0xff] }
0x130b   :  { %v881_v9 = vsel %vm300_vm1, %v880_v18, %v879_v11  ;;  %v1458_v11 = vld [vmem:[%s2740_s10] sm:$0x3] }
0x130e   :  { %v1012_v5 = vpop.permute.xlu2 %1011 }
0x130f   :  { %v742_v62 = vpop.permute.xlu1 %741 }
0x1310   :  { %vm743_vm6 = vcmp.eq.s32.totalorder %v742_v62, 1  ;;  %v1171_v62 = vrot.slane %v1161_v13, 6  ;;  %v1474_v13 = vld [vmem:[%s2742_s12] sm:$0x3] }
0x1311   :  { %v744_v24 = vsel %vm743_vm6, %v735_v22, -1e+30  ;;  %1020 = vperm.xlu0 %1922, %v1018_v21  }
0x1312   :  { %v2558_v19 = vmax.f32 %v599_v8, %v744_v24  ;;  %1341 = vrot.lane.b32.xlu2 %v2555_v17, %s2100_s5  ;;  %v1016_v8 = vadd.f32 %v2501_v37, %v1012_v5 }
0x1314   :  { %v1026_v45 = vrot.slane %v1016_v8, 4  ;;  %v1896_v8 = vld [vmem:[%s2743_s13] sm:$0xff] }
0x1316   :  { %v1158_v25 = vpop.permute.xlu2 %1157 }
0x1317   :  { %v888_v35 = vpop.permute.xlu1 %887  ;;  %v1162_v16 = vadd.f32 %v2501_v37, %v1158_v25 }
0x1318   :  { %vm889_vm12 = vcmp.eq.s32.totalorder %v888_v35, 1 }
0x1319   :  { %1312 = vperm.xlu0 %1922, %v1310_v26   ;;  %v1172_v20 = vrot.slane %v1162_v16, 5  ;;  %v890_v5 = vsel %vm889_vm12, %v881_v9, -1e+30  ;;  %v1466_v16 = vld [vmem:[%s2741_s11] sm:$0x3] }
0x131a   :  { %1345 = vrot.lane.b32.xlu2 %v2566_v27, %s2100_s5  ;;  %v891_v26 = vmax.f32 %v2558_v19, %v890_v5  ;;  %s2101_s5 = smov [#allocation2]  }
0x131b   :  { %v1173_v29 = vsel %vm300_vm1, %v1172_v20, %v1171_v62  ;;  %s1716_s28 = sshll.u32 %s2101_s5, 4  ;;  %s1717_s28 = int_to_ptr.vmem [resolvable:$true] %s1716_s28 }
0x131e   :  { %v439_v30 = vpop.permute.xlu2 %438 }
0x131f   :  { %vm440_vm10 = vcmp.eq.s32.totalorder %v439_v30, 1  ;;  %v1034_v38 = vpop.permute.xlu1 %1033 }
0x1320   :  { %v446_v7 = vsel %vm440_vm10, %v2507_v49, %v303_v31  ;;  %v1782_v49 = vor.u32 %v1894_v44, %v1779_v39  ;;  %vm1035_vm13 = vcmp.eq.s32.totalorder %v1034_v38, 1 }
0x1321   :  { %v591_v32 = vsel %vm584_vm9, %v2520_v48, %v446_v7  ;;  %v1891_v48 = vld [vmem:[%s2739_s9 + $0x14] sm:$0xf0] }
0x1322   :  { %1402 = vmatpush.bf16.msra.mxu2 %v1782_v49  ;;  %v1796_v55 = vor.u32 %v1891_v48, %v1795_v57 }
0x1324   :  { %1438 = vmatpush.bf16.msra.mxu3 %v1796_v55  ;;  %v1902_v55 = vld [vmem:[%s2743_s13 + $0x30] sm:$0xff] }
0x1325   :  { %1619 = vmatpush.bf16.msrb.mxu1 %v1902_v55 }
0x1326   :  { %v729_v28 = vpop.permute.xlu2 %728  ;;  %1403 = vmatpush.bf16.msra.mxu2 %v1774_v42 }
0x1327   :  { %vm730_vm11 = vcmp.eq.s32.totalorder %v729_v28, 1  ;;  %v1180_v36 = vpop.permute.xlu1 %1179 }
0x1328   :  { %v2572_v34 = vsel %vm730_vm11, %v735_v22, %v591_v32  ;;  %1439 = vmatpush.bf16.msra.mxu3 %v1788_v23  ;;  %v1027_v22 = vsel %vm300_vm1, %v1026_v45, %v1025_v15  ;;  %vm1181_vm14 = vcmp.eq.s32.totalorder %v1180_v36, 1  ;;  %v1915_v23 = vld [vmem:[%s2747_s17 + $0x18] sm:$0xff]  ;;  %v1477_v15 = vperm.slane %v1474_v13, 1 }
0x1329   :  { %v1036_v6 = vsel %vm1035_vm13, %v1027_v22, -1e+30  ;;  %v1182_v31 = vsel %vm1181_vm14, %v1173_v29, -1e+30 }
0x132a   :  { %1631 = vmatpush.bf16.msrb.mxu2 %v1911_v54  ;;  %v1037_v7 = vmax.f32 %v891_v26, %v1036_v6  ;;  %v1469_v54 = vperm.slane %v1466_v16, 1  ;;  %v1476_v26 = vperm.slane %v1474_v13, 0 }
0x132c   :  { %v1183_v38 = vmax.f32 %v1037_v7, %v1182_v31  ;;  %1700 = vmatpush.bf16.msrb.mxu3 %v1915_v23 }
0x132e   :  { %1632 = vmatpush.bf16.msrb.mxu2 %v1910_v40  ;;  %v1460_v40 = vperm.slane %v1458_v11, 0 }
0x132f   :  { %v1326_v43 = vpop.permute.xlu1 %1325 }
0x1330   :  { %vm1327_vm15 = vcmp.eq.s32.totalorder %v1326_v43, 1  ;;  %v1461_v43 = vperm.slane %v1458_v11, 1 }
0x1337   :  { %v875_v32 = vpop.permute.xlu1 %874 }
0x1338   :  { %vm876_vm2 = vcmp.eq.s32.totalorder %v875_v32, 1 }
0x133f   :  { %v1167_v63 = vpop.permute.xlu1 %1166 }
0x1340   :  { %vm1168_vm4 = vcmp.eq.s32.totalorder %v1167_v63, 1 }
0x1364   :  { %v1304_v51 = vpop.permute.xlu2 %1303 }
0x1365   :  { %v1308_v24 = vadd.f32 %v2501_v37, %v1304_v51  ;;  %v1899_v51 = vld [vmem:[%s2743_s13 + $0x18] sm:$0xff] }
0x1367   :  { %v1318_v28 = vrot.slane %v1308_v24, 6 }
0x136c   :  { %v1342_v21 = vpop.permute.xlu2 %1341 }
0x1374   :  { %v1346_v49 = vpop.permute.xlu2 %1345 }
0x137b   :  { %v1302_v25 = vpop.permute.xlu0 %1301 }
0x137c   :  { %v1307_v30 = vadd.f32 %v2494_v14, %v1302_v25  ;;  %v883_v14 = vsel %vm876_vm2, %v881_v9, %v2572_v34  ;;  %v1909_v34 = vld [vmem:[%s2743_s13 + $0x68] sm:$0xff] }
0x137d   :  { %1633 = vmatpush.bf16.msrb.mxu2 %v1909_v34 }
0x137e   :  { %v1317_v35 = vrot.slane %v1307_v30, 7 }
0x1380   :  { %v1319_v44 = vsel %vm300_vm1, %v1318_v28, %v1317_v35  ;;  %v1914_v35 = vld [vmem:[%s2747_s17 + $0x10] sm:$0xff]  ;;  %vm1709_vm1 = vcmask 25600  }
0x1381   :  { %v1328_v39 = vsel %vm1327_vm15, %v1319_v44, -1e+30  ;;  %1701 = vmatpush.bf16.msrb.mxu3 %v1914_v35 }
0x1382   :  { %v1329_v37 = vmax.f32 %v1183_v38, %v1328_v39  ;;  %v1913_v38 = vld [vmem:[%s2747_s17 + $0x8] sm:$0xff]  ;;  %v1930_v39 = vld [vmem:[%s2744_s14] ss:$0 sm:$0xff] }
0x1383   :  { %v1021_v33 = vpop.permute.xlu0 %1020 }
0x1384   :  { %v1344_v61 = vmul.f32 %v1342_v21, %v1329_v37  ;;  %vm1022_vm3 = vcmp.eq.s32.totalorder %v1021_v33, 1 }
0x1385   :  { %v1029_v52 = vsel %vm1022_vm3, %v1027_v22, %v883_v14  ;;  %v1468_v22 = vperm.slane %v1466_v16, 0  ;;  %1702 = vmatpush.bf16.msrb.mxu3 %v1913_v38  ;;  %v1932_v14 = vld [vmem:[%s2746_s16] ss:$0 sm:$0xff] }
0x1386   :  { %v1348_v19 = vadd.f32 %v1346_v49, %v1344_v61  ;;  %v1175_v56 = vsel %vm1168_vm4, %v1173_v29, %v1029_v52  ;;  %v1931_v61 = vld [vmem:[%s2745_s15] ss:$0 sm:$0xff] }
0x1388   :  { %v1349_v50 = vmax.f32 %v1348_v19, 0.0 }
0x138a   :  { %v1359_v41 = vpack.c.bf16 %v1349_v50, %v1349_v50 }
0x138b   :  { %v1313_v47 = vpop.permute.xlu0 %1312 }
0x138c   :  { %vm1314_vm5 = vcmp.eq.s32.totalorder %v1313_v47, 1  ;;  %1783 = vmatmul.msk.bf16.vlgmr.msra.gmra.mxu1 %vm69_vm0, %v1359_v41  ;;  %1784 = vmatmul.msk.bf16.vlgmr.msra.gmra.mxu2 %vm69_vm0, %v1359_v41 }
0x138d   :  { %v1321_v42 = vsel %vm1314_vm5, %v1319_v44, %v1175_v56  ;;  %v1912_v44 = vld [vmem:[%s2747_s17] sm:$0xff] }
0x138e   :  { %v1335_v36 = vmul.f32 %v2555_v17, %v1321_v42  ;;  %v1908_v17 = vld [vmem:[%s2743_s13 + $0x60] sm:$0xff]  ;;  %1703 = vmatpush.bf16.msrb.mxu3 %v1912_v44 }
0x138f   :  { %1634 = vmatpush.bf16.msrb.mxu2 %v1908_v17  ;;  %v1933_v42 = vld [vmem:[%s2748_s18] ss:$0 sm:$0xff] }
0x1390   :  { %v1339_v57 = vadd.f32 %v2566_v27, %v1335_v36  ;;  %v1901_v27 = vld [vmem:[%s2743_s13 + $0x28] sm:$0xff] }
0x1391   :  { %1620 = vmatpush.bf16.msrb.mxu1 %v1901_v27 }
0x1392   :  { %v1340_v48 = vmax.f32 %v1339_v57, 0.0 }
0x1393   :  { %1635 = vmatpush.bf16.msrb.mxu2 %v1907_v1 }
0x1394   :  { %v1358_v58 = vpack.c.bf16 %v1340_v48, %v1340_v48 }
0x1395   :  { %1621 = vmatpush.bf16.msrb.mxu1 %v1900_v10 }
0x1396   :  { %1801 = vmatmul.msk.bf16.vlgmr.msra.gmra.mxu3 %vm69_vm0, %v1358_v58  ;;  %1802 = vmatmul.msk.bf16.vlgmr.msrb.gmra.mxu0 %vm69_vm0, %v1358_v58  ;;  %vm1692_vm0 = vcmask 523264  }
0x1397   :  { %1636 = vmatpush.bf16.msrb.mxu2 %v1906_v60 }
0x1399   :  { %1622 = vmatpush.bf16.msrb.mxu1 %v1899_v51 }
0x139b   :  { %1637 = vmatpush.bf16.msrb.mxu2 %v1905_v2 }
0x139d   :  { %1623 = vmatpush.bf16.msrb.mxu1 %v1898_v46 }
0x139f   :  { %1638 = vmatpush.bf16.msrb.mxu2 %v1904_v3 }
0x13a1   :  { %1624 = vmatpush.bf16.msrb.mxu1 %v1897_v4 }
0x13a5   :  { %1625 = vmatpush.bf16.msrb.mxu1 %v1896_v8 }
0x1409   :  { %v1392_v59 = vpop.f32.mrf.mxu1 }
0x140f   :  { %v1405_v53 = vpop.f32.mrf.mxu2 }
0x1411   :  { %v1394_v12 = vpop.f32.mrf.mxu1 }
0x1413   :  { %v1454_v18 = vpop.f32.mrf.mxu0 }
0x1414   :  { %v1455_v45 = vadd.f32 %v1454_v18, %v1405_v53 }
0x1416   :  { %v1465_v0 = vadd.f32 %v1461_v43, %v1455_v45 }
0x1417   :  { %v1407_v9 = vpop.f32.mrf.mxu2 }
0x1418   :  { %v1473_v20 = vmul.f32 %v1469_v54, %v1465_v0 }
0x1419   :  { %v1441_v5 = vpop.f32.mrf.mxu3 }
0x141a   :  { %v1481_v21 = vadd.f32 %v1477_v15, %v1473_v20  ;;  %v1442_v62 = vadd.f32 %v1441_v5, %v1392_v59 }
0x141b   :  { %v1456_v24 = vpop.f32.mrf.mxu0 }
0x141c   :  { %v1483_v6 = vmax.f32 %v1481_v21, 0.0  ;;  %v1464_v25 = vadd.f32 %v1460_v40, %v1442_v62 }
0x141e   :  { %v1472_v29 = vmul.f32 %v1468_v22, %v1464_v25  ;;  %v1485_v30 = vpack.c.bf16 %v1483_v6, %v1483_v6 }
0x1420   :  { %v1480_v31 = vadd.f32 %v1476_v26, %v1472_v29  ;;  %1639 = vmatmul.bf16.vlgmr.msrb.gmra.mxu2 %v1485_v30 }
0x1421   :  { %v1443_v7 = vpop.f32.mrf.mxu3 }
0x1422   :  { %v1482_v32 = vmax.f32 %v1480_v31, 0.0 }
0x1424   :  { %v1484_v28 = vpack.c.bf16 %v1482_v32, %v1482_v32 }
0x1426   :  { %1626 = vmatmul.bf16.vlgmr.msrb.gmra.mxu1 %v1484_v28 }
0x14a3   :  { %v1627_v37 = vpop.f32.mrf.mxu1  ;;  %v1640_v33 = vpop.f32.mrf.mxu2 }
0x14a4   :  { %v1628_v49 = vadd.f32 %v1930_v39, %v1627_v37 }
0x14a6   :  { %v1641_v19 = vadd.f32 %v1640_v33, %v1628_v49 }
0x14a8   :  { %v1648_v63 = vmul.f32 %v1931_v61, %v1641_v19 }
0x14aa   :  { %v1653_v50 = vadd.f32 %v1932_v14, %v1648_v63 }
0x14ab   :  { %v1629_v52 = vpop.f32.mrf.mxu1  ;;  %v1642_v41 = vpop.f32.mrf.mxu2 }
0x14ac   :  { %v1654_v47 = vmax.f32 %v1653_v50, 0.0 }
0x14ae   :  { %v1655_v56 = vpack.c.bf16 %v1654_v47, %v1654_v47 }
0x14b0   :  { %1883 = vmatmul.msk.bf16.vlgmr.msrb.gmra.mxu3 %vm1692_vm0, %v1655_v56 }
0x1533   :  { %v1705_v36 = vpop.f32.mrf.mxu3 }
0x1534   :  { %v1706_v57 = vadd.f32 %v1933_v42, %v1705_v36 }
0x1536   :  { %1710 = vst.msk [vmem:[#allocation2] sm:$0x3] %vm1709_vm1, %v1706_v57 }
0x1537   :  { %1721 = dma.vmem_to_hbm [thread:$0]  %s1717_s28, 32, %s1719_s8, [#allocation3]  }
0x153b   :  { %v1707_v48 = vpop.f32.mrf.mxu3 }
0x153c   :  { %2094 = dma.done.wait [#allocation3], 32  }
0x153d   :  { %2095 = vsyncadd [#allocation3], 4294967264 }
0x153e   :  { %1726 = vsyncpa [#allocation3], 1 }

// kernel: final_preln_transformer_forward.2
= control target key start
LH: loop header
LB: loop body
LE: loop exit
PB: predicated region body
PF: predicated region fallthrough
CT: control target
= control target key end

     0   :  { %s4122_s29 = smov 0   ;;  %s4124_s30 = smov 0   ;;  %s4617_s0 = inlined_call_operand.vmem [shape: f32[2,8,32], index: 0, kind: input, shape index: {}]   ;;  %s4618_s1 = inlined_call_operand.vmem [shape: f32[2,1,8], index: 1, kind: input, shape index: {}]   ;;  %s4619_s2 = inlined_call_operand.vmem [shape: f32[2,1,32], index: 2, kind: input, shape index: {}]   ;;  %s4620_s3 = inlined_call_operand.vmem [shape: f32[2,1,32], index: 3, kind: input, shape index: {}]   ;;  %s4621_s4 = inlined_call_operand.vmem [shape: bf16[2,32,96], index: 4, kind: input, shape index: {}]   ;;  %s4622_s5 = inlined_call_operand.vmem [shape: f32[2,1,96], index: 5, kind: input, shape index: {}]   ;;  %s4623_s6 = inlined_call_operand.vmem [shape: bf16[2,4,8,32], index: 6, kind: input, shape index: {}]   ;;  %s4624_s7 = inlined_call_operand.vmem [shape: f32[2,1,32], index: 7, kind: input, shape index: {}]   ;;  %s4625_s8 = inlined_call_operand.vmem [shape: f32[2,1,32], index: 8, kind: input, shape index: {}]   ;;  %s4626_s9 = inlined_call_operand.vmem [shape: f32[2,1,32], index: 9, kind: input, shape index: {}]   ;;  %s4627_s10 = inlined_call_operand.vmem [shape: bf16[2,32,2048], index: 10, kind: input, shape index: {}]   ;;  %s4628_s11 = inlined_call_operand.vmem [shape: f32[2,1,2048], index: 11, kind: input, shape index: {}]   ;;  %s4629_s12 = inlined_call_operand.vmem [shape: bf16[2,2048,32], index: 12, kind: input, shape index: {}]   ;;  %s4630_s13 = inlined_call_operand.vmem [shape: f32[2,1,32], index: 13, kind: input, shape index: {}]   ;;  %s4631_s14 = inlined_call_operand.vmem [shape: f32[2,8,32], index: 14, kind: output, shape index: {}]  }
   0x1   :  { %4636 = sst [smem:[#allocation8_spill]] %s4617_s0  ;;  %s4126_s15 = smov 0  }
   0x2   :  { %4637 = sst [smem:[#allocation9_spill]] %s4618_s1  ;;  %s4128_s16 = smov 0  }
   0x3   :  { %4638 = sst [smem:[#allocation10_spill]] %s4621_s4  ;;  %s4130_s17 = smov 0  }
   0x4   :  { %4639 = sst [smem:[#allocation11_spill]] %s4623_s6 }
   0x5   :  { %4640 = sst [smem:[#allocation12_spill]] %s4625_s8 }
   0x6   :  { %4641 = sst [smem:[#allocation13_spill]] %s4626_s9 }
   0x7   :  { %4642 = sst [smem:[#allocation14_spill]] %s4629_s12 }
   0x8   :  { %4643 = sst [smem:[#allocation15_spill]] %s4630_s13 }
   0x9   :  { %4644 = sst [smem:[#allocation16_spill]] %s4631_s14 }
   0xa LB: > { %4645 = sst [smem:[#allocation2_spill]] %s4023_s29  ;;  %s33_s18 = sadd.s32 1, %s4031_s15  ;;  %s4039_s17 = sphi %s4130_s17, %s24_s17   ;;  %s4035_s16 = sphi %s4128_s16, %s4676_s16   ;;  %s4031_s15 = sphi %s4126_s15, %s4675_s15   ;;  %s4027_s30 = sphi %s4124_s30, %s4674_s30   ;;  %s4023_s29 = sphi %s4122_s29, %s4673_s29  }
   0xb   : > { %4646 = sst [smem:[#allocation3_spill]] %s4031_s15  ;;  %s36_s19 = sadd.s32 1, %s4035_s16 }
   0xc   : > { %4647 = sst [smem:[#allocation4_spill]] %s4035_s16  ;;  %p34_p0 = scmp.ge.s32.totalorder %s33_s18, 2 }
   0xd   : > { %4648 = sst [smem:[#allocation5_spill]] %s4039_s17  ;;  %p3064_p1 = scmp.ge.s32.totalorder %s4039_s17, 1 }
   0xe   : > { %p536_p2 = scmp.lt.s32.totalorder %s4039_s17, 5  ;;  %s4678_s18 = smov (%p34_p0, %s33_s18), 0 }
   0xf   : > { %4649 = sst [smem:[#allocation6_spill]] %s4678_s18  ;;  %s4680_s19 = smov (!%p34_p0, %s36_s19), %s4035_s16 }
  0x10   : > { %p537_p3 = pnand %p3064_p1, %p536_p2  ;;  %p38_p4 = scmp.ge.s32.totalorder %s4680_s19, 2 }
  0x11   : > { %p628_p5 = scmp.lt.s32.totalorder (!%p537_p3), %s4027_s30, 1  ;;  %p635_p6 = scmp.lt.s32.totalorder (!%p537_p3), %s4023_s29, 1 }
  0x12   : > { %s4682_s19 = smov (%p38_p4, %s4680_s19), 0  ;;  %540 = sbr.rel (%p537_p3) target bundleno = 1990 (0x7c6), region = 76 }
  0x13   : > { %4650 = sst [smem:[#allocation7_spill]] %s4682_s19 }
  0x14   : > { %s4652_s0 = sld [smem:[#allocation8_spill]] (!%p537_p3) }
  0x15   : > { %s4653_s4 = sld [smem:[#allocation10_spill]] (!%p537_p3) }
  0x16   : > { %s4654_s6 = sld [smem:[#allocation11_spill]] (!%p537_p3) }
  0x17   : > { %s4684_s30 = smov (!%p628_p5, %s4027_s30), 1  ;;  %s4657_s17 = sld [smem:[#allocation14_spill]] }
  0x18   : > { %s4158_s20 = scalar_select %p635_p6, %s4023_s29, 1 }
  0x19   : > { %s3065_s21 = sshll.u32 %s4684_s30, 3  ;;  %s4658_s14 = sld [smem:[#allocation15_spill]] }
  0x1a   : > { %s631_s27 = scalar_lea.vmem %s4652_s0, %s3065_s21  ;;  %s3759_s29 = sshll.u32 %s4158_s20, 4 }
  0x1b   : > { %s4180_s12 = scalar_lea.vmem %s4653_s4, %s3759_s29  ;;  %s3761_s1 = sshll.u32 %s4158_s20, 8 }
  0x1c   : > { %s4189_s0 = scalar_lea.vmem %s4654_s6, %s3759_s29  ;;  %s4207_s25 = scalar_lea.vmem %s4628_s11, %s3759_s29 }
  0x1d   : > { %s4212_s6 = scalar_lea.vmem %s4627_s10, %s3761_s1  ;;  %s3762_s19 = sshll.u32 %s4158_s20, 10 }
  0x1e   : > { %s4218_s16 = scalar_lea.vmem %s4657_s17, %s3762_s19  ;;  %s4659_s22 = sld [smem:[#allocation16_spill]] }
  0x1f   : > { %s679_s4 = scalar_lea.vmem %s4658_s14, %s4158_s20  ;;  %s4660_s23 = sld [smem:[#allocation2_spill]] }
  0x24   : > { %s4227_s29 = scalar_lea.vmem %s4659_s22, %s3065_s21 }
  0x25   : > { %p3076_p7 = scmp.ne.s32.totalorder %s4660_s23, 0 }
  0x27   : > { %688 = sbr.rel (%p3076_p7) target bundleno = 46 (0x2e), region = 80 }
  0x2c   : > { %v689_v0 = vld [vmem:[%s631_s27] sm:$0xff]  ;;  %vm690_vm0 = vcmask 261120  }
  0x2d   : > { %691 = vst.msk [vmem:[%s4227_s29] sm:$0xff] %vm690_vm0, %v689_v0 }
  0x2e PF: > { %vm696_vm1 = vcmask 261120   ;;  %v4041_v3 = vmov 32.0   ;;  %v3764_v15 = vld [vmem:[%s4180_s12 + $0x8] sm:$0xff]  ;;  %v3763_v16 = vld [vmem:[%s4180_s12] sm:$0xff]  ;;  %s4661_s9 = scalar_lea.vmem %s4619_s2, %s4158_s20  ;;  %s4662_s21 = scalar_lea.vmem %s4620_s3, %s4158_s20  ;;  %vm801_vm6 = vcmask 64512   ;;  %vm946_vm7 = vcmask 1043456  }
  0x2f   : > { %3979 = vrcp.f32 %v4041_v3  ;;  %764 = vmatpush.bf16.msra.mxu0 %v3764_v15  ;;  %v3971_v26 = vld [vmem:[%s4661_s9] ss:$0 sm:$0xff]  ;;  %s4663_s24 = scalar_lea.vmem %s4622_s5, %s4158_s20  ;;  %s4042_s26 = smov 104  }
  0x30   : > { %v3972_v29 = vld [vmem:[%s4662_s21] ss:$0 sm:$0xff]  ;;  %s4043_s19 = smov 120   ;;  %s4044_s28 = smov 112  }
  0x31   : > { %v3973_v33 = vld [vmem:[%s4663_s24] ss:$0 sm:$0xff]  ;;  %s4045_s17 = smov 96   ;;  %s4664_s22 = sld [smem:[#allocation9_spill]] }
  0x32   : > { %s4046_s1 = smov 64   ;;  %s4666_s8 = scalar_lea.vmem %s4624_s7, %s4158_s20 }
  0x33   : > { %765 = vmatpush.bf16.msra.mxu0 %v3763_v16  ;;  %s4667_s18 = sld [smem:[#allocation12_spill]] }
  0x34   : > { %v4232_v1 = vld [vmem:[%s4227_s29] sm:$0xff]  ;;  %s4669_s24 = sld [smem:[#allocation13_spill]] }
  0x35   : > { %v697_v2 = vsel %vm696_vm1, %v4232_v1, 0.0  ;;  %v3980_v4 = vpop.eup %3979 }
  0x36   : > { %698 = vadd.xlane.f32.xlu0 %v697_v2  ;;  %v701_v5 = vmul.f32 32.0, %v3980_v4  ;;  %vm705_vm2 = vweird.f32 %v3980_v4 }
  0x37   : > { %s4665_s23 = scalar_lea.vmem %s4664_s22, %s4684_s30 }
  0x38   : > { %v702_v6 = vsub.f32 1.0, %v701_v5  ;;  %v3974_v5 = vld [vmem:[%s4665_s23] ss:$0 sm:$0xff] }
  0x39   : > { %s4668_s21 = scalar_lea.vmem %s4667_s18, %s4158_s20 }
  0x3a   : > { %v703_v7 = vmul.f32 %v3980_v4, %v702_v6 }
  0x3c   : > { %v704_v8 = vadd.f32 %v3980_v4, %v703_v7 }
  0x3e   : > { %v4236_v9 = vsel %vm705_vm2, %v3980_v4, %v704_v8 }
  0xa9   : > { %v699_v10 = vpop.xlane.xlu0 %698 }
  0xaa   : > { %v707_v11 = vmul.f32 %v4236_v9, %v699_v10 }
  0xac   : > { %v708_v12 = vsub.f32 %v4232_v1, %v707_v11 }
  0xae   : > { %v709_v13 = vmul.f32 %v708_v12, %v708_v12 }
  0xb0   : > { %v710_v14 = vsel %vm696_vm1, %v709_v13, 0.0 }
  0xb1   : > { %711 = vadd.xlane.f32.xlu0 %v710_v14 }
 0x124   : > { %v712_v17 = vpop.xlane.xlu0 %711 }
 0x125   : > { %v713_v18 = vmul.f32 %v712_v17, %v4236_v9 }
 0x127   : > { %v714_v19 = vadd.f32 1e-05, %v713_v18 }
 0x129   : > { %3981 = vrsqrt.f32 %v714_v19  ;;  %vm721_vm4 = vweird.f32 %v714_v19 }
 0x12f   : > { %v3982_v20 = vpop.eup %3981 }
 0x130   : > { %v716_v21 = vmul.f32 %v3982_v20, %v714_v19  ;;  %vm722_vm3 = vweird.f32 %v3982_v20 }
 0x131   : > { %vm723_vm5 = vmor %vm721_vm4, %vm722_vm3 }
 0x132   : > { %v717_v22 = vmul.f32 %v3982_v20, %v716_v21 }
 0x134   : > { %v718_v23 = vmul.f32 0.5, %v717_v22 }
 0x136   : > { %v719_v24 = vsub.f32 1.5, %v718_v23 }
 0x138   : > { %v720_v25 = vmul.f32 %v3982_v20, %v719_v24 }
 0x13a   : > { %v724_v27 = vsel %vm723_vm5, %v3982_v20, %v720_v25 }
 0x13b   : > { %v725_v28 = vmul.f32 %v724_v27, %v708_v12 }
 0x13d   : > { %v729_v30 = vmul.f32 %v3971_v26, %v725_v28 }
 0x13f   : > { %v733_v31 = vadd.f32 %v3972_v29, %v729_v30 }
 0x141   : > { %v734_v32 = vpack.c.bf16 %v733_v31, %v733_v31 }
 0x143   : > { %3085 = vmatmul.msk.bf16.vlgmr.msra.gmra.mxu0 %vm696_vm1, %v734_v32 }
 0x1c0   : > { %v767_v34 = vpop.f32.mrf.mxu0 }
 0x1c1   : > { %v768_v35 = vadd.f32 %v3973_v33, %v767_v34 }
 0x1c3   : > { %778 = vrot.lane.b32.xlu2 %v768_v35, %s4042_s26  ;;  %772 = vrot.lane.b32.xlu1 %v768_v35, %s4043_s19  ;;  %v789_v37 = vpack.c.bf16 %v768_v35, %v768_v35  ;;  %v781_v54 = vmul.f32 0.35355338, %v768_v35  ;;  %s4670_s26 = scalar_lea.vmem %s4669_s24, %s4158_s20 }
 0x1c5   : > { %v797_v38 = vunpack.c.l.b16 %v789_v37  ;;  %v785_v55 = vpack.c.bf16 %v781_v54, %v781_v54 }
 0x1c7   : > { %v4260_v39 = vpack.c.b16 %v797_v38, %v797_v38 }
 0x1c8   : > { %v769_v36 = vpop.f32.mrf.mxu0 }
 0x1cb   : > { %775 = vrot.lane.b32.xlu1 %v768_v35, %s4044_s28 }
 0x1d3   : > { %799 = vrot.lane.b32.xlu1 %v4260_v39, %s4045_s17 }
 0x21d   : > { %v779_v42 = vpop.permute.xlu2 %778 }
 0x21e   : > { %v792_v44 = vpack.c.bf16 %v779_v42, %v779_v42  ;;  %v784_v62 = vmul.f32 0.35355338, %v779_v42 }
 0x220   : > { %v870_v47 = vunpack.c.l.b16 %v792_v44  ;;  %v788_v63 = vpack.c.bf16 %v784_v62, %v784_v62 }
 0x222   : > { %v4263_v50 = vpack.c.b16 %v870_v47, %v870_v47 }
 0x235   : > { %v773_v40 = vpop.permute.xlu1 %772 }
 0x236   : > { %v790_v41 = vpack.c.bf16 %v773_v40, %v773_v40  ;;  %v782_v58 = vmul.f32 0.35355338, %v773_v40 }
 0x238   : > { %v822_v43 = vunpack.c.l.b16 %v790_v41  ;;  %v786_v59 = vpack.c.bf16 %v782_v58, %v782_v58 }
 0x23a   : > { %v823_v45 = vpack.c.b16 %v822_v43, %v822_v43 }
 0x23c   : > { %824 = vrot.lane.b32.xlu2 %v823_v45, %s4045_s17 }
 0x23d   : > { %v776_v46 = vpop.permute.xlu1 %775 }
 0x23e   : > { %v791_v48 = vpack.c.bf16 %v776_v46, %v776_v46  ;;  %v783_v3 = vmul.f32 0.35355338, %v776_v46 }
 0x240   : > { %v846_v49 = vunpack.c.l.b16 %v791_v48  ;;  %v787_v4 = vpack.c.bf16 %v783_v3, %v783_v3 }
 0x242   : > { %v4265_v51 = vpack.c.b16 %v846_v49, %v846_v49 }
 0x244   : > { %872 = vrot.lane.b32.xlu2 %v4263_v50, %s4045_s17  ;;  %848 = vrot.lane.b32.xlu0 %v4265_v51, %s4045_s17 }
 0x245   : > { %v800_v52 = vpop.permute.xlu1 %799 }
 0x246   : > { %v806_v53 = vsel %vm801_vm6, %v800_v52, 0 }
 0x247   : > { %815 = vmatpush.bf16.xpose.msra.mxu1 %v806_v53 }
 0x24e   : > { %3086 = vmatmul.msk.bf16.vlgmr.msra.gmra.mxu1 %vm801_vm6, %v785_v55 }
 0x296   : > { %v825_v56 = vpop.permute.xlu2 %824 }
 0x297   : > { %v830_v57 = vsel %vm801_vm6, %v825_v56, 0 }
 0x298   : > { %839 = vmatpush.bf16.xpose.msra.mxu2 %v830_v57 }
 0x29e   : > { %v873_v60 = vpop.permute.xlu2 %872 }
 0x29f   : > { %3087 = vmatmul.msk.bf16.vlgmr.msra.gmra.mxu2 %vm801_vm6, %v786_v59  ;;  %v878_v61 = vsel %vm801_vm6, %v873_v60, 0 }
 0x2a0   : > { %887 = vmatpush.bf16.xpose.msrb.mxu0 %v878_v61 }
 0x2a7   : > { %3089 = vmatmul.msk.bf16.vlgmr.msrb.gmra.mxu0 %vm801_vm6, %v788_v63 }
 0x2b6   : > { %v849_v0 = vpop.permute.xlu0 %848 }
 0x2b7   : > { %v854_v2 = vsel %vm801_vm6, %v849_v0, 0 }
 0x2b8   : > { %863 = vmatpush.bf16.xpose.msra.mxu3 %v854_v2 }
 0x2bf   : > { %3088 = vmatmul.msk.bf16.vlgmr.msra.gmra.mxu3 %vm801_vm6, %v787_v4  ;;  %v3095_v4 = vld [vmem:[%s4189_s0 + $0x4] sm:$0xf] }
 0x2cb   : > { %v817_v6 = vpop.f32.mrf.mxu1 }
 0x2cc   : > { %v818_v7 = vadd.f32 %v3974_v5, %v817_v6  ;;  %v3097_v6 = vld [vmem:[%s4189_s0 + $0x8] sm:$0xf] }
 0x2ce   : > { %v893_v8 = vsel %vm801_vm6, %v818_v7, -inf }
 0x2cf   : > { %894 = vmax.xlane.f32.xlu0 %v893_v8  ;;  %v1082_v8 = vsel %vm946_vm7, %v3097_v6, 0  ;;  %v3183_v6 = vld [vmem:[%s4212_s6 + $0x90] sm:$0xf] }
 0x2d3   : > { %v819_v10 = vpop.f32.mrf.mxu1 }
 0x2d4   : > { %v3099_v10 = vld [vmem:[%s4189_s0 + $0xc] sm:$0xf] }
 0x322   : > { %v841_v11 = vpop.f32.mrf.mxu2 }
 0x323   : > { %v842_v12 = vadd.f32 %v3974_v5, %v841_v11 }
 0x324   : > { %v889_v13 = vpop.f32.mrf.mxu0 }
 0x325   : > { %v896_v14 = vsel %vm801_vm6, %v842_v12, -inf  ;;  %v890_v23 = vadd.f32 %v3974_v5, %v889_v13 }
 0x326   : > { %897 = vmax.xlane.f32.xlu1 %v896_v14  ;;  %v1028_v14 = vld [vmem:[%s4189_s0] sm:$0xf] }
 0x327   : > { %v902_v26 = vsel %vm801_vm6, %v890_v23, -inf }
 0x32a   : > { %v843_v15 = vpop.f32.mrf.mxu2 }
 0x32b   : > { %v1033_v15 = vsel %vm946_vm7, %v1028_v14, 0  ;;  %v3792_v14 = vld [vmem:[%s4212_s6 + $0xd4] sm:$0xf0] }
 0x32c   : > { %v891_v16 = vpop.f32.mrf.mxu0 }
 0x33f   : > { %963 = vrot.lane.b32.xlu1 %v823_v45, %s4046_s1 }
 0x342   : > { %v865_v17 = vpop.f32.mrf.mxu3  ;;  %v895_v18 = vpop.xlane.xlu0 %894 }
 0x343   : > { %v866_v19 = vadd.f32 %v3974_v5, %v865_v17  ;;  %v905_v20 = vsub.f32 %v818_v7, %v895_v18  ;;  %v1059_v5 = vsel %vm946_vm7, %v3095_v4, 0 }
 0x345   : > { %v909_v21 = vmul.f32 1.442695, %v905_v20  ;;  %v899_v22 = vsel %vm801_vm6, %v866_v19, -inf }
 0x346   : > { %900 = vmax.xlane.f32.xlu2 %v899_v22 }
 0x347   : > { %3983 = vpow2.f32 %v909_v21 }
 0x34a   : > { %v867_v24 = vpop.f32.mrf.mxu3 }
 0x34d   : > { %v3984_v25 = vpop.eup %3983 }
 0x34e   : > { %903 = vmax.xlane.f32.xlu2 %v902_v26  ;;  %v917_v27 = vsel %vm801_vm6, %v3984_v25, 0.0 }
 0x34f   : > { %918 = vadd.xlane.f32.xlu0 %v917_v27 }
 0x399   : > { %v898_v28 = vpop.xlane.xlu1 %897 }
 0x39a   : > { %v906_v29 = vsub.f32 %v842_v12, %v898_v28  ;;  %v1105_v12 = vsel %vm946_vm7, %v3099_v10, 0 }
 0x39c   : > { %v911_v30 = vmul.f32 1.442695, %v906_v29 }
 0x39e   : > { %3985 = vpow2.f32 %v911_v30  ;;  %v3975_v30 = vld [vmem:[%s4666_s8] ss:$0 sm:$0xff] }
 0x3a4   : > { %v3986_v31 = vpop.eup %3985 }
 0x3a5   : > { %v920_v32 = vsel %vm801_vm6, %v3986_v31, 0.0 }
 0x3a6   : > { %921 = vadd.xlane.f32.xlu1 %v920_v32 }
 0x3b1   : > { %v964_v33 = vpop.permute.xlu1 %963 }
 0x3b2   : > { %v969_v34 = vsel %vm946_vm7, %v964_v33, 0 }
 0x3b3   : > { %978 = vmatpush.bf16.msrb.mxu2 %v969_v34 }
 0x3b7   : > { %1068 = vmatpush.bf16.msra.mxu2 %v1059_v5 }
 0x3b9   : > { %v901_v35 = vpop.xlane.xlu2 %900 }
 0x3ba   : > { %v907_v36 = vsub.f32 %v866_v19, %v901_v35 }
 0x3bc   : > { %v913_v37 = vmul.f32 1.442695, %v907_v36 }
 0x3be   : > { %3987 = vpow2.f32 %v913_v37 }
 0x3bf   : > { %1005 = vrot.lane.b32.xlu1 %v4263_v50, %s4046_s1 }
 0x3c1   : > { %v904_v38 = vpop.xlane.xlu2 %903 }
 0x3c2   : > { %v908_v40 = vsub.f32 %v890_v23, %v904_v38  ;;  %v919_v53 = vpop.xlane.xlu0 %918 }
 0x3c4   : > { %v3988_v41 = vpop.eup %3987  ;;  %v915_v42 = vmul.f32 1.442695, %v908_v40 }
 0x3c5   : > { %v923_v43 = vsel %vm801_vm6, %v3988_v41, 0.0 }
 0x3c6   : > { %3989 = vpow2.f32 %v915_v42  ;;  %924 = vadd.xlane.f32.xlu2 %v923_v43 }
 0x3cc   : > { %v3990_v44 = vpop.eup %3989 }
 0x3cd   : > { %v926_v45 = vsel %vm801_vm6, %v3990_v44, 0.0 }
 0x3ce   : > { %927 = vadd.xlane.f32.xlu0 %v926_v45 }
 0x3de   : > { %984 = vrot.lane.b32.xlu2 %v4265_v51, %s4046_s1 }
 0x3e2   : > { %941 = vrot.lane.b32.xlu0 %v4260_v39, %s4046_s1 }
 0x419   : > { %v922_v46 = vpop.xlane.xlu1 %921 }
 0x41a   : > { %3991 = vrcp.f32 %v922_v46  ;;  %v3789_v46 = vld [vmem:[%s4212_s6 + $0xbc] sm:$0xf0] }
 0x420   : > { %v3992_v47 = vpop.eup %3991 }
 0x421   : > { %v934_v48 = vmul.f32 %v3992_v47, %v3986_v31  ;;  %v3781_v47 = vld [vmem:[%s4212_s6 + $0x84] sm:$0xf] }
 0x423   : > { %v938_v49 = vpack.c.bf16 %v934_v48, %v934_v48 }
 0x425   : > { %3091 = vmatmul.msk.bf16.vlgmr.msrb.gmra.mxu2 %vm801_vm6, %v938_v49  ;;  %v3169_v49 = vld [vmem:[%s4212_s6 + $0xc0] sm:$0xf0] }
 0x431   : > { %v1006_v50 = vpop.permute.xlu1 %1005 }
 0x432   : > { %v1011_v52 = vsel %vm946_vm7, %v1006_v50, 0  ;;  %v3175_v50 = vld [vmem:[%s4212_s6 + $0x88] sm:$0xf] }
 0x433   : > { %1020 = vmatpush.bf16.msra.mxu0 %v1011_v52  ;;  %v3790_v52 = vld [vmem:[%s4212_s6 + $0xc4] sm:$0xf0] }
 0x437   : > { %1114 = vmatpush.bf16.msrb.mxu0 %v1105_v12  ;;  %v3185_v12 = vld [vmem:[%s4212_s6 + $0xd0] sm:$0xf0] }
 0x439   : > { %v925_v54 = vpop.xlane.xlu2 %924 }
 0x43a   : > { %3993 = vrcp.f32 %v925_v54  ;;  %v3176_v54 = vor.u32 %v3790_v52, %v3175_v50  ;;  %v3794_v52 = vld [vmem:[%s4212_s6 + $0xe4] sm:$0xf0] }
 0x440   : > { %v3994_v55 = vpop.eup %3993 }
 0x441   : > { %v935_v56 = vmul.f32 %v3994_v55, %v3988_v41  ;;  %v985_v51 = vpop.permute.xlu2 %984  ;;  %v928_v57 = vpop.xlane.xlu0 %927  ;;  %v3782_v55 = vld [vmem:[%s4212_s6 + $0x8c] sm:$0xf] }
 0x442   : > { %3995 = vrcp.f32 %v928_v57  ;;  %v990_v39 = vsel %vm946_vm7, %v985_v51, 0  ;;  %v3103_v57 = vld [vmem:[%s4212_s6] sm:$0xf] }
 0x443   : > { %999 = vmatpush.bf16.msrb.mxu3 %v990_v39  ;;  %v939_v58 = vpack.c.bf16 %v935_v56, %v935_v56  ;;  %3997 = vrcp.f32 %v919_v53  ;;  %v3172_v53 = vor.u32 %v3781_v47, %v3169_v49  ;;  %v3177_v56 = vld [vmem:[%s4212_s6 + $0xc8] sm:$0xf0]  ;;  %v3773_v39 = vld [vmem:[%s4212_s6 + $0x3c] sm:$0xf0]  ;;  %v3785_v47 = vld [vmem:[%s4212_s6 + $0xa4] sm:$0xf] }
 0x444   : > { %v3180_v51 = vor.u32 %v3782_v55, %v3177_v56  ;;  %v3207_v49 = vld [vmem:[%s4212_s6 + $0xa8] sm:$0xf] }
 0x445   : > { %1405 = vmatpush.bf16.msrb.mxu2 %v3172_v53  ;;  %v3786_v53 = vld [vmem:[%s4212_s6 + $0xac] sm:$0xf] }
 0x446   : > { %3092 = vmatmul.msk.bf16.vlgmr.msrb.gmra.mxu3 %vm801_vm6, %v939_v58  ;;  %v3765_v58 = vld [vmem:[%s4212_s6 + $0x4] sm:$0xf] }
 0x447   : > { %1091 = vmatpush.bf16.msra.mxu3 %v1082_v8  ;;  %v3783_v8 = vld [vmem:[%s4212_s6 + $0x94] sm:$0xf] }
 0x448   : > { %v3996_v59 = vpop.eup %3995 }
 0x449   : > { %v936_v60 = vmul.f32 %v3996_v59, %v3990_v44  ;;  %v3998_v62 = vpop.eup %3997  ;;  %v3104_v59 = vor.u32 %v3773_v39, %v3103_v57  ;;  %v3777_v57 = vld [vmem:[%s4212_s6 + $0x5c] sm:$0xf0]  ;;  %v3208_v39 = vor.u32 %v3794_v52, %v3207_v49  ;;  %v3824_v49 = vld [vmem:[%s4218_s16 + $0xd8] sm:$0xff] }
 0x44a   : > { %v933_v63 = vmul.f32 %v3998_v62, %v3984_v25  ;;  %v3774_v62 = vld [vmem:[%s4212_s6 + $0x44] sm:$0xf0]  ;;  %v3816_v52 = vld [vmem:[%s4218_s16 + $0x98] sm:$0xff] }
 0x44b   : > { %v940_v61 = vpack.c.bf16 %v936_v60, %v936_v60  ;;  %1418 = vmatpush.bf16.msrb.mxu3 %v3176_v54  ;;  %v3105_v60 = vld [vmem:[%s4212_s6 + $0x40] sm:$0xf0]  ;;  %v3209_v54 = vld [vmem:[%s4212_s6 + $0xe8] sm:$0xf0] }
 0x44c   : > { %v937_v3 = vpack.c.bf16 %v933_v63, %v933_v63  ;;  %v3108_v63 = vor.u32 %v3765_v58, %v3105_v60  ;;  %v3212_v58 = vor.u32 %v3786_v53, %v3209_v54  ;;  %v3137_v60 = vld [vmem:[%s4212_s6 + $0x60] sm:$0xf0]  ;;  %v3799_v53 = vld [vmem:[%s4218_s16 + $0x10] sm:$0xff] }
 0x44d   : > { %3093 = vmatmul.msk.bf16.vlgmr.msra.gmra.mxu0 %vm801_vm6, %v940_v61  ;;  %v3111_v61 = vld [vmem:[%s4212_s6 + $0x8] sm:$0xf]  ;;  %v3823_v54 = vld [vmem:[%s4218_s16 + $0xd0] sm:$0xff] }
 0x44e   : > { %1431 = vmatpush.bf16.msra.mxu0 %v3180_v51  ;;  %1406 = vmatpush.bf16.msrb.mxu2 %v3108_v63  ;;  %v3135_v51 = vld [vmem:[%s4212_s6 + $0x20] sm:$0xf]  ;;  %v3770_v63 = vld [vmem:[%s4212_s6 + $0x2c] sm:$0xf] }
 0x454   : > { %v942_v0 = vpop.permute.xlu0 %941 }
 0x455   : > { %v948_v2 = vsel %vm946_vm7, %v942_v0, 0  ;;  %v3112_v0 = vor.u32 %v3774_v62, %v3111_v61  ;;  %v3143_v61 = vld [vmem:[%s4212_s6 + $0x28] sm:$0xf] }
 0x456   : > { %957 = vmatpush.bf16.msrb.mxu1 %v948_v2  ;;  %v3766_v2 = vld [vmem:[%s4212_s6 + $0xc] sm:$0xf]  ;;  %v3778_v62 = vld [vmem:[%s4212_s6 + $0x64] sm:$0xf0] }
 0x457   : > { %1419 = vmatpush.bf16.msrb.mxu3 %v3112_v0  ;;  %v3145_v0 = vld [vmem:[%s4212_s6 + $0x68] sm:$0xf0] }
 0x459   : > { %3090 = vmatmul.msk.bf16.vlgmr.msrb.gmra.mxu1 %vm801_vm6, %v937_v3  ;;  %v3113_v3 = vld [vmem:[%s4212_s6 + $0x48] sm:$0xf0] }
 0x45a   : > { %1042 = vmatpush.bf16.msra.mxu1 %v1033_v15  ;;  %v3116_v4 = vor.u32 %v3766_v2, %v3113_v3  ;;  %v3188_v15 = vor.u32 %v3783_v8, %v3185_v12  ;;  %v3136_v2 = vor.u32 %v3777_v57, %v3135_v51  ;;  %v3787_v8 = vld [vmem:[%s4212_s6 + $0xb4] sm:$0xf]  ;;  %v3796_v12 = vld [vmem:[%s4212_s6 + $0xf4] sm:$0xf0]  ;;  %v3798_v51 = vld [vmem:[%s4218_s16 + $0x8] sm:$0xff] }
 0x45b   : > { %v3806_v57 = vld [vmem:[%s4218_s16 + $0x48] sm:$0xff] }
 0x45c   : > { %1432 = vmatpush.bf16.msra.mxu0 %v3116_v4  ;;  %v3144_v4 = vor.u32 %v3778_v62, %v3143_v61  ;;  %v3860_v61 = vld [vmem:[%s4218_s16 + $0x1f8] sm:$0xff]  ;;  %v3805_v62 = vld [vmem:[%s4218_s16 + $0x40] sm:$0xff] }
 0x4a8   : > { %v980_v7 = vpop.f32.mrf.mxu2 }
 0x4a9   : > { %v1052_v11 = vpack.c.bf16 %v980_v7, %v980_v7  ;;  %v3791_v7 = vld [vmem:[%s4212_s6 + $0xcc] sm:$0xf0] }
 0x4ab   : > { %3096 = vmatmul.msk.bf16.vlgmr.msra.gmra.mxu2 %vm801_vm6, %v1052_v11  ;;  %v3184_v11 = vor.u32 %v3791_v7, %v3183_v6  ;;  %v3215_v6 = vld [vmem:[%s4212_s6 + $0xb0] sm:$0xf] }
 0x4ac   : > { %1457 = vmatpush.bf16.msra.mxu2 %v3188_v15  ;;  %v3795_v7 = vld [vmem:[%s4212_s6 + $0xec] sm:$0xf0] }
 0x4ad   : > { %v3216_v15 = vor.u32 %v3795_v7, %v3215_v6  ;;  %v3851_v6 = vld [vmem:[%s4218_s16 + $0x1b0] sm:$0xff]  ;;  %v3834_v7 = vld [vmem:[%s4218_s16 + $0x128] sm:$0xff] }
 0x4b0   : > { %v982_v13 = vpop.f32.mrf.mxu2 }
 0x4b1   : > { %v3191_v13 = vld [vmem:[%s4212_s6 + $0x98] sm:$0xf] }
 0x4c9   : > { %v1001_v16 = vpop.f32.mrf.mxu3 }
 0x4ca   : > { %v1075_v17 = vpack.c.bf16 %v1001_v16, %v1001_v16  ;;  %v1022_v18 = vpop.f32.mrf.mxu0  ;;  %v3192_v16 = vor.u32 %v3792_v14, %v3191_v13  ;;  %v3788_v13 = vld [vmem:[%s4212_s6 + $0xbc] sm:$0xf] }
 0x4cb   : > { %v1098_v19 = vpack.c.bf16 %v1022_v18, %v1022_v18  ;;  %v3193_v18 = vld [vmem:[%s4212_s6 + $0xd8] sm:$0xf0] }
 0x4cc   : > { %3098 = vmatmul.msk.bf16.vlgmr.msra.gmra.mxu3 %vm801_vm6, %v1075_v17  ;;  %v3784_v17 = vld [vmem:[%s4212_s6 + $0x9c] sm:$0xf] }
 0x4cd   : > { %3100 = vmatmul.msk.bf16.vlgmr.msrb.gmra.mxu0 %vm801_vm6, %v1098_v19  ;;  %v3119_v19 = vld [vmem:[%s4212_s6 + $0x10] sm:$0xf]  ;;  %1470 = vmatpush.bf16.msra.mxu3 %v3192_v16  ;;  %v3225_v14 = vld [vmem:[%s4212_s6 + $0xf8] sm:$0xf0] }
 0x4d1   : > { %v1003_v20 = vpop.f32.mrf.mxu3 }
 0x4d2   : > { %v1024_v21 = vpop.f32.mrf.mxu0 }
 0x4d3   : > { %v3196_v21 = vor.u32 %v3784_v17, %v3193_v18  ;;  %v3151_v17 = vld [vmem:[%s4212_s6 + $0x30] sm:$0xf] }
 0x4d4   : > { %v3779_v18 = vld [vmem:[%s4212_s6 + $0x6c] sm:$0xf0] }
 0x4d5   : > { %1483 = vmatpush.bf16.msrb.mxu0 %v3196_v21  ;;  %v3771_v21 = vld [vmem:[%s4212_s6 + $0x34] sm:$0xf] }
 0x4d6   : > { %v959_v22 = vpop.f32.mrf.mxu1 }
 0x4d7   : > { %v1027_v23 = vpack.c.bf16 %v959_v22, %v959_v22  ;;  %v3775_v22 = vld [vmem:[%s4212_s6 + $0x4c] sm:$0xf0] }
 0x4d9   : > { %3094 = vmatmul.msk.bf16.vlgmr.msra.gmra.mxu1 %vm801_vm6, %v1027_v23  ;;  %v3767_v23 = vld [vmem:[%s4212_s6 + $0x14] sm:$0xf] }
 0x4de   : > { %v961_v24 = vpop.f32.mrf.mxu1 }
 0x4df   : > { %v3121_v24 = vld [vmem:[%s4212_s6 + $0x50] sm:$0xf0] }
 0x52e   : > { %v1070_v25 = vpop.f32.mrf.mxu2 }
 0x536   : > { %v1072_v26 = vpop.f32.mrf.mxu2 }
 0x537   : > { %v3776_v26 = vld [vmem:[%s4212_s6 + $0x54] sm:$0xf0] }
 0x54a   : > { %v1116_v27 = vpop.f32.mrf.mxu0 }
 0x54f   : > { %v1093_v28 = vpop.f32.mrf.mxu3 }
 0x552   : > { %v1118_v29 = vpop.f32.mrf.mxu0 }
 0x553   : > { %v3768_v29 = vld [vmem:[%s4212_s6 + $0x1c] sm:$0xf] }
 0x556   : > { %v1044_v31 = vpop.f32.mrf.mxu1 }
 0x557   : > { %v1051_v32 = vadd.f32 %v3975_v30, %v1044_v31  ;;  %v1095_v33 = vpop.f32.mrf.mxu3  ;;  %v3129_v30 = vld [vmem:[%s4212_s6 + $0x58] sm:$0xf0] }
 0x558   : > { %v3132_v31 = vor.u32 %v3768_v29, %v3129_v30  ;;  %v3804_v30 = vld [vmem:[%s4218_s16 + $0x38] sm:$0xff] }
 0x559   : > { %v1074_v34 = vadd.f32 %v1070_v25, %v1051_v32  ;;  %v3127_v25 = vld [vmem:[%s4212_s6 + $0x18] sm:$0xf] }
 0x55a   : > { %1484 = vmatpush.bf16.msrb.mxu0 %v3132_v31  ;;  %v3828_v31 = vld [vmem:[%s4218_s16 + $0xf8] sm:$0xff] }
 0x55b   : > { %v1097_v35 = vadd.f32 %v1093_v28, %v1074_v34  ;;  %v3128_v28 = vor.u32 %v3776_v26, %v3127_v25  ;;  %v3161_v25 = vld [vmem:[%s4212_s6 + $0x78] sm:$0xf0]  ;;  %v3152_v26 = vor.u32 %v3779_v18, %v3151_v17  ;;  %v3831_v18 = vld [vmem:[%s4218_s16 + $0x110] sm:$0xff] }
 0x55c   : > { %v3856_v17 = vld [vmem:[%s4218_s16 + $0x1d8] sm:$0xff] }
 0x55d   : > { %v1120_v36 = vadd.f32 %v1116_v27, %v1097_v35  ;;  %v3124_v27 = vor.u32 %v3767_v23, %v3121_v24  ;;  %1471 = vmatpush.bf16.msra.mxu3 %v3128_v28  ;;  %v3159_v23 = vld [vmem:[%s4212_s6 + $0x38] sm:$0xf]  ;;  %v3772_v24 = vld [vmem:[%s4212_s6 + $0x3c] sm:$0xf] }
 0x55e   : > { %v1046_v37 = vpop.f32.mrf.mxu1  ;;  %v3164_v29 = vor.u32 %v3772_v24, %v3161_v25  ;;  %v3847_v24 = vld [vmem:[%s4218_s16 + $0x190] sm:$0xff]  ;;  %v3829_v25 = vld [vmem:[%s4218_s16 + $0x100] sm:$0xff] }
 0x55f   : > { %v4323_v38 = vadd.f32 %v1120_v36, %v4232_v1  ;;  %v3167_v1 = vld [vmem:[%s4212_s6 + $0x80] sm:$0xf]  ;;  %1458 = vmatpush.bf16.msra.mxu2 %v3124_v27 }
 0x560   : > { %v3168_v48 = vor.u32 %v3789_v46, %v3167_v1  ;;  %v3199_v1 = vld [vmem:[%s4212_s6 + $0xa0] sm:$0xf] }
 0x561   : > { %v1124_v40 = vsel %vm696_vm1, %v4323_v38, 0.0  ;;  %v3793_v46 = vld [vmem:[%s4212_s6 + $0xdc] sm:$0xf0] }
 0x562   : > { %1125 = vadd.xlane.f32.xlu2 %v1124_v40  ;;  %1392 = vmatpush.bf16.msrb.mxu1 %v3168_v48  ;;  %v3976_v40 = vld [vmem:[%s4668_s21] ss:$0 sm:$0xff]  ;;  %v3201_v48 = vld [vmem:[%s4212_s6 + $0xe0] sm:$0xf0]  ;;  %v3200_v56 = vor.u32 %v3793_v46, %v3199_v1 }
 0x563   : > { %v3825_v1 = vld [vmem:[%s4218_s16 + $0xe0] sm:$0xff] }
 0x564   : > { %v3809_v46 = vld [vmem:[%s4218_s16 + $0x60] sm:$0xff] }
 0x566   : > { %1393 = vmatpush.bf16.msrb.mxu1 %v3104_v59  ;;  %v3769_v59 = vld [vmem:[%s4212_s6 + $0x24] sm:$0xf] }
 0x567   : > { %v3140_v3 = vor.u32 %v3769_v59, %v3137_v60  ;;  %v3821_v59 = vld [vmem:[%s4218_s16 + $0xc0] sm:$0xff]  ;;  %v3836_v60 = vld [vmem:[%s4218_s16 + $0x138] sm:$0xff] }
 0x56a   : > { %1444 = vmatpush.bf16.msra.mxu1 %v3184_v11  ;;  %v3223_v11 = vld [vmem:[%s4212_s6 + $0xb8] sm:$0xf] }
 0x5d5   : > { %v1126_v41 = vpop.xlane.xlu2 %1125 }
 0x5d6   : > { %v1127_v42 = vmul.f32 %v1126_v41, %v4236_v9 }
 0x5d8   : > { %v4329_v43 = vsub.f32 %v4323_v38, %v1127_v42  ;;  %v3977_v42 = vld [vmem:[%s4670_s26] ss:$0 sm:$0xff] }
 0x5da   : > { %v1129_v44 = vmul.f32 %v4329_v43, %v4329_v43 }
 0x5dc   : > { %v1130_v45 = vsel %vm696_vm1, %v1129_v44, 0.0 }
 0x5dd   : > { %1131 = vadd.xlane.f32.xlu1 %v1130_v45 }
 0x650   : > { %v1132_v5 = vpop.xlane.xlu1 %1131 }
 0x651   : > { %v1133_v10 = vmul.f32 %v1132_v5, %v4236_v9  ;;  %v3120_v9 = vor.u32 %v3775_v22, %v3119_v19  ;;  %v3148_v5 = vor.u32 %v3770_v63, %v3145_v0  ;;  %v3224_v19 = vor.u32 %v3796_v12, %v3223_v11  ;;  %v3153_v22 = vld [vmem:[%s4212_s6 + $0x70] sm:$0xf0]  ;;  %v3813_v63 = vld [vmem:[%s4218_s16 + $0x80] sm:$0xff]  ;;  %v3844_v0 = vld [vmem:[%s4218_s16 + $0x178] sm:$0xff] }
 0x652   : > { %v3156_v27 = vor.u32 %v3771_v21, %v3153_v22  ;;  %v3850_v11 = vld [vmem:[%s4218_s16 + $0x1a8] sm:$0xff]  ;;  %v3833_v12 = vld [vmem:[%s4218_s16 + $0x120] sm:$0xff]  ;;  %v3848_v21 = vld [vmem:[%s4218_s16 + $0x198] sm:$0xff] }
 0x653   : > { %v1134_v20 = vadd.f32 1e-05, %v1133_v10  ;;  %1445 = vmatpush.bf16.msra.mxu1 %v3120_v9  ;;  %v3217_v10 = vld [vmem:[%s4212_s6 + $0xf0] sm:$0xf0]  ;;  %v3780_v9 = vld [vmem:[%s4212_s6 + $0x74] sm:$0xf0] }
 0x654   : > { %v3220_v16 = vor.u32 %v3787_v8, %v3217_v10  ;;  %v3160_v28 = vor.u32 %v3780_v9, %v3159_v23  ;;  %v3858_v8 = vld [vmem:[%s4218_s16 + $0x1e8] sm:$0xff]  ;;  %v3839_v9 = vld [vmem:[%s4218_s16 + $0x150] sm:$0xff] }
 0x655   : > { %3999 = vrsqrt.f32 %v1134_v20  ;;  %vm1141_vm9 = vweird.f32 %v1134_v20  ;;  %v3842_v10 = vld [vmem:[%s4218_s16 + $0x168] sm:$0xff] }
 0x656   : > { %v3830_v22 = vld [vmem:[%s4218_s16 + $0x108] sm:$0xff] }
 0x657   : > { %v3854_v23 = vld [vmem:[%s4218_s16 + $0x1c8] sm:$0xff] }
 0x65b   : > { %v4000_v32 = vpop.eup %3999 }
 0x65c   : > { %v1136_v33 = vmul.f32 %v4000_v32, %v1134_v20  ;;  %vm1142_vm8 = vweird.f32 %v4000_v32  ;;  %v3228_v20 = vor.u32 %v3788_v13, %v3225_v14  ;;  %v3857_v13 = vld [vmem:[%s4218_s16 + $0x1e0] sm:$0xff] }
 0x65d   : > { %vm1143_vm10 = vmor %vm1141_vm9, %vm1142_vm8  ;;  %v3841_v14 = vld [vmem:[%s4218_s16 + $0x160] sm:$0xff] }
 0x65e   : > { %v1137_v34 = vmul.f32 %v4000_v32, %v1136_v33  ;;  %v3820_v33 = vld [vmem:[%s4218_s16 + $0xb8] sm:$0xff] }
 0x660   : > { %v1138_v35 = vmul.f32 0.5, %v1137_v34  ;;  %v3803_v34 = vld [vmem:[%s4218_s16 + $0x30] sm:$0xff] }
 0x662   : > { %v1139_v36 = vsub.f32 1.5, %v1138_v35  ;;  %v3827_v35 = vld [vmem:[%s4218_s16 + $0xf0] sm:$0xff] }
 0x664   : > { %v1140_v37 = vmul.f32 %v4000_v32, %v1139_v36  ;;  %v3811_v36 = vld [vmem:[%s4218_s16 + $0x70] sm:$0xff] }
 0x666   : > { %v1144_v41 = vsel %vm1143_vm10, %v4000_v32, %v1140_v37  ;;  %v3812_v32 = vld [vmem:[%s4218_s16 + $0x78] sm:$0xff]  ;;  %v3819_v37 = vld [vmem:[%s4218_s16 + $0xb0] sm:$0xff] }
 0x667   : > { %v1145_v44 = vmul.f32 %v1144_v41, %v4329_v43  ;;  %v3204_v43 = vor.u32 %v3785_v47, %v3201_v48  ;;  %v3826_v41 = vld [vmem:[%s4218_s16 + $0xe8] sm:$0xff]  ;;  %v3817_v47 = vld [vmem:[%s4218_s16 + $0xa0] sm:$0xff]  ;;  %v3800_v48 = vld [vmem:[%s4218_s16 + $0x18] sm:$0xff] }
 0x669   : > { %v1149_v45 = vmul.f32 %v3976_v40, %v1145_v44  ;;  %v3802_v40 = vld [vmem:[%s4218_s16 + $0x28] sm:$0xff] }
 0x66a   : > { %v3818_v44 = vld [vmem:[%s4218_s16 + $0xa8] sm:$0xff] }
 0x66b   : > { %v1153_v50 = vadd.f32 %v3977_v42, %v1149_v45  ;;  %v3810_v42 = vld [vmem:[%s4218_s16 + $0x68] sm:$0xff]  ;;  %v3801_v45 = vld [vmem:[%s4218_s16 + $0x20] sm:$0xff] }
 0x66d   : > { %v4386_v55 = vpack.c.bf16 %v1153_v50, %v1153_v50  ;;  %v3808_v50 = vld [vmem:[%s4218_s16 + $0x58] sm:$0xff] }
 0x66f   : > { %3229 = vmatmul.msk.bf16.vlgmr.msrb.gmra.mxu1 %vm696_vm1, %v4386_v55  ;;  %3230 = vmatmul.msk.bf16.vlgmr.msrb.gmra.mxu2 %vm696_vm1, %v4386_v55 }
 0x670   : > { %3231 = vmatmul.msk.bf16.vlgmr.msrb.gmra.mxu3 %vm696_vm1, %v4386_v55  ;;  %3232 = vmatmul.msk.bf16.vlgmr.msra.gmra.mxu0 %vm696_vm1, %v4386_v55 }
 0x671   : > { %1496 = vmatpush.bf16.msrb.mxu1 %v3200_v56  ;;  %1509 = vmatpush.bf16.msrb.mxu2 %v3204_v43  ;;  %v3807_v56 = vld [vmem:[%s4218_s16 + $0x50] sm:$0xff] }
 0x672   : > { %1522 = vmatpush.bf16.msrb.mxu3 %v3208_v39  ;;  %1535 = vmatpush.bf16.msra.mxu0 %v3212_v58  ;;  %v3815_v43 = vld [vmem:[%s4218_s16 + $0x90] sm:$0xff]  ;;  %v3814_v39 = vld [vmem:[%s4218_s16 + $0x88] sm:$0xff]  ;;  %v3797_v58 = vld [vmem:[%s4218_s16] sm:$0xff] }
 0x675   : > { %1497 = vmatpush.bf16.msrb.mxu1 %v3136_v2  ;;  %1510 = vmatpush.bf16.msrb.mxu2 %v3140_v3  ;;  %v3852_v2 = vld [vmem:[%s4218_s16 + $0x1b8] sm:$0xff]  ;;  %v3835_v3 = vld [vmem:[%s4218_s16 + $0x130] sm:$0xff] }
 0x676   : > { %1523 = vmatpush.bf16.msrb.mxu3 %v3144_v4  ;;  %1536 = vmatpush.bf16.msra.mxu0 %v3148_v5  ;;  %v3859_v4 = vld [vmem:[%s4218_s16 + $0x1f0] sm:$0xff] }
 0x677   : > { %v3843_v5 = vld [vmem:[%s4218_s16 + $0x170] sm:$0xff] }
 0x67f   : > { %3233 = vmatmul.msk.bf16.vlgmr.msra.gmra.mxu1 %vm696_vm1, %v4386_v55  ;;  %3234 = vmatmul.msk.bf16.vlgmr.msra.gmra.mxu2 %vm696_vm1, %v4386_v55 }
 0x680   : > { %3235 = vmatmul.msk.bf16.vlgmr.msra.gmra.mxu3 %vm696_vm1, %v4386_v55  ;;  %3236 = vmatmul.msk.bf16.vlgmr.msrb.gmra.mxu0 %vm696_vm1, %v4386_v55 }
 0x681   : > { %1548 = vmatpush.bf16.msra.mxu1 %v3216_v15  ;;  %1561 = vmatpush.bf16.msra.mxu2 %v3220_v16  ;;  %v3849_v15 = vld [vmem:[%s4218_s16 + $0x1a0] sm:$0xff]  ;;  %v3832_v16 = vld [vmem:[%s4218_s16 + $0x118] sm:$0xff] }
 0x682   : > { %1574 = vmatpush.bf16.msra.mxu3 %v3224_v19  ;;  %1587 = vmatpush.bf16.msrb.mxu0 %v3228_v20  ;;  %v3855_v19 = vld [vmem:[%s4218_s16 + $0x1d0] sm:$0xff]  ;;  %v3840_v20 = vld [vmem:[%s4218_s16 + $0x158] sm:$0xff] }
 0x685   : > { %1549 = vmatpush.bf16.msra.mxu1 %v3152_v26  ;;  %1562 = vmatpush.bf16.msra.mxu2 %v3156_v27  ;;  %v3853_v26 = vld [vmem:[%s4218_s16 + $0x1c0] sm:$0xff]  ;;  %v3838_v27 = vld [vmem:[%s4218_s16 + $0x148] sm:$0xff] }
 0x686   : > { %1575 = vmatpush.bf16.msra.mxu3 %v3160_v28  ;;  %1588 = vmatpush.bf16.msrb.mxu0 %v3164_v29  ;;  %v3846_v28 = vld [vmem:[%s4218_s16 + $0x188] sm:$0xff]  ;;  %v3837_v29 = vld [vmem:[%s4218_s16 + $0x140] sm:$0xff] }
 0x68f   : > { %3237 = vmatmul.msk.bf16.vlgmr.msrb.gmra.mxu1 %vm696_vm1, %v4386_v55  ;;  %3238 = vmatmul.msk.bf16.vlgmr.msrb.gmra.mxu2 %vm696_vm1, %v4386_v55 }
 0x690   : > { %3239 = vmatmul.msk.bf16.vlgmr.msrb.gmra.mxu3 %vm696_vm1, %v4386_v55  ;;  %3240 = vmatmul.msk.bf16.vlgmr.msra.gmra.mxu0 %vm696_vm1, %v4386_v55 }
 0x691   : > { %2654 = vmatpush.bf16.msrb.mxu1 %v3804_v30  ;;  %2693 = vmatpush.bf16.msra.mxu0 %v3828_v31  ;;  %v3845_v30 = vld [vmem:[%s4218_s16 + $0x180] sm:$0xff] }
 0x692   : > { %2667 = vmatpush.bf16.msrb.mxu2 %v3812_v32  ;;  %2680 = vmatpush.bf16.msrb.mxu3 %v3820_v33  ;;  %v4509_v31 = vld [vmem:[%s4207_s25] sm:$0xff] }
 0x693   : > { %v1191_v32 = vperm.slane %v4509_v31, 0  ;;  %v1194_v33 = vperm.slane %v4509_v31, 3 }
 0x695   : > { %2655 = vmatpush.bf16.msrb.mxu1 %v3803_v34  ;;  %2694 = vmatpush.bf16.msra.mxu0 %v3827_v35 }
 0x696   : > { %2668 = vmatpush.bf16.msrb.mxu2 %v3811_v36  ;;  %2681 = vmatpush.bf16.msrb.mxu3 %v3819_v37 }
 0x699   : > { %2656 = vmatpush.bf16.msrb.mxu1 %v3802_v40  ;;  %2695 = vmatpush.bf16.msra.mxu0 %v3826_v41  ;;  %v1192_v41 = vperm.slane %v4509_v31, 1 }
 0x69a   : > { %2669 = vmatpush.bf16.msrb.mxu2 %v3810_v42  ;;  %2682 = vmatpush.bf16.msrb.mxu3 %v3818_v44  ;;  %v1193_v44 = vperm.slane %v4509_v31, 2 }
 0x69d   : > { %2657 = vmatpush.bf16.msrb.mxu1 %v3801_v45  ;;  %2696 = vmatpush.bf16.msra.mxu0 %v3825_v1  ;;  %v3868_v45 = vld [vmem:[%s4218_s16 + $0x238] sm:$0xff] }
 0x69e   : > { %2670 = vmatpush.bf16.msrb.mxu2 %v3809_v46  ;;  %2683 = vmatpush.bf16.msrb.mxu3 %v3817_v47  ;;  %v3892_v46 = vld [vmem:[%s4218_s16 + $0x2f8] sm:$0xff] }
 0x69f   : > { %3241 = vmatmul.msk.bf16.vlgmr.msra.gmra.mxu1 %vm696_vm1, %v4386_v55  ;;  %3242 = vmatmul.msk.bf16.vlgmr.msra.gmra.mxu2 %vm696_vm1, %v4386_v55 }
 0x6a0   : > { %3243 = vmatmul.msk.bf16.vlgmr.msra.gmra.mxu3 %vm696_vm1, %v4386_v55  ;;  %3244 = vmatmul.msk.bf16.vlgmr.msrb.gmra.mxu0 %vm696_vm1, %v4386_v55  ;;  %v3822_v55 = vld [vmem:[%s4218_s16 + $0xc8] sm:$0xff] }
 0x6a1   : > { %2658 = vmatpush.bf16.msrb.mxu1 %v3800_v48  ;;  %2697 = vmatpush.bf16.msra.mxu0 %v3824_v49 }
 0x6a2   : > { %2671 = vmatpush.bf16.msrb.mxu2 %v3808_v50  ;;  %2684 = vmatpush.bf16.msrb.mxu3 %v3816_v52 }
 0x6a5   : > { %2659 = vmatpush.bf16.msrb.mxu1 %v3799_v53  ;;  %2698 = vmatpush.bf16.msra.mxu0 %v3823_v54  ;;  %v3867_v54 = vld [vmem:[%s4218_s16 + $0x230] sm:$0xff] }
 0x6a6   : > { %2672 = vmatpush.bf16.msrb.mxu2 %v3807_v56  ;;  %2685 = vmatpush.bf16.msrb.mxu3 %v3815_v43 }
 0x6a9   : > { %2660 = vmatpush.bf16.msrb.mxu1 %v3798_v51  ;;  %2699 = vmatpush.bf16.msra.mxu0 %v3822_v55  ;;  %v3891_v51 = vld [vmem:[%s4218_s16 + $0x2f0] sm:$0xff] }
 0x6aa   : > { %2673 = vmatpush.bf16.msrb.mxu2 %v3806_v57  ;;  %2686 = vmatpush.bf16.msrb.mxu3 %v3814_v39  ;;  %v3876_v57 = vld [vmem:[%s4218_s16 + $0x278] sm:$0xff] }
 0x6ad   : > { %2661 = vmatpush.bf16.msrb.mxu1 %v3797_v58  ;;  %2700 = vmatpush.bf16.msra.mxu0 %v3821_v59  ;;  %v3884_v58 = vld [vmem:[%s4218_s16 + $0x2b8] sm:$0xff] }
 0x6ae   : > { %2674 = vmatpush.bf16.msrb.mxu2 %v3805_v62  ;;  %2687 = vmatpush.bf16.msrb.mxu3 %v3813_v63  ;;  %v1195_v62 = vperm.slane %v4509_v31, 4 }
 0x6b1   : > { %2706 = vmatpush.bf16.msra.mxu1 %v3836_v60  ;;  %2745 = vmatpush.bf16.msrb.mxu0 %v3860_v61  ;;  %v3866_v60 = vld [vmem:[%s4218_s16 + $0x228] sm:$0xff] }
 0x6b2   : > { %2719 = vmatpush.bf16.msra.mxu2 %v3844_v0  ;;  %2732 = vmatpush.bf16.msra.mxu3 %v3852_v2  ;;  %v3890_v61 = vld [vmem:[%s4218_s16 + $0x2e8] sm:$0xff]  ;;  %v1198_v0 = vperm.slane %v4509_v31, 7  ;;  %v3875_v2 = vld [vmem:[%s4218_s16 + $0x270] sm:$0xff] }
 0x6b5   : > { %2707 = vmatpush.bf16.msra.mxu1 %v3835_v3  ;;  %2746 = vmatpush.bf16.msrb.mxu0 %v3859_v4  ;;  %v3883_v4 = vld [vmem:[%s4218_s16 + $0x2b0] sm:$0xff] }
 0x6b6   : > { %2720 = vmatpush.bf16.msra.mxu2 %v3843_v5  ;;  %2733 = vmatpush.bf16.msra.mxu3 %v3851_v6  ;;  %v3865_v6 = vld [vmem:[%s4218_s16 + $0x220] sm:$0xff] }
 0x6b9   : > { %2708 = vmatpush.bf16.msra.mxu1 %v3834_v7  ;;  %2747 = vmatpush.bf16.msrb.mxu0 %v3858_v8 }
 0x6ba   : > { %2721 = vmatpush.bf16.msra.mxu2 %v3842_v10  ;;  %2734 = vmatpush.bf16.msra.mxu3 %v3850_v11  ;;  %v3889_v10 = vld [vmem:[%s4218_s16 + $0x2e0] sm:$0xff] }
 0x6bd   : > { %2709 = vmatpush.bf16.msra.mxu1 %v3833_v12  ;;  %2748 = vmatpush.bf16.msrb.mxu0 %v3857_v13  ;;  %v3874_v12 = vld [vmem:[%s4218_s16 + $0x268] sm:$0xff] }
 0x6be   : > { %2722 = vmatpush.bf16.msra.mxu2 %v3841_v14  ;;  %2735 = vmatpush.bf16.msra.mxu3 %v3849_v15  ;;  %v3882_v14 = vld [vmem:[%s4218_s16 + $0x2a8] sm:$0xff]  ;;  %v1196_v15 = vperm.slane %v4509_v31, 5 }
 0x6c1   : > { %2710 = vmatpush.bf16.msra.mxu1 %v3832_v16  ;;  %2749 = vmatpush.bf16.msrb.mxu0 %v3856_v17  ;;  %v1197_v17 = vperm.slane %v4509_v31, 6  ;;  %v3887_v31 = vld [vmem:[%s4218_s16 + $0x2d0] sm:$0xff] }
 0x6c2   : > { %2723 = vmatpush.bf16.msra.mxu2 %v3840_v20  ;;  %2736 = vmatpush.bf16.msra.mxu3 %v3848_v21  ;;  %v3888_v20 = vld [vmem:[%s4218_s16 + $0x2d8] sm:$0xff] }
 0x6c5   : > { %2711 = vmatpush.bf16.msra.mxu1 %v3831_v18  ;;  %2750 = vmatpush.bf16.msrb.mxu0 %v3855_v19  ;;  %v3864_v18 = vld [vmem:[%s4218_s16 + $0x218] sm:$0xff] }
 0x6c6   : > { %2724 = vmatpush.bf16.msra.mxu2 %v3839_v9  ;;  %2737 = vmatpush.bf16.msra.mxu3 %v3847_v24 }
 0x6c9   : > { %2712 = vmatpush.bf16.msra.mxu1 %v3830_v22  ;;  %2751 = vmatpush.bf16.msrb.mxu0 %v3854_v23  ;;  %v3873_v23 = vld [vmem:[%s4218_s16 + $0x260] sm:$0xff] }
 0x6ca   : > { %2725 = vmatpush.bf16.msra.mxu2 %v3838_v27  ;;  %2738 = vmatpush.bf16.msra.mxu3 %v3846_v28  ;;  %v3863_v28 = vld [vmem:[%s4218_s16 + $0x210] sm:$0xff] }
 0x6cd   : > { %2713 = vmatpush.bf16.msra.mxu1 %v3829_v25  ;;  %2752 = vmatpush.bf16.msrb.mxu0 %v3853_v26  ;;  %v3881_v25 = vld [vmem:[%s4218_s16 + $0x2a0] sm:$0xff] }
 0x6ce   : > { %2726 = vmatpush.bf16.msra.mxu2 %v3837_v29  ;;  %2739 = vmatpush.bf16.msra.mxu3 %v3845_v30 }
 0x6ec   : > { %v1395_v34 = vpop.f32.mrf.mxu1 }
 0x6ed   : > { %v1396_v35 = vadd.f32 %v1395_v34, %v1191_v32  ;;  %v1434_v36 = vpop.f32.mrf.mxu0  ;;  %v4541_v34 = vld [vmem:[%s4207_s25 + $0x8] sm:$0xff] }
 0x6ee   : > { %v1435_v37 = vadd.f32 %v1434_v36, %v1194_v33  ;;  %v3872_v33 = vld [vmem:[%s4218_s16 + $0x258] sm:$0xff] }
 0x6ef   : > { %v1594_v40 = vmax.f32 %v1396_v35, 0.0  ;;  %v3880_v36 = vld [vmem:[%s4218_s16 + $0x298] sm:$0xff] }
 0x6f0   : > { %v1597_v42 = vmax.f32 %v1435_v37, 0.0 }
 0x6f1   : > { %v1610_v1 = vpack.c.bf16 %v1594_v40, %v1594_v40  ;;  %v3862_v40 = vld [vmem:[%s4218_s16 + $0x208] sm:$0xff] }
 0x6f2   : > { %v1613_v47 = vpack.c.bf16 %v1597_v42, %v1597_v42  ;;  %v1408_v48 = vpop.f32.mrf.mxu2  ;;  %v1199_v42 = vperm.slane %v4541_v34, 0 }
 0x6f3   : > { %v1409_v49 = vadd.f32 %v1408_v48, %v1192_v41  ;;  %v1421_v50 = vpop.f32.mrf.mxu3  ;;  %2662 = vmatmul.bf16.vlgmr.msrb.gmra.mxu1 %v1610_v1  ;;  %v3886_v41 = vld [vmem:[%s4218_s16 + $0x2c8] sm:$0xff]  ;;  %v3871_v1 = vld [vmem:[%s4218_s16 + $0x250] sm:$0xff] }
 0x6f4   : > { %v1422_v52 = vadd.f32 %v1421_v50, %v1193_v44  ;;  %2701 = vmatmul.bf16.vlgmr.msra.gmra.mxu0 %v1613_v47  ;;  %2758 = vmatpush.bf16.msrb.mxu1 %v3868_v45  ;;  %v1397_v53 = vpop.f32.mrf.mxu1  ;;  %v1202_v45 = vperm.slane %v4541_v34, 3  ;;  %v3879_v47 = vld [vmem:[%s4218_s16 + $0x290] sm:$0xff] }
 0x6f5   : > { %v1595_v56 = vmax.f32 %v1409_v49, 0.0  ;;  %2797 = vmatpush.bf16.msra.mxu0 %v3892_v46  ;;  %v1436_v43 = vpop.f32.mrf.mxu0  ;;  %v3861_v49 = vld [vmem:[%s4218_s16 + $0x200] sm:$0xff] }
 0x6f6   : > { %v1596_v55 = vmax.f32 %v1422_v52, 0.0  ;;  %v3885_v53 = vld [vmem:[%s4218_s16 + $0x2c0] sm:$0xff]  ;;  %v3924_v43 = vld [vmem:[%s4218_s16 + $0x3f8] sm:$0xff] }
 0x6f7   : > { %v1611_v39 = vpack.c.bf16 %v1595_v56, %v1595_v56 }
 0x6f8   : > { %v1612_v59 = vpack.c.bf16 %v1596_v55, %v1596_v55  ;;  %2759 = vmatpush.bf16.msrb.mxu1 %v3867_v54  ;;  %v3900_v54 = vld [vmem:[%s4218_s16 + $0x338] sm:$0xff] }
 0x6f9   : > { %2798 = vmatpush.bf16.msra.mxu0 %v3891_v51  ;;  %2675 = vmatmul.bf16.vlgmr.msrb.gmra.mxu2 %v1611_v39  ;;  %v3870_v51 = vld [vmem:[%s4218_s16 + $0x248] sm:$0xff]  ;;  %v1200_v39 = vperm.slane %v4541_v34, 1 }
 0x6fa   : > { %2688 = vmatmul.bf16.vlgmr.msrb.gmra.mxu3 %v1612_v59  ;;  %2771 = vmatpush.bf16.msrb.mxu2 %v3876_v57  ;;  %v1410_v63 = vpop.f32.mrf.mxu2  ;;  %v3878_v57 = vld [vmem:[%s4218_s16 + $0x288] sm:$0xff]  ;;  %v1201_v59 = vperm.slane %v4541_v34, 2 }
 0x6fb   : > { %2784 = vmatpush.bf16.msrb.mxu3 %v3884_v58  ;;  %v1423_v3 = vpop.f32.mrf.mxu3 }
 0x6fc   : > { %2760 = vmatpush.bf16.msrb.mxu1 %v3866_v60  ;;  %v1447_v5 = vpop.f32.mrf.mxu1 }
 0x6fd   : > { %2799 = vmatpush.bf16.msra.mxu0 %v3890_v61  ;;  %v1448_v7 = vadd.f32 %v1447_v5, %v1195_v62  ;;  %v1486_v8 = vpop.f32.mrf.mxu0  ;;  %v3899_v61 = vld [vmem:[%s4218_s16 + $0x330] sm:$0xff]  ;;  %v3877_v5 = vld [vmem:[%s4218_s16 + $0x280] sm:$0xff] }
 0x6fe   : > { %v1487_v11 = vadd.f32 %v1486_v8, %v1198_v0  ;;  %2772 = vmatpush.bf16.msrb.mxu2 %v3875_v2  ;;  %v3923_v0 = vld [vmem:[%s4218_s16 + $0x3f0] sm:$0xff]  ;;  %v3869_v2 = vld [vmem:[%s4218_s16 + $0x240] sm:$0xff] }
 0x6ff   : > { %v1598_v13 = vmax.f32 %v1448_v7, 0.0  ;;  %2785 = vmatpush.bf16.msrb.mxu3 %v3883_v4 }
 0x700   : > { %v1601_v16 = vmax.f32 %v1487_v11, 0.0  ;;  %2761 = vmatpush.bf16.msrb.mxu1 %v3865_v6  ;;  %v3908_v6 = vld [vmem:[%s4218_s16 + $0x378] sm:$0xff] }
 0x701   : > { %v1614_v19 = vpack.c.bf16 %v1598_v13, %v1598_v13  ;;  %2800 = vmatpush.bf16.msra.mxu0 %v3889_v10  ;;  %v3916_v10 = vld [vmem:[%s4218_s16 + $0x3b8] sm:$0xff]  ;;  %v3898_v13 = vld [vmem:[%s4218_s16 + $0x328] sm:$0xff] }
 0x702   : > { %v1617_v21 = vpack.c.bf16 %v1601_v16, %v1601_v16  ;;  %2773 = vmatpush.bf16.msrb.mxu2 %v3874_v12  ;;  %v1460_v22 = vpop.f32.mrf.mxu2 }
 0x703   : > { %2786 = vmatpush.bf16.msrb.mxu3 %v3882_v14  ;;  %v1461_v9 = vadd.f32 %v1460_v22, %v1196_v15  ;;  %v1473_v24 = vpop.f32.mrf.mxu3  ;;  %2714 = vmatmul.bf16.vlgmr.msra.gmra.mxu1 %v1614_v19  ;;  %v3922_v15 = vld [vmem:[%s4218_s16 + $0x3e8] sm:$0xff]  ;;  %v3915_v19 = vld [vmem:[%s4218_s16 + $0x3b0] sm:$0xff]  ;;  %v3921_v22 = vld [vmem:[%s4218_s16 + $0x3e0] sm:$0xff] }
 0x704   : > { %v1474_v26 = vadd.f32 %v1473_v24, %v1197_v17  ;;  %2753 = vmatmul.bf16.vlgmr.msrb.gmra.mxu0 %v1617_v21  ;;  %2762 = vmatpush.bf16.msrb.mxu1 %v3864_v18  ;;  %v1449_v27 = vpop.f32.mrf.mxu1  ;;  %v3907_v17 = vld [vmem:[%s4218_s16 + $0x370] sm:$0xff] }
 0x705   : > { %v1599_v29 = vmax.f32 %v1461_v9, 0.0  ;;  %2801 = vmatpush.bf16.msra.mxu0 %v3888_v20  ;;  %v1488_v30 = vpop.f32.mrf.mxu0  ;;  %v3897_v20 = vld [vmem:[%s4218_s16 + $0x320] sm:$0xff]  ;;  %v3906_v9 = vld [vmem:[%s4218_s16 + $0x368] sm:$0xff]  ;;  %v3896_v27 = vld [vmem:[%s4218_s16 + $0x318] sm:$0xff] }
 0x706   : > { %v1600_v32 = vmax.f32 %v1474_v26, 0.0  ;;  %2774 = vmatpush.bf16.msrb.mxu2 %v3873_v23  ;;  %v3913_v30 = vld [vmem:[%s4218_s16 + $0x3a0] sm:$0xff] }
 0x707   : > { %v1615_v35 = vpack.c.bf16 %v1599_v29, %v1599_v29  ;;  %2787 = vmatpush.bf16.msrb.mxu3 %v3881_v25  ;;  %v3914_v25 = vld [vmem:[%s4218_s16 + $0x3a8] sm:$0xff]  ;;  %v3905_v29 = vld [vmem:[%s4218_s16 + $0x360] sm:$0xff] }
 0x708   : > { %v1616_v37 = vpack.c.bf16 %v1600_v32, %v1600_v32  ;;  %2763 = vmatpush.bf16.msrb.mxu1 %v3863_v28  ;;  %v3920_v28 = vld [vmem:[%s4218_s16 + $0x3d8] sm:$0xff]  ;;  %v1203_v32 = vperm.slane %v4541_v34, 4 }
 0x709   : > { %2802 = vmatpush.bf16.msra.mxu0 %v3887_v31  ;;  %2727 = vmatmul.bf16.vlgmr.msra.gmra.mxu2 %v1615_v35  ;;  %v3895_v31 = vld [vmem:[%s4218_s16 + $0x310] sm:$0xff] }
 0x70a   : > { %2740 = vmatmul.bf16.vlgmr.msra.gmra.mxu3 %v1616_v37  ;;  %2775 = vmatpush.bf16.msrb.mxu2 %v3872_v33  ;;  %v1462_v44 = vpop.f32.mrf.mxu2  ;;  %v3919_v35 = vld [vmem:[%s4218_s16 + $0x3d0] sm:$0xff] }
 0x70b   : > { %2788 = vmatpush.bf16.msrb.mxu3 %v3880_v36  ;;  %v1475_v46 = vpop.f32.mrf.mxu3  ;;  %v1206_v36 = vperm.slane %v4541_v34, 7 }
 0x70c   : > { %2764 = vmatpush.bf16.msrb.mxu1 %v3862_v40  ;;  %v1499_v48 = vpop.f32.mrf.mxu1  ;;  %v3904_v40 = vld [vmem:[%s4218_s16 + $0x358] sm:$0xff]  ;;  %v3918_v46 = vld [vmem:[%s4218_s16 + $0x3c8] sm:$0xff] }
 0x70d   : > { %2803 = vmatpush.bf16.msra.mxu0 %v3886_v41  ;;  %v1500_v50 = vadd.f32 %v1499_v48, %v1199_v42  ;;  %v1538_v52 = vpop.f32.mrf.mxu0  ;;  %v3912_v42 = vld [vmem:[%s4218_s16 + $0x398] sm:$0xff]  ;;  %v3903_v48 = vld [vmem:[%s4218_s16 + $0x350] sm:$0xff] }
 0x70e   : > { %v1539_v56 = vadd.f32 %v1538_v52, %v1202_v45  ;;  %2776 = vmatpush.bf16.msrb.mxu2 %v3871_v1  ;;  %v3894_v45 = vld [vmem:[%s4218_s16 + $0x308] sm:$0xff]  ;;  %v1205_v52 = vperm.slane %v4541_v34, 6 }
 0x70f   : > { %v1602_v55 = vmax.f32 %v1500_v50, 0.0  ;;  %2789 = vmatpush.bf16.msrb.mxu3 %v3879_v47  ;;  %v3911_v50 = vld [vmem:[%s4218_s16 + $0x390] sm:$0xff] }
 0x710   : > { %v1605_v58 = vmax.f32 %v1539_v56, 0.0  ;;  %2765 = vmatpush.bf16.msrb.mxu1 %v3861_v49  ;;  %v1204_v49 = vperm.slane %v4541_v34, 5 }
 0x711   : > { %v1618_v60 = vpack.c.bf16 %v1602_v55, %v1602_v55  ;;  %2804 = vmatpush.bf16.msra.mxu0 %v3885_v53  ;;  %v3893_v53 = vld [vmem:[%s4218_s16 + $0x300] sm:$0xff] }
 0x712   : > { %v1621_v62 = vpack.c.bf16 %v1605_v58, %v1605_v58  ;;  %2777 = vmatpush.bf16.msrb.mxu2 %v3870_v51  ;;  %v1512_v63 = vpop.f32.mrf.mxu2  ;;  %v3910_v58 = vld [vmem:[%s4218_s16 + $0x388] sm:$0xff] }
 0x713   : > { %2790 = vmatpush.bf16.msrb.mxu3 %v3878_v57  ;;  %v1513_v3 = vadd.f32 %v1512_v63, %v1200_v39  ;;  %v1525_v4 = vpop.f32.mrf.mxu3  ;;  %2766 = vmatmul.bf16.vlgmr.msrb.gmra.mxu1 %v1618_v60  ;;  %v3902_v57 = vld [vmem:[%s4218_s16 + $0x348] sm:$0xff]  ;;  %v3909_v63 = vld [vmem:[%s4218_s16 + $0x380] sm:$0xff] }
 0x714   : > { %2810 = vmatpush.bf16.msra.mxu1 %v3900_v54  ;;  %v1526_v7 = vadd.f32 %v1525_v4, %v1201_v59  ;;  %2805 = vmatmul.bf16.vlgmr.msra.gmra.mxu0 %v1621_v62  ;;  %v1501_v8 = vpop.f32.mrf.mxu1 }
 0x715   : > { %2849 = vmatpush.bf16.msrb.mxu0 %v3924_v43  ;;  %v1603_v11 = vmax.f32 %v1513_v3, 0.0  ;;  %v1540_v12 = vpop.f32.mrf.mxu0  ;;  %v3917_v43 = vld [vmem:[%s4218_s16 + $0x3c0] sm:$0xff] }
 0x716   : > { %v1604_v14 = vmax.f32 %v1526_v7, 0.0  ;;  %2778 = vmatpush.bf16.msrb.mxu2 %v3869_v2 }
 0x717   : > { %v1619_v16 = vpack.c.bf16 %v1603_v11, %v1603_v11  ;;  %2791 = vmatpush.bf16.msrb.mxu3 %v3877_v5 }
 0x718   : > { %2811 = vmatpush.bf16.msra.mxu1 %v3899_v61  ;;  %v1620_v18 = vpack.c.bf16 %v1604_v14, %v1604_v14  ;;  %v3901_v61 = vld [vmem:[%s4218_s16 + $0x340] sm:$0xff] }
 0x719   : > { %2850 = vmatpush.bf16.msrb.mxu0 %v3923_v0  ;;  %2779 = vmatmul.bf16.vlgmr.msrb.gmra.mxu2 %v1619_v16 }
 0x71a   : > { %2823 = vmatpush.bf16.msra.mxu2 %v3908_v6  ;;  %2792 = vmatmul.bf16.vlgmr.msrb.gmra.mxu3 %v1620_v18  ;;  %v1514_v21 = vpop.f32.mrf.mxu2 }
 0x71b   : > { %2836 = vmatpush.bf16.msra.mxu3 %v3916_v10  ;;  %v1527_v23 = vpop.f32.mrf.mxu3 }
 0x71c   : > { %2812 = vmatpush.bf16.msra.mxu1 %v3898_v13  ;;  %v1551_v24 = vpop.f32.mrf.mxu1 }
 0x71d   : > { %2851 = vmatpush.bf16.msrb.mxu0 %v3922_v15  ;;  %v1590_v26 = vpop.f32.mrf.mxu0  ;;  %v1552_v1 = vadd.f32 %v1551_v24, %v1203_v32 }
 0x71e   : > { %2824 = vmatpush.bf16.msra.mxu2 %v3907_v17  ;;  %v1591_v47 = vadd.f32 %v1590_v26, %v1206_v36  ;;  %v3978_v17 = vld [vmem:[%s679_s4] ss:$0 sm:$0xff] }
 0x71f   : > { %2837 = vmatpush.bf16.msra.mxu3 %v3915_v19  ;;  %v1606_v54 = vmax.f32 %v1552_v1, 0.0 }
 0x720   : > { %2813 = vmatpush.bf16.msra.mxu1 %v3897_v20  ;;  %v1609_v51 = vmax.f32 %v1591_v47, 0.0 }
 0x721   : > { %2852 = vmatpush.bf16.msrb.mxu0 %v3921_v22  ;;  %v1622_v60 = vpack.c.bf16 %v1606_v54, %v1606_v54 }
 0x722   : > { %2825 = vmatpush.bf16.msra.mxu2 %v3906_v9  ;;  %v1564_v33 = vpop.f32.mrf.mxu2  ;;  %v1625_v34 = vpack.c.bf16 %v1609_v51, %v1609_v51 }
 0x723   : > { %2838 = vmatpush.bf16.msra.mxu3 %v3914_v25  ;;  %v1577_v37 = vpop.f32.mrf.mxu3  ;;  %v1565_v39 = vadd.f32 %v1564_v33, %v1204_v49 }
 0x724   : > { %2814 = vmatpush.bf16.msra.mxu1 %v3896_v27  ;;  %v1553_v41 = vpop.f32.mrf.mxu1  ;;  %v1578_v59 = vadd.f32 %v1577_v37, %v1205_v52 }
 0x725   : > { %2853 = vmatpush.bf16.msrb.mxu0 %v3920_v28  ;;  %v1592_v44 = vpop.f32.mrf.mxu0  ;;  %v1607_v62 = vmax.f32 %v1565_v39, 0.0 }
 0x726   : > { %2826 = vmatpush.bf16.msra.mxu2 %v3905_v29  ;;  %v1608_v0 = vmax.f32 %v1578_v59, 0.0 }
 0x727   : > { %2839 = vmatpush.bf16.msra.mxu3 %v3913_v30  ;;  %v1623_v2 = vpack.c.bf16 %v1607_v62, %v1607_v62 }
 0x728   : > { %2815 = vmatpush.bf16.msra.mxu1 %v3895_v31  ;;  %v1624_v3 = vpack.c.bf16 %v1608_v0, %v1608_v0 }
 0x729   : > { %2854 = vmatpush.bf16.msrb.mxu0 %v3919_v35 }
 0x72a   : > { %2827 = vmatpush.bf16.msra.mxu2 %v3904_v40  ;;  %v1566_v56 = vpop.f32.mrf.mxu2 }
 0x72b   : > { %2840 = vmatpush.bf16.msra.mxu3 %v3912_v42  ;;  %v1579_v55 = vpop.f32.mrf.mxu3 }
 0x72c   : > { %2816 = vmatpush.bf16.msra.mxu1 %v3894_v45 }
 0x72d   : > { %2855 = vmatpush.bf16.msrb.mxu0 %v3918_v46 }
 0x72e   : > { %2828 = vmatpush.bf16.msra.mxu2 %v3903_v48 }
 0x72f   : > { %2841 = vmatpush.bf16.msra.mxu3 %v3911_v50 }
 0x730   : > { %2817 = vmatpush.bf16.msra.mxu1 %v3893_v53 }
 0x731   : > { %2856 = vmatpush.bf16.msrb.mxu0 %v3917_v43 }
 0x732   : > { %2829 = vmatpush.bf16.msra.mxu2 %v3902_v57 }
 0x733   : > { %2842 = vmatpush.bf16.msra.mxu3 %v3910_v58  ;;  %2818 = vmatmul.bf16.vlgmr.msra.gmra.mxu1 %v1622_v60 }
 0x734   : > { %2857 = vmatmul.bf16.vlgmr.msrb.gmra.mxu0 %v1625_v34 }
 0x736   : > { %2830 = vmatpush.bf16.msra.mxu2 %v3901_v61 }
 0x737   : > { %2843 = vmatpush.bf16.msra.mxu3 %v3909_v63 }
 0x739   : > { %2831 = vmatmul.bf16.vlgmr.msra.gmra.mxu2 %v1623_v2 }
 0x73a   : > { %2844 = vmatmul.bf16.vlgmr.msra.gmra.mxu3 %v1624_v3 }
 0x770   : > { %v2663_v4 = vpop.f32.mrf.mxu1 }
 0x771   : > { %v2702_v5 = vpop.f32.mrf.mxu0  ;;  %v2664_v20 = vadd.f32 %v3978_v17, %v2663_v4 }
 0x778   : > { %v2665_v6 = vpop.f32.mrf.mxu1 }
 0x779   : > { %v2704_v7 = vpop.f32.mrf.mxu0 }
 0x77c   : > { %v2676_v8 = vpop.f32.mrf.mxu2 }
 0x77d   : > { %v2689_v10 = vpop.f32.mrf.mxu3  ;;  %v2677_v23 = vadd.f32 %v2676_v8, %v2664_v20 }
 0x77f   : > { %v2690_v25 = vadd.f32 %v2689_v10, %v2677_v23 }
 0x780   : > { %v2715_v11 = vpop.f32.mrf.mxu1 }
 0x781   : > { %v2754_v12 = vpop.f32.mrf.mxu0  ;;  %v2703_v28 = vadd.f32 %v2702_v5, %v2690_v25 }
 0x783   : > { %v2716_v31 = vadd.f32 %v2715_v11, %v2703_v28 }
 0x784   : > { %v2678_v13 = vpop.f32.mrf.mxu2 }
 0x785   : > { %v2691_v14 = vpop.f32.mrf.mxu3 }
 0x788   : > { %v2717_v15 = vpop.f32.mrf.mxu1 }
 0x789   : > { %v2756_v16 = vpop.f32.mrf.mxu0 }
 0x78c   : > { %v2728_v18 = vpop.f32.mrf.mxu2 }
 0x78d   : > { %v2741_v19 = vpop.f32.mrf.mxu3  ;;  %v2729_v32 = vadd.f32 %v2728_v18, %v2716_v31 }
 0x78f   : > { %v2742_v33 = vadd.f32 %v2741_v19, %v2729_v32 }
 0x790   : > { %v2767_v21 = vpop.f32.mrf.mxu1 }
 0x791   : > { %v2806_v22 = vpop.f32.mrf.mxu0  ;;  %v2755_v37 = vadd.f32 %v2754_v12, %v2742_v33 }
 0x793   : > { %v2768_v40 = vadd.f32 %v2767_v21, %v2755_v37 }
 0x794   : > { %v2730_v9 = vpop.f32.mrf.mxu2 }
 0x795   : > { %v2743_v24 = vpop.f32.mrf.mxu3 }
 0x798   : > { %v2769_v26 = vpop.f32.mrf.mxu1 }
 0x799   : > { %v2808_v27 = vpop.f32.mrf.mxu0 }
 0x79c   : > { %v2780_v29 = vpop.f32.mrf.mxu2 }
 0x79d   : > { %v2793_v30 = vpop.f32.mrf.mxu3  ;;  %v2781_v42 = vadd.f32 %v2780_v29, %v2768_v40 }
 0x79f   : > { %v2794_v45 = vadd.f32 %v2793_v30, %v2781_v42 }
 0x7a1   : > { %v2807_v46 = vadd.f32 %v2806_v22, %v2794_v45 }
 0x7a4   : > { %v2782_v35 = vpop.f32.mrf.mxu2 }
 0x7a5   : > { %v2795_v36 = vpop.f32.mrf.mxu3 }
 0x7b0   : > { %v2819_v41 = vpop.f32.mrf.mxu1 }
 0x7b1   : > { %v2858_v44 = vpop.f32.mrf.mxu0  ;;  %v2820_v48 = vadd.f32 %v2819_v41, %v2807_v46 }
 0x7b8   : > { %v2821_v1 = vpop.f32.mrf.mxu1 }
 0x7b9   : > { %v2860_v47 = vpop.f32.mrf.mxu0 }
 0x7bc   : > { %v2832_v49 = vpop.f32.mrf.mxu2 }
 0x7bd   : > { %v2833_v50 = vadd.f32 %v2832_v49, %v2820_v48  ;;  %v2845_v52 = vpop.f32.mrf.mxu3 }
 0x7bf   : > { %v2846_v53 = vadd.f32 %v2845_v52, %v2833_v50 }
 0x7c1   : > { %v2859_v54 = vadd.f32 %v2858_v44, %v2846_v53 }
 0x7c3   : > { %v2862_v56 = vadd.f32 %v2859_v54, %v4323_v38 }
 0x7c4   : > { %v2834_v43 = vpop.f32.mrf.mxu2 }
 0x7c5   : > { %2863 = vst.msk [vmem:[%s4227_s29] sm:$0xff] %vm696_vm1, %v2862_v56  ;;  %v2847_v51 = vpop.f32.mrf.mxu3 }
 0x7c6 PF: > { %s4672_s4 = sld [smem:[#allocation5_spill]] }
 0x7c7   : > { %s4673_s29 = sld [smem:[#allocation3_spill]] }
 0x7c8   : > { %s4674_s30 = sld [smem:[#allocation4_spill]] }
 0x7c9   : > { %s4675_s15 = sld [smem:[#allocation6_spill]] }
 0x7ca   : > { %s4676_s16 = sld [smem:[#allocation7_spill]] }
 0x7cc   : > { %s24_s17 = sadd.s32 1, %s4672_s4  }
 0x7cd   : > { %p21_p8 = scmp.ge.s32.totalorder %s24_s17, 6  }
 0x7cf   :  { %23 = sbr.rel (!%p21_p8) target bundleno = 10 (0xa), region = 152 }

</bundles_post_ra>
